<compile_context>
chip_gen: v5e
topology: v5e:2x2
jax: 0.10.0
libtpu: 0.0.40
codegen_flags: <defaults>
</compile_context>

<pallas_src>
import functools
import math

import jax
import jax.numpy as jnp
from jax.experimental import pallas as pl
from jax.experimental.pallas import tpu as pltpu

_LN_EPS = 1e-5
_NEG_INF = jnp.float32(-1e30)
_VMEM_LIMIT = 48 * 1024 * 1024   # headroom under v7x's 64 MiB physical VMEM


def _layernorm(y, g, b, eps):
    mu = jnp.mean(y, axis=-1, keepdims=True)
    var = jnp.mean((y - mu) ** 2, axis=-1, keepdims=True)
    return (y - mu) * jax.lax.rsqrt(var + eps) * g + b


def _mha(x, kv_src, wq, bq, wkv, bkv, wo, bo, bias, oc_scr, *, num_heads, scale):
    """Multi-head attention for one batch element: x (T,E) queries, kv_src (S,E)."""
    E = x.shape[-1]
    Dh = E // num_heads

    # Fused projections: bf16 MXU operands, f32 accumulation.
    q = (jnp.dot(x.astype(jnp.bfloat16), wq,
                 preferred_element_type=jnp.float32) + bq).astype(jnp.bfloat16)
    kv = (jnp.dot(kv_src.astype(jnp.bfloat16), wkv,
                  preferred_element_type=jnp.float32) + bkv)
    k = kv[:, :E].astype(jnp.bfloat16)        # (S, E) — head slices start at h*Dh
    v = kv[:, E:].astype(jnp.bfloat16)        # (S, E) — head slices start at h*Dh

    for h in range(num_heads):                # Python unroll => static offsets
        lo = h * Dh
        s = jax.lax.dot_general(q[:, lo:lo + Dh], k[:, lo:lo + Dh],
                                (((1,), (1,)), ((), ())),
                                preferred_element_type=jnp.float32) * scale
        if bias is not None:
            s = s + bias
        m = jnp.max(s, axis=-1, keepdims=True)
        p = jnp.exp(s - m)
        p = p / jnp.sum(p, axis=-1, keepdims=True)        # exact softmax
        o_h = jnp.dot(p.astype(jnp.bfloat16), v[:, lo:lo + Dh],
                      preferred_element_type=jnp.float32)  # (T, Dh) f32
        oc_scr[:, lo:lo + Dh] = o_h.astype(jnp.bfloat16)

    # Single concatenated-heads output projection: (T,E)@(E,E), bf16, K = E.
    return jnp.dot(oc_scr[...], wo, preferred_element_type=jnp.float32) + bo


# ---------------------------------------------------------------------------
# Fused decoder layer (self-attn + cross-attn + FFN, post-norm) — one call.
# ---------------------------------------------------------------------------
def _decoder_layer_kernel(*refs, num_heads, eps, has_mask):
    x_ref, mem_ref = refs[0], refs[1]
    idx = 2
    if has_mask:
        bias_ref = refs[idx]
        idx += 1
    else:
        bias_ref = None
    (wq_s, bq_s, wkv_s, bkv_s, wo_s, bo_s, g1, be1,
     wq_c, bq_c, wkv_c, bkv_c, wo_c, bo_c, g2, be2,
     w1, b1, w2, b2, g3, be3) = refs[idx:idx + 22]
    o_ref = refs[idx + 22]
    oc_scr = refs[idx + 23]                     # (T, E) bf16 scratch

    x = x_ref[0]                                # (T, E) f32
    mem = mem_ref[0]                            # (S, E) f32
    E = x.shape[-1]
    scale = 1.0 / math.sqrt(E // num_heads)
    bias = bias_ref[...] if has_mask else None

    # --- self-attention + residual + LayerNorm (dropout = identity, eval) ---
    sa = _mha(x, x, wq_s[...], bq_s[...], wkv_s[...], bkv_s[...],
              wo_s[...], bo_s[...], bias, oc_scr,
              num_heads=num_heads, scale=scale)
    x = _layernorm(x + sa, g1[...], be1[...], eps)

    # --- cross-attention on encoder memory (memory mask is None) ---
    ca = _mha(x, mem, wq_c[...], bq_c[...], wkv_c[...], bkv_c[...],
              wo_c[...], bo_c[...], None, oc_scr,
              num_heads=num_heads, scale=scale)
    x = _layernorm(x + ca, g2[...], be2[...], eps)

    # --- feed-forward (ReLU) + residual + LayerNorm ---
    h = jnp.maximum(jnp.dot(x.astype(jnp.bfloat16), w1[...],
                            preferred_element_type=jnp.float32) + b1[...], 0.0)
    ff = jnp.dot(h.astype(jnp.bfloat16), w2[...],
                 preferred_element_type=jnp.float32) + b2[...]
    x = _layernorm(x + ff, g3[...], be3[...], eps)

    o_ref[0] = x


def _decoder_layer(x, memory, layer, bias, num_heads):
    B, T, E = x.shape
    S = memory.shape[1]
    Hd = layer["lin1_w"].shape[1]
    has_mask = bias is not None

    def full2(shape):
        return pl.BlockSpec(shape, lambda b: (0, 0))

    in_specs = [pl.BlockSpec((1, T, E), lambda b: (b, 0, 0)),      # x
                pl.BlockSpec((1, S, E), lambda b: (b, 0, 0))]      # memory
    args = [x, memory]
    if has_mask:
        in_specs.append(full2((T, T)))
        args.append(bias)

    def attn_pack(p):
        specs = [full2((E, E)), full2((1, E)), full2((E, 2 * E)),
                 full2((1, 2 * E)), full2((E, E)), full2((1, E))]
        a = [p["wq"], p["bq"], p["wkv"], p["bkv"], p["wo"], p["bo"]]
        return specs, a

    s_specs, s_args = attn_pack(layer["self_attn"])
    c_specs, c_args = attn_pack(layer["cross_attn"])
    in_specs += s_specs + [full2((1, E)), full2((1, E))]
    args += s_args + [layer["norm1_w"], layer["norm1_b"]]
    in_specs += c_specs + [full2((1, E)), full2((1, E))]
    args += c_args + [layer["norm2_w"], layer["norm2_b"]]
    in_specs += [full2((E, Hd)), full2((1, Hd)), full2((Hd, E)),
                 full2((1, E)), full2((1, E)), full2((1, E))]
    args += [layer["lin1_w"], layer["lin1_b"], layer["lin2_w"], layer["lin2_b"],
             layer["norm3_w"], layer["norm3_b"]]

    kernel = functools.partial(_decoder_layer_kernel, num_heads=num_heads,
                               eps=_LN_EPS, has_mask=has_mask)
    return pl.pallas_call(
        kernel,
        out_shape=jax.ShapeDtypeStruct((B, T, E), jnp.float32),
        grid=(B,),
        in_specs=in_specs,
        out_specs=pl.BlockSpec((1, T, E), lambda b: (b, 0, 0)),
        scratch_shapes=[pltpu.VMEM((T, E), jnp.bfloat16)],
        compiler_params=pltpu.CompilerParams(
            dimension_semantics=("parallel",),
            vmem_limit_bytes=_VMEM_LIMIT),
    )(*args)


# ---------------------------------------------------------------------------
# Final vocab projection: x resident, fc_w streamed exactly once over the grid.
# ---------------------------------------------------------------------------
def _vocab_proj_kernel(x_ref, w_ref, b_ref, o_ref):
    o_ref[...] = (jnp.dot(x_ref[...].astype(jnp.bfloat16), w_ref[...],
                          preferred_element_type=jnp.float32) + b_ref[...])


def _vocab_proj(x2d, w, b, *, tn):
    BT, E = x2d.shape
    Vp = w.shape[1]
    assert Vp % tn == 0
    return pl.pallas_call(
        _vocab_proj_kernel,
        out_shape=jax.ShapeDtypeStruct((BT, Vp), jnp.float32),
        grid=(Vp // tn,),
        in_specs=[
            # Constant block index: activations stay VMEM-resident across all
            # vocab tiles; fc_w (dominant HBM traffic) is streamed exactly once.
            pl.BlockSpec((BT, E), lambda j: (0, 0)),
            pl.BlockSpec((E, tn), lambda j: (0, j)),
            pl.BlockSpec((1, tn), lambda j: (0, j)),
        ],
        out_specs=pl.BlockSpec((BT, tn), lambda j: (0, j)),
        compiler_params=pltpu.CompilerParams(
            dimension_semantics=("parallel",),
            vmem_limit_bytes=_VMEM_LIMIT),
    )(x2d, w, b)


# ---------------------------------------------------------------------------
# Forward pass (matches TransformerDecoder.forward in eval mode)
# ---------------------------------------------------------------------------
def transformer_decoder_forward(params, captions, encoder_output, mask=None, *,
                                num_heads, vocab_size):
    """Post-norm decoder layers, ReLU FFN, eval mode (dropout = identity)."""
    B, T = captions.shape
    max_seq_len = params["pos_enc"].shape[1]
    # TODO(synk): the reference dynamically grows positional_encoding past
    # max_seq_len; here we require T <= max_seq_len (static check).
    assert T <= max_seq_len, (T, max_seq_len)

    x = jnp.take(params["embedding"], captions, axis=0) + params["pos_enc"][:, :T, :]
    x = x.astype(jnp.float32)

    if mask is None:
        tgt_bias = None
    elif mask.dtype == jnp.bool_:
        # PyTorch bool attn_mask: True => position is NOT allowed to attend.
        tgt_bias = jnp.where(mask, _NEG_INF, jnp.float32(0.0))
    else:
        tgt_bias = mask.astype(jnp.float32)

    memory = encoder_output.astype(jnp.float32)
    for layer in params["layers"]:
        x = _decoder_layer(x, memory, layer, tgt_bias, num_heads)

    E = x.shape[-1]
    Vp = params["fc_w"].shape[1]
    tn = 512 if Vp % 512 == 0 else (256 if Vp % 256 == 0 else 128)
    tn = min(tn, Vp)
    logits = _vocab_proj(x.reshape(B * T, E), params["fc_w"], params["fc_b"], tn=tn)
    logits = logits.reshape(B, T, Vp)
    if Vp == vocab_size:
        return logits
    # TODO(synk): padded vocab columns could be dropped via a masked store in
    # the last vocab tile instead of this XLA slice.
    return logits[:, :, :vocab_size]


# ---------------------------------------------------------------------------
# Parameter initialization (PyTorch-like shapes) + kernel-layout preprocessing
# ---------------------------------------------------------------------------
def init_params(key, vocab_size, embed_size, hidden_size, num_layers, max_seq_len):
    keys = iter(jax.random.split(key, 16 + num_layers * 32))

    def w(shape, scale=0.05):
        return jax.random.normal(next(keys), shape, jnp.float32) * scale

    def attn_params():
        # in_proj_weight (3E, E) split into q/k/v; stored pre-transposed as (E, E).
        return {
            "wq": w((embed_size, embed_size)), "bq": w((embed_size,)),
            "wk": w((embed_size, embed_size)), "bk": w((embed_size,)),
            "wv": w((embed_size, embed_size)), "bv": w((embed_size,)),
            "wo": w((embed_size, embed_size)), "bo": w((embed_size,)),
        }

    params = {
        "embedding": w((vocab_size, embed_size), 1.0),
        "pos_enc": w((1, max_seq_len, embed_size), 0.02),
        "fc_w": w((embed_size, vocab_size)),
        "fc_b": w((vocab_size,)),
        "layers": [],
    }
    for _ in range(num_layers):
        params["layers"].append({
            "self_attn": attn_params(),
            "cross_attn": attn_params(),
            "lin1_w": w((embed_size, hidden_size)), "lin1_b": w((hidden_size,)),
            "lin2_w": w((hidden_size, embed_size)), "lin2_b": w((embed_size,)),
            "norm1_w": jnp.ones((embed_size,), jnp.float32),
            "norm1_b": jnp.zeros((embed_size,), jnp.float32),
            "norm2_w": jnp.ones((embed_size,), jnp.float32),
            "norm2_b": jnp.zeros((embed_size,), jnp.float32),
            "norm3_w": jnp.ones((embed_size,), jnp.float32),
            "norm3_b": jnp.zeros((embed_size,), jnp.float32),
        })
    return params


def prepare_params(raw):
    """One-time preprocessing into the kernel-friendly layout:
    - concatenated K|V projection weight (E, 2E); all matmul weights bf16,
    - biases / LayerNorm params reshaped to (1, N) float32,
    - vocab projection zero-padded to a lane-dense tile multiple (bf16)."""
    V = raw["fc_w"].shape[1]
    mult = 512 if V >= 512 else 128
    Vp = ((V + mult - 1) // mult) * mult

    def attn(p):
        return {
            "wq": p["wq"].astype(jnp.bfloat16),
            "bq": p["bq"].reshape(1, -1),
            "wkv": jnp.concatenate([p["wk"], p["wv"]], axis=1).astype(jnp.bfloat16),
            "bkv": jnp.concatenate([p["bk"], p["bv"]]).reshape(1, -1),
            "wo": p["wo"].astype(jnp.bfloat16),
            "bo": p["bo"].reshape(1, -1),
        }

    out = {
        "embedding": raw["embedding"],
        "pos_enc": raw["pos_enc"],
        "fc_w": jnp.pad(raw["fc_w"], ((0, 0), (0, Vp - V))).astype(jnp.bfloat16),
        "fc_b": jnp.pad(raw["fc_b"], (0, Vp - V)).reshape(1, -1),
        "layers": [],
    }
    for lyr in raw["layers"]:
        out["layers"].append({
            "self_attn": attn(lyr["self_attn"]),
            "cross_attn": attn(lyr["cross_attn"]),
            "lin1_w": lyr["lin1_w"].astype(jnp.bfloat16),
            "lin1_b": lyr["lin1_b"].reshape(1, -1),
            "lin2_w": lyr["lin2_w"].astype(jnp.bfloat16),
            "lin2_b": lyr["lin2_b"].reshape(1, -1),
            "norm1_w": lyr["norm1_w"].reshape(1, -1),
            "norm1_b": lyr["norm1_b"].reshape(1, -1),
            "norm2_w": lyr["norm2_w"].reshape(1, -1),
            "norm2_b": lyr["norm2_b"].reshape(1, -1),
            "norm3_w": lyr["norm3_w"].reshape(1, -1),
            "norm3_b": lyr["norm3_b"].reshape(1, -1),
        })
    return out


if __name__ == "__main__":
    vocab_size, embed_size, hidden_size = 50, 32, 64
    num_heads, num_layers, max_seq_len = 4, 2, 16
    B, T, S = 2, 8, 8

    key = jax.random.PRNGKey(0)
    kp, kc, ke = jax.random.split(key, 3)
    raw = init_params(kp, vocab_size, embed_size, hidden_size, num_layers, max_seq_len)
    params = prepare_params(raw)
    captions = jax.random.randint(kc, (B, T), 0, vocab_size, dtype=jnp.int32)
    encoder_output = jax.random.normal(ke, (B, S, embed_size), jnp.float32)

    fwd = jax.jit(functools.partial(transformer_decoder_forward,
                                    num_heads=num_heads, vocab_size=vocab_size))
    out = fwd(params, captions, encoder_output, None)
    jax.block_until_ready(out)
    assert out.shape == (B, T, vocab_size), out.shape
    assert bool(jnp.all(jnp.isfinite(out)))
    print("KERNEL_OK")
</pallas_src>

<mosaic_0001>
module attributes {stable_mosaic.version = 11 : i64} {
  func.func @_vocab_proj_kernel(%arg0: i32, %arg1: memref<16x32xf32, #tpu.memory_space<vmem>>, %arg2: memref<32x128xbf16, #tpu.memory_space<vmem>>, %arg3: memref<1x128xf32, #tpu.memory_space<vmem>>, %arg4: memref<16x128xf32, #tpu.memory_space<vmem>>) attributes {dimension_semantics = [#tpu.dimension_semantics<parallel>], iteration_bounds = array<i64: 1>, scalar_prefetch = 0 : i64, scratch_operands = 0 : i64, tpu.core_type = #tpu.core_type<tc>, window_params = [{pipeline_mode = #tpu.pipeline_mode<synchronous>, transform_indices = @transform_0, window_bounds = array<i64: 16, 32>}, {transform_indices = @transform_1, window_bounds = array<i64: 32, 128>}, {transform_indices = @transform_2, window_bounds = array<i64: 1, 128>}, {transform_indices = @transform_3, window_bounds = array<i64: 16, 128>}]} {
    %c0 = arith.constant 0 : index
    %c0_0 = arith.constant 0 : index
    %0 = vector.load %arg1[%c0, %c0_0] : memref<16x32xf32, #tpu.memory_space<vmem>>, vector<16x32xf32>
    %1 = arith.truncf %0 : vector<16x32xf32> to vector<16x32xbf16>
    %c0_1 = arith.constant 0 : index
    %c0_2 = arith.constant 0 : index
    %2 = vector.load %arg2[%c0_1, %c0_2] : memref<32x128xbf16, #tpu.memory_space<vmem>>, vector<32x128xbf16>
    %cst = arith.constant dense<0.000000e+00> : vector<16x128xf32>
    %3 = tpu.matmul %1, %2, %cst {dimension_numbers = #tpu.dot_dimension_numbers<[1], [0], [0], [1], [0, 0, 1, 1], [], []>} : vector<16x32xbf16>, vector<32x128xbf16>, vector<16x128xf32> -> vector<16x128xf32>
    %c0_3 = arith.constant 0 : index
    %c0_4 = arith.constant 0 : index
    %4 = vector.load %arg3[%c0_3, %c0_4] : memref<1x128xf32, #tpu.memory_space<vmem>>, vector<1x128xf32>
    %5 = vector.broadcast %4 : vector<1x128xf32> to vector<16x128xf32>
    %6 = arith.addf %3, %5 : vector<16x128xf32>
    %c0_5 = arith.constant 0 : index
    %c0_6 = arith.constant 0 : index
    %7 = vector.load %arg4[%c0_5, %c0_6] : memref<16x128xf32, #tpu.memory_space<vmem>>, vector<16x128xf32>
    tpu.vector_store %arg4[%c0_5, %c0_6], %6 {strides = array<i32>} : memref<16x128xf32, #tpu.memory_space<vmem>>, vector<16x128xf32>,
    return
  }
  func.func @transform_0(%arg0: i32) -> (i32, i32) {
    %c0_i32 = arith.constant 0 : i32
    %c0_i32_0 = arith.constant 0 : i32
    %c0_i32_1 = arith.constant 0 : i32
    return %c0_i32, %c0_i32_0 : i32, i32
  }
  func.func @transform_1(%arg0: i32) -> (i32, i32) {
    %c0_i32 = arith.constant 0 : i32
    %c0_i32_0 = arith.constant 0 : i32
    return %c0_i32, %arg0 : i32, i32
  }
  func.func @transform_2(%arg0: i32) -> (i32, i32) {
    %c0_i32 = arith.constant 0 : i32
    %c0_i32_0 = arith.constant 0 : i32
    return %c0_i32, %arg0 : i32, i32
  }
  func.func @transform_3(%arg0: i32) -> (i32, i32) {
    %c0_i32 = arith.constant 0 : i32
    %c0_i32_0 = arith.constant 0 : i32
    return %c0_i32, %arg0 : i32, i32
  }
}

module attributes {stable_mosaic.version = 11 : i64} {
  func.func @_decoder_layer_kernel(%arg0: i32, %arg1: memref<1x8x32xf32, #tpu.memory_space<vmem>>, %arg2: memref<1x8x32xf32, #tpu.memory_space<vmem>>, %arg3: memref<32x32xbf16, #tpu.memory_space<vmem>>, %arg4: memref<1x32xf32, #tpu.memory_space<vmem>>, %arg5: memref<32x64xbf16, #tpu.memory_space<vmem>>, %arg6: memref<1x64xf32, #tpu.memory_space<vmem>>, %arg7: memref<32x32xbf16, #tpu.memory_space<vmem>>, %arg8: memref<1x32xf32, #tpu.memory_space<vmem>>, %arg9: memref<1x32xf32, #tpu.memory_space<vmem>>, %arg10: memref<1x32xf32, #tpu.memory_space<vmem>>, %arg11: memref<32x32xbf16, #tpu.memory_space<vmem>>, %arg12: memref<1x32xf32, #tpu.memory_space<vmem>>, %arg13: memref<32x64xbf16, #tpu.memory_space<vmem>>, %arg14: memref<1x64xf32, #tpu.memory_space<vmem>>, %arg15: memref<32x32xbf16, #tpu.memory_space<vmem>>, %arg16: memref<1x32xf32, #tpu.memory_space<vmem>>, %arg17: memref<1x32xf32, #tpu.memory_space<vmem>>, %arg18: memref<1x32xf32, #tpu.memory_space<vmem>>, %arg19: memref<32x64xbf16, #tpu.memory_space<vmem>>, %arg20: memref<1x64xf32, #tpu.memory_space<vmem>>, %arg21: memref<64x32xbf16, #tpu.memory_space<vmem>>, %arg22: memref<1x32xf32, #tpu.memory_space<vmem>>, %arg23: memref<1x32xf32, #tpu.memory_space<vmem>>, %arg24: memref<1x32xf32, #tpu.memory_space<vmem>>, %arg25: memref<1x8x32xf32, #tpu.memory_space<vmem>>, %arg26: memref<8x32xbf16, #tpu.memory_space<vmem>>) attributes {dimension_semantics = [#tpu.dimension_semantics<parallel>], iteration_bounds = array<i64: 2>, scalar_prefetch = 0 : i64, scratch_operands = 1 : i64, tpu.core_type = #tpu.core_type<tc>, window_params = [{transform_indices = @transform_0, window_bounds = array<i64: 1, 8, 32>}, {transform_indices = @transform_1, window_bounds = array<i64: 1, 8, 32>}, {pipeline_mode = #tpu.pipeline_mode<synchronous>, transform_indices = @transform_2, window_bounds = array<i64: 32, 32>}, {pipeline_mode = #tpu.pipeline_mode<synchronous>, transform_indices = @transform_3, window_bounds = array<i64: 1, 32>}, {pipeline_mode = #tpu.pipeline_mode<synchronous>, transform_indices = @transform_4, window_bounds = array<i64: 32, 64>}, {pipeline_mode = #tpu.pipeline_mode<synchronous>, transform_indices = @transform_5, window_bounds = array<i64: 1, 64>}, {pipeline_mode = #tpu.pipeline_mode<synchronous>, transform_indices = @transform_6, window_bounds = array<i64: 32, 32>}, {pipeline_mode = #tpu.pipeline_mode<synchronous>, transform_indices = @transform_7, window_bounds = array<i64: 1, 32>}, {pipeline_mode = #tpu.pipeline_mode<synchronous>, transform_indices = @transform_8, window_bounds = array<i64: 1, 32>}, {pipeline_mode = #tpu.pipeline_mode<synchronous>, transform_indices = @transform_9, window_bounds = array<i64: 1, 32>}, {pipeline_mode = #tpu.pipeline_mode<synchronous>, transform_indices = @transform_10, window_bounds = array<i64: 32, 32>}, {pipeline_mode = #tpu.pipeline_mode<synchronous>, transform_indices = @transform_11, window_bounds = array<i64: 1, 32>}, {pipeline_mode = #tpu.pipeline_mode<synchronous>, transform_indices = @transform_12, window_bounds = array<i64: 32, 64>}, {pipeline_mode = #tpu.pipeline_mode<synchronous>, transform_indices = @transform_13, window_bounds = array<i64: 1, 64>}, {pipeline_mode = #tpu.pipeline_mode<synchronous>, transform_indices = @transform_14, window_bounds = array<i64: 32, 32>}, {pipeline_mode = #tpu.pipeline_mode<synchronous>, transform_indices = @transform_15, window_bounds = array<i64: 1, 32>}, {pipeline_mode = #tpu.pipeline_mode<synchronous>, transform_indices = @transform_16, window_bounds = array<i64: 1, 32>}, {pipeline_mode = #tpu.pipeline_mode<synchronous>, transform_indices = @transform_17, window_bounds = array<i64: 1, 32>}, {pipeline_mode = #tpu.pipeline_mode<synchronous>, transform_indices = @transform_18, window_bounds = array<i64: 32, 64>}, {pipeline_mode = #tpu.pipeline_mode<synchronous>, transform_indices = @transform_19, window_bounds = array<i64: 1, 64>}, {pipeline_mode = #tpu.pipeline_mode<synchronous>, transform_indices = @transform_20, window_bounds = array<i64: 64, 32>}, {pipeline_mode = #tpu.pipeline_mode<synchronous>, transform_indices = @transform_21, window_bounds = array<i64: 1, 32>}, {pipeline_mode = #tpu.pipeline_mode<synchronous>, transform_indices = @transform_22, window_bounds = array<i64: 1, 32>}, {pipeline_mode = #tpu.pipeline_mode<synchronous>, transform_indices = @transform_23, window_bounds = array<i64: 1, 32>}, {transform_indices = @transform_24, window_bounds = array<i64: 1, 8, 32>}]} {
    %c0 = arith.constant 0 : index
    %c0_0 = arith.constant 0 : index
    %c0_1 = arith.constant 0 : index
    %0 = vector.load %arg1[%c0, %c0_0, %c0_1] : memref<1x8x32xf32, #tpu.memory_space<vmem>>, vector<1x8x32xf32>
    %1 = vector.shape_cast %0 : vector<1x8x32xf32> to vector<8x32xf32>
    %c0_2 = arith.constant 0 : index
    %c0_3 = arith.constant 0 : index
    %c0_4 = arith.constant 0 : index
    %2 = vector.load %arg2[%c0_2, %c0_3, %c0_4] : memref<1x8x32xf32, #tpu.memory_space<vmem>>, vector<1x8x32xf32>
    %3 = vector.shape_cast %2 : vector<1x8x32xf32> to vector<8x32xf32>
    %c0_5 = arith.constant 0 : index
    %c0_6 = arith.constant 0 : index
    %4 = vector.load %arg3[%c0_5, %c0_6] : memref<32x32xbf16, #tpu.memory_space<vmem>>, vector<32x32xbf16>
    %c0_7 = arith.constant 0 : index
    %c0_8 = arith.constant 0 : index
    %5 = vector.load %arg4[%c0_7, %c0_8] : memref<1x32xf32, #tpu.memory_space<vmem>>, vector<1x32xf32>
    %c0_9 = arith.constant 0 : index
    %c0_10 = arith.constant 0 : index
    %6 = vector.load %arg5[%c0_9, %c0_10] : memref<32x64xbf16, #tpu.memory_space<vmem>>, vector<32x64xbf16>
    %c0_11 = arith.constant 0 : index
    %c0_12 = arith.constant 0 : index
    %7 = vector.load %arg6[%c0_11, %c0_12] : memref<1x64xf32, #tpu.memory_space<vmem>>, vector<1x64xf32>
    %c0_13 = arith.constant 0 : index
    %c0_14 = arith.constant 0 : index
    %8 = vector.load %arg7[%c0_13, %c0_14] : memref<32x32xbf16, #tpu.memory_space<vmem>>, vector<32x32xbf16>
    %c0_15 = arith.constant 0 : index
    %c0_16 = arith.constant 0 : index
    %9 = vector.load %arg8[%c0_15, %c0_16] : memref<1x32xf32, #tpu.memory_space<vmem>>, vector<1x32xf32>
    %10 = arith.truncf %1 : vector<8x32xf32> to vector<8x32xbf16>
    %cst = arith.constant dense<0.000000e+00> : vector<8x32xf32>
    %11 = tpu.matmul %10, %4, %cst {dimension_numbers = #tpu.dot_dimension_numbers<[1], [0], [0], [1], [0, 0, 1, 1], [], []>} : vector<8x32xbf16>, vector<32x32xbf16>, vector<8x32xf32> -> vector<8x32xf32>
    %12 = vector.broadcast %5 : vector<1x32xf32> to vector<8x32xf32>
    %13 = arith.addf %11, %12 : vector<8x32xf32>
    %14 = arith.truncf %13 : vector<8x32xf32> to vector<8x32xbf16>
    %15 = arith.truncf %1 : vector<8x32xf32> to vector<8x32xbf16>
    %cst_17 = arith.constant dense<0.000000e+00> : vector<8x64xf32>
    %16 = tpu.matmul %15, %6, %cst_17 {dimension_numbers = #tpu.dot_dimension_numbers<[1], [0], [0], [1], [0, 0, 1, 1], [], []>} : vector<8x32xbf16>, vector<32x64xbf16>, vector<8x64xf32> -> vector<8x64xf32>
    %17 = vector.broadcast %7 : vector<1x64xf32> to vector<8x64xf32>
    %18 = arith.addf %16, %17 : vector<8x64xf32>
    %19 = vector.extract_strided_slice %18 {offsets = [0, 0], sizes = [8, 32], strides = [1, 1]} : vector<8x64xf32> to vector<8x32xf32>
    %20 = arith.truncf %19 : vector<8x32xf32> to vector<8x32xbf16>
    %21 = vector.extract_strided_slice %18 {offsets = [0, 32], sizes = [8, 32], strides = [1, 1]} : vector<8x64xf32> to vector<8x32xf32>
    %22 = arith.truncf %21 : vector<8x32xf32> to vector<8x32xbf16>
    %23 = vector.extract_strided_slice %14 {offsets = [0, 0], sizes = [8, 8], strides = [1, 1]} : vector<8x32xbf16> to vector<8x8xbf16>
    %24 = vector.extract_strided_slice %20 {offsets = [0, 0], sizes = [8, 8], strides = [1, 1]} : vector<8x32xbf16> to vector<8x8xbf16>
    %cst_18 = arith.constant dense<0.000000e+00> : vector<8x8xf32>
    %25 = tpu.matmul %23, %24, %cst_18 {dimension_numbers = #tpu.dot_dimension_numbers<[1], [1], [0], [0], [0, 0, 1, 0], [], []>} : vector<8x8xbf16>, vector<8x8xbf16>, vector<8x8xf32> -> vector<8x8xf32>
    %cst_19 = arith.constant 0.353553385 : f32
    %26 = vector.broadcast %cst_19 : f32 to vector<8x8xf32>
    %27 = arith.mulf %25, %26 : vector<8x8xf32>
    %cst_20 = arith.constant dense<0xFF800000> : vector<8xf32>
    %28 = vector.multi_reduction <maximumf>, %27, %cst_20 [1] : vector<8x8xf32> to vector<8xf32>
    %29 = vector.shape_cast %28 : vector<8xf32> to vector<8x1xf32>
    %30 = vector.broadcast %29 : vector<8x1xf32> to vector<8x8xf32>
    %31 = arith.subf %27, %30 : vector<8x8xf32>
    %32 = math.exp %31 : vector<8x8xf32>
    %cst_21 = arith.constant dense<0.000000e+00> : vector<8xf32>
    %33 = vector.multi_reduction <add>, %32, %cst_21 [1] : vector<8x8xf32> to vector<8xf32>
    %34 = vector.shape_cast %33 : vector<8xf32> to vector<8x1xf32>
    %35 = vector.broadcast %34 : vector<8x1xf32> to vector<8x8xf32>
    %36 = arith.divf %32, %35 : vector<8x8xf32>
    %37 = arith.truncf %36 : vector<8x8xf32> to vector<8x8xbf16>
    %38 = vector.extract_strided_slice %22 {offsets = [0, 0], sizes = [8, 8], strides = [1, 1]} : vector<8x32xbf16> to vector<8x8xbf16>
    %cst_22 = arith.constant dense<0.000000e+00> : vector<8x8xf32>
    %39 = tpu.matmul %37, %38, %cst_22 {dimension_numbers = #tpu.dot_dimension_numbers<[1], [0], [0], [1], [0, 0, 1, 1], [], []>} : vector<8x8xbf16>, vector<8x8xbf16>, vector<8x8xf32> -> vector<8x8xf32>
    %40 = arith.truncf %39 : vector<8x8xf32> to vector<8x8xbf16>
    %c0_23 = arith.constant 0 : index
    %c0_24 = arith.constant 0 : index
    %41 = vector.load %arg26[%c0_23, %c0_24] : memref<8x32xbf16, #tpu.memory_space<vmem>>, vector<8x8xbf16>
    tpu.vector_store %arg26[%c0_23, %c0_24], %40 {strides = array<i32>} : memref<8x32xbf16, #tpu.memory_space<vmem>>, vector<8x8xbf16>,
    %42 = vector.extract_strided_slice %14 {offsets = [0, 8], sizes = [8, 8], strides = [1, 1]} : vector<8x32xbf16> to vector<8x8xbf16>
    %43 = vector.extract_strided_slice %20 {offsets = [0, 8], sizes = [8, 8], strides = [1, 1]} : vector<8x32xbf16> to vector<8x8xbf16>
    %cst_25 = arith.constant dense<0.000000e+00> : vector<8x8xf32>
    %44 = tpu.matmul %42, %43, %cst_25 {dimension_numbers = #tpu.dot_dimension_numbers<[1], [1], [0], [0], [0, 0, 1, 0], [], []>} : vector<8x8xbf16>, vector<8x8xbf16>, vector<8x8xf32> -> vector<8x8xf32>
    %cst_26 = arith.constant 0.353553385 : f32
    %45 = vector.broadcast %cst_26 : f32 to vector<8x8xf32>
    %46 = arith.mulf %44, %45 : vector<8x8xf32>
    %cst_27 = arith.constant dense<0xFF800000> : vector<8xf32>
    %47 = vector.multi_reduction <maximumf>, %46, %cst_27 [1] : vector<8x8xf32> to vector<8xf32>
    %48 = vector.shape_cast %47 : vector<8xf32> to vector<8x1xf32>
    %49 = vector.broadcast %48 : vector<8x1xf32> to vector<8x8xf32>
    %50 = arith.subf %46, %49 : vector<8x8xf32>
    %51 = math.exp %50 : vector<8x8xf32>
    %cst_28 = arith.constant dense<0.000000e+00> : vector<8xf32>
    %52 = vector.multi_reduction <add>, %51, %cst_28 [1] : vector<8x8xf32> to vector<8xf32>
    %53 = vector.shape_cast %52 : vector<8xf32> to vector<8x1xf32>
    %54 = vector.broadcast %53 : vector<8x1xf32> to vector<8x8xf32>
    %55 = arith.divf %51, %54 : vector<8x8xf32>
    %56 = arith.truncf %55 : vector<8x8xf32> to vector<8x8xbf16>
    %57 = vector.extract_strided_slice %22 {offsets = [0, 8], sizes = [8, 8], strides = [1, 1]} : vector<8x32xbf16> to vector<8x8xbf16>
    %cst_29 = arith.constant dense<0.000000e+00> : vector<8x8xf32>
    %58 = tpu.matmul %56, %57, %cst_29 {dimension_numbers = #tpu.dot_dimension_numbers<[1], [0], [0], [1], [0, 0, 1, 1], [], []>} : vector<8x8xbf16>, vector<8x8xbf16>, vector<8x8xf32> -> vector<8x8xf32>
    %59 = arith.truncf %58 : vector<8x8xf32> to vector<8x8xbf16>
    %c0_30 = arith.constant 0 : index
    %c8 = arith.constant 8 : index
    %60 = vector.load %arg26[%c0_30, %c8] : memref<8x32xbf16, #tpu.memory_space<vmem>>, vector<8x8xbf16>
    tpu.vector_store %arg26[%c0_30, %c8], %59 {strides = array<i32>} : memref<8x32xbf16, #tpu.memory_space<vmem>>, vector<8x8xbf16>,
    %61 = vector.extract_strided_slice %14 {offsets = [0, 16], sizes = [8, 8], strides = [1, 1]} : vector<8x32xbf16> to vector<8x8xbf16>
    %62 = vector.extract_strided_slice %20 {offsets = [0, 16], sizes = [8, 8], strides = [1, 1]} : vector<8x32xbf16> to vector<8x8xbf16>
    %cst_31 = arith.constant dense<0.000000e+00> : vector<8x8xf32>
    %63 = tpu.matmul %61, %62, %cst_31 {dimension_numbers = #tpu.dot_dimension_numbers<[1], [1], [0], [0], [0, 0, 1, 0], [], []>} : vector<8x8xbf16>, vector<8x8xbf16>, vector<8x8xf32> -> vector<8x8xf32>
    %cst_32 = arith.constant 0.353553385 : f32
    %64 = vector.broadcast %cst_32 : f32 to vector<8x8xf32>
    %65 = arith.mulf %63, %64 : vector<8x8xf32>
    %cst_33 = arith.constant dense<0xFF800000> : vector<8xf32>
    %66 = vector.multi_reduction <maximumf>, %65, %cst_33 [1] : vector<8x8xf32> to vector<8xf32>
    %67 = vector.shape_cast %66 : vector<8xf32> to vector<8x1xf32>
    %68 = vector.broadcast %67 : vector<8x1xf32> to vector<8x8xf32>
    %69 = arith.subf %65, %68 : vector<8x8xf32>
    %70 = math.exp %69 : vector<8x8xf32>
    %cst_34 = arith.constant dense<0.000000e+00> : vector<8xf32>
    %71 = vector.multi_reduction <add>, %70, %cst_34 [1] : vector<8x8xf32> to vector<8xf32>
    %72 = vector.shape_cast %71 : vector<8xf32> to vector<8x1xf32>
    %73 = vector.broadcast %72 : vector<8x1xf32> to vector<8x8xf32>
    %74 = arith.divf %70, %73 : vector<8x8xf32>
    %75 = arith.truncf %74 : vector<8x8xf32> to vector<8x8xbf16>
    %76 = vector.extract_strided_slice %22 {offsets = [0, 16], sizes = [8, 8], strides = [1, 1]} : vector<8x32xbf16> to vector<8x8xbf16>
    %cst_35 = arith.constant dense<0.000000e+00> : vector<8x8xf32>
    %77 = tpu.matmul %75, %76, %cst_35 {dimension_numbers = #tpu.dot_dimension_numbers<[1], [0], [0], [1], [0, 0, 1, 1], [], []>} : vector<8x8xbf16>, vector<8x8xbf16>, vector<8x8xf32> -> vector<8x8xf32>
    %78 = arith.truncf %77 : vector<8x8xf32> to vector<8x8xbf16>
    %c0_36 = arith.constant 0 : index
    %c16 = arith.constant 16 : index
    %79 = vector.load %arg26[%c0_36, %c16] : memref<8x32xbf16, #tpu.memory_space<vmem>>, vector<8x8xbf16>
    tpu.vector_store %arg26[%c0_36, %c16], %78 {strides = array<i32>} : memref<8x32xbf16, #tpu.memory_space<vmem>>, vector<8x8xbf16>,
    %80 = vector.extract_strided_slice %14 {offsets = [0, 24], sizes = [8, 8], strides = [1, 1]} : vector<8x32xbf16> to vector<8x8xbf16>
    %81 = vector.extract_strided_slice %20 {offsets = [0, 24], sizes = [8, 8], strides = [1, 1]} : vector<8x32xbf16> to vector<8x8xbf16>
    %cst_37 = arith.constant dense<0.000000e+00> : vector<8x8xf32>
    %82 = tpu.matmul %80, %81, %cst_37 {dimension_numbers = #tpu.dot_dimension_numbers<[1], [1], [0], [0], [0, 0, 1, 0], [], []>} : vector<8x8xbf16>, vector<8x8xbf16>, vector<8x8xf32> -> vector<8x8xf32>
    %cst_38 = arith.constant 0.353553385 : f32
    %83 = vector.broadcast %cst_38 : f32 to vector<8x8xf32>
    %84 = arith.mulf %82, %83 : vector<8x8xf32>
    %cst_39 = arith.constant dense<0xFF800000> : vector<8xf32>
    %85 = vector.multi_reduction <maximumf>, %84, %cst_39 [1] : vector<8x8xf32> to vector<8xf32>
    %86 = vector.shape_cast %85 : vector<8xf32> to vector<8x1xf32>
    %87 = vector.broadcast %86 : vector<8x1xf32> to vector<8x8xf32>
    %88 = arith.subf %84, %87 : vector<8x8xf32>
    %89 = math.exp %88 : vector<8x8xf32>
    %cst_40 = arith.constant dense<0.000000e+00> : vector<8xf32>
    %90 = vector.multi_reduction <add>, %89, %cst_40 [1] : vector<8x8xf32> to vector<8xf32>
    %91 = vector.shape_cast %90 : vector<8xf32> to vector<8x1xf32>
    %92 = vector.broadcast %91 : vector<8x1xf32> to vector<8x8xf32>
    %93 = arith.divf %89, %92 : vector<8x8xf32>
    %94 = arith.truncf %93 : vector<8x8xf32> to vector<8x8xbf16>
    %95 = vector.extract_strided_slice %22 {offsets = [0, 24], sizes = [8, 8], strides = [1, 1]} : vector<8x32xbf16> to vector<8x8xbf16>
    %cst_41 = arith.constant dense<0.000000e+00> : vector<8x8xf32>
    %96 = tpu.matmul %94, %95, %cst_41 {dimension_numbers = #tpu.dot_dimension_numbers<[1], [0], [0], [1], [0, 0, 1, 1], [], []>} : vector<8x8xbf16>, vector<8x8xbf16>, vector<8x8xf32> -> vector<8x8xf32>
    %97 = arith.truncf %96 : vector<8x8xf32> to vector<8x8xbf16>
    %c0_42 = arith.constant 0 : index
    %c24 = arith.constant 24 : index
    %98 = vector.load %arg26[%c0_42, %c24] : memref<8x32xbf16, #tpu.memory_space<vmem>>, vector<8x8xbf16>
    tpu.vector_store %arg26[%c0_42, %c24], %97 {strides = array<i32>} : memref<8x32xbf16, #tpu.memory_space<vmem>>, vector<8x8xbf16>,
    %c0_43 = arith.constant 0 : index
    %c0_44 = arith.constant 0 : index
    %99 = vector.load %arg26[%c0_43, %c0_44] : memref<8x32xbf16, #tpu.memory_space<vmem>>, vector<8x32xbf16>
    %cst_45 = arith.constant dense<0.000000e+00> : vector<8x32xf32>
    %100 = tpu.matmul %99, %8, %cst_45 {dimension_numbers = #tpu.dot_dimension_numbers<[1], [0], [0], [1], [0, 0, 1, 1], [], []>} : vector<8x32xbf16>, vector<32x32xbf16>, vector<8x32xf32> -> vector<8x32xf32>
    %101 = vector.broadcast %9 : vector<1x32xf32> to vector<8x32xf32>
    %102 = arith.addf %100, %101 : vector<8x32xf32>
    %103 = arith.addf %1, %102 : vector<8x32xf32>
    %c0_46 = arith.constant 0 : index
    %c0_47 = arith.constant 0 : index
    %104 = vector.load %arg9[%c0_46, %c0_47] : memref<1x32xf32, #tpu.memory_space<vmem>>, vector<1x32xf32>
    %c0_48 = arith.constant 0 : index
    %c0_49 = arith.constant 0 : index
    %105 = vector.load %arg10[%c0_48, %c0_49] : memref<1x32xf32, #tpu.memory_space<vmem>>, vector<1x32xf32>
    %cst_50 = arith.constant dense<0.000000e+00> : vector<8xf32>
    %106 = vector.multi_reduction <add>, %103, %cst_50 [1] : vector<8x32xf32> to vector<8xf32>
    %107 = vector.shape_cast %106 : vector<8xf32> to vector<8x1xf32>
    %cst_51 = arith.constant 3.200000e+01 : f32
    %108 = vector.broadcast %cst_51 : f32 to vector<8x1xf32>
    %109 = arith.divf %107, %108 : vector<8x1xf32>
    %110 = vector.broadcast %109 : vector<8x1xf32> to vector<8x32xf32>
    %111 = arith.subf %103, %110 : vector<8x32xf32>
    %112 = arith.mulf %111, %111 : vector<8x32xf32>
    %cst_52 = arith.constant dense<0.000000e+00> : vector<8xf32>
    %113 = vector.multi_reduction <add>, %112, %cst_52 [1] : vector<8x32xf32> to vector<8xf32>
    %114 = vector.shape_cast %113 : vector<8xf32> to vector<8x1xf32>
    %cst_53 = arith.constant 3.200000e+01 : f32
    %115 = vector.broadcast %cst_53 : f32 to vector<8x1xf32>
    %116 = arith.divf %114, %115 : vector<8x1xf32>
    %117 = vector.broadcast %109 : vector<8x1xf32> to vector<8x32xf32>
    %118 = arith.subf %103, %117 : vector<8x32xf32>
    %cst_54 = arith.constant 9.99999974E-6 : f32
    %119 = vector.broadcast %cst_54 : f32 to vector<8x1xf32>
    %120 = arith.addf %116, %119 : vector<8x1xf32>
    %121 = math.rsqrt %120 : vector<8x1xf32>
    %122 = vector.broadcast %121 : vector<8x1xf32> to vector<8x32xf32>
    %123 = arith.mulf %118, %122 : vector<8x32xf32>
    %124 = vector.broadcast %104 : vector<1x32xf32> to vector<8x32xf32>
    %125 = arith.mulf %123, %124 : vector<8x32xf32>
    %126 = vector.broadcast %105 : vector<1x32xf32> to vector<8x32xf32>
    %127 = arith.addf %125, %126 : vector<8x32xf32>
    %c0_55 = arith.constant 0 : index
    %c0_56 = arith.constant 0 : index
    %128 = vector.load %arg11[%c0_55, %c0_56] : memref<32x32xbf16, #tpu.memory_space<vmem>>, vector<32x32xbf16>
    %c0_57 = arith.constant 0 : index
    %c0_58 = arith.constant 0 : index
    %129 = vector.load %arg12[%c0_57, %c0_58] : memref<1x32xf32, #tpu.memory_space<vmem>>, vector<1x32xf32>
    %c0_59 = arith.constant 0 : index
    %c0_60 = arith.constant 0 : index
    %130 = vector.load %arg13[%c0_59, %c0_60] : memref<32x64xbf16, #tpu.memory_space<vmem>>, vector<32x64xbf16>
    %c0_61 = arith.constant 0 : index
    %c0_62 = arith.constant 0 : index
    %131 = vector.load %arg14[%c0_61, %c0_62] : memref<1x64xf32, #tpu.memory_space<vmem>>, vector<1x64xf32>
    %c0_63 = arith.constant 0 : index
    %c0_64 = arith.constant 0 : index
    %132 = vector.load %arg15[%c0_63, %c0_64] : memref<32x32xbf16, #tpu.memory_space<vmem>>, vector<32x32xbf16>
    %c0_65 = arith.constant 0 : index
    %c0_66 = arith.constant 0 : index
    %133 = vector.load %arg16[%c0_65, %c0_66] : memref<1x32xf32, #tpu.memory_space<vmem>>, vector<1x32xf32>
    %134 = arith.truncf %127 : vector<8x32xf32> to vector<8x32xbf16>
    %cst_67 = arith.constant dense<0.000000e+00> : vector<8x32xf32>
    %135 = tpu.matmul %134, %128, %cst_67 {dimension_numbers = #tpu.dot_dimension_numbers<[1], [0], [0], [1], [0, 0, 1, 1], [], []>} : vector<8x32xbf16>, vector<32x32xbf16>, vector<8x32xf32> -> vector<8x32xf32>
    %136 = vector.broadcast %129 : vector<1x32xf32> to vector<8x32xf32>
    %137 = arith.addf %135, %136 : vector<8x32xf32>
    %138 = arith.truncf %137 : vector<8x32xf32> to vector<8x32xbf16>
    %139 = arith.truncf %3 : vector<8x32xf32> to vector<8x32xbf16>
    %cst_68 = arith.constant dense<0.000000e+00> : vector<8x64xf32>
    %140 = tpu.matmul %139, %130, %cst_68 {dimension_numbers = #tpu.dot_dimension_numbers<[1], [0], [0], [1], [0, 0, 1, 1], [], []>} : vector<8x32xbf16>, vector<32x64xbf16>, vector<8x64xf32> -> vector<8x64xf32>
    %141 = vector.broadcast %131 : vector<1x64xf32> to vector<8x64xf32>
    %142 = arith.addf %140, %141 : vector<8x64xf32>
    %143 = vector.extract_strided_slice %142 {offsets = [0, 0], sizes = [8, 32], strides = [1, 1]} : vector<8x64xf32> to vector<8x32xf32>
    %144 = arith.truncf %143 : vector<8x32xf32> to vector<8x32xbf16>
    %145 = vector.extract_strided_slice %142 {offsets = [0, 32], sizes = [8, 32], strides = [1, 1]} : vector<8x64xf32> to vector<8x32xf32>
    %146 = arith.truncf %145 : vector<8x32xf32> to vector<8x32xbf16>
    %147 = vector.extract_strided_slice %138 {offsets = [0, 0], sizes = [8, 8], strides = [1, 1]} : vector<8x32xbf16> to vector<8x8xbf16>
    %148 = vector.extract_strided_slice %144 {offsets = [0, 0], sizes = [8, 8], strides = [1, 1]} : vector<8x32xbf16> to vector<8x8xbf16>
    %cst_69 = arith.constant dense<0.000000e+00> : vector<8x8xf32>
    %149 = tpu.matmul %147, %148, %cst_69 {dimension_numbers = #tpu.dot_dimension_numbers<[1], [1], [0], [0], [0, 0, 1, 0], [], []>} : vector<8x8xbf16>, vector<8x8xbf16>, vector<8x8xf32> -> vector<8x8xf32>
    %cst_70 = arith.constant 0.353553385 : f32
    %150 = vector.broadcast %cst_70 : f32 to vector<8x8xf32>
    %151 = arith.mulf %149, %150 : vector<8x8xf32>
    %cst_71 = arith.constant dense<0xFF800000> : vector<8xf32>
    %152 = vector.multi_reduction <maximumf>, %151, %cst_71 [1] : vector<8x8xf32> to vector<8xf32>
    %153 = vector.shape_cast %152 : vector<8xf32> to vector<8x1xf32>
    %154 = vector.broadcast %153 : vector<8x1xf32> to vector<8x8xf32>
    %155 = arith.subf %151, %154 : vector<8x8xf32>
    %156 = math.exp %155 : vector<8x8xf32>
    %cst_72 = arith.constant dense<0.000000e+00> : vector<8xf32>
    %157 = vector.multi_reduction <add>, %156, %cst_72 [1] : vector<8x8xf32> to vector<8xf32>
    %158 = vector.shape_cast %157 : vector<8xf32> to vector<8x1xf32>
    %159 = vector.broadcast %158 : vector<8x1xf32> to vector<8x8xf32>
    %160 = arith.divf %156, %159 : vector<8x8xf32>
    %161 = arith.truncf %160 : vector<8x8xf32> to vector<8x8xbf16>
    %162 = vector.extract_strided_slice %146 {offsets = [0, 0], sizes = [8, 8], strides = [1, 1]} : vector<8x32xbf16> to vector<8x8xbf16>
    %cst_73 = arith.constant dense<0.000000e+00> : vector<8x8xf32>
    %163 = tpu.matmul %161, %162, %cst_73 {dimension_numbers = #tpu.dot_dimension_numbers<[1], [0], [0], [1], [0, 0, 1, 1], [], []>} : vector<8x8xbf16>, vector<8x8xbf16>, vector<8x8xf32> -> vector<8x8xf32>
    %164 = arith.truncf %163 : vector<8x8xf32> to vector<8x8xbf16>
    %c0_74 = arith.constant 0 : index
    %c0_75 = arith.constant 0 : index
    %165 = vector.load %arg26[%c0_74, %c0_75] : memref<8x32xbf16, #tpu.memory_space<vmem>>, vector<8x8xbf16>
    tpu.vector_store %arg26[%c0_74, %c0_75], %164 {strides = array<i32>} : memref<8x32xbf16, #tpu.memory_space<vmem>>, vector<8x8xbf16>,
    %166 = vector.extract_strided_slice %138 {offsets = [0, 8], sizes = [8, 8], strides = [1, 1]} : vector<8x32xbf16> to vector<8x8xbf16>
    %167 = vector.extract_strided_slice %144 {offsets = [0, 8], sizes = [8, 8], strides = [1, 1]} : vector<8x32xbf16> to vector<8x8xbf16>
    %cst_76 = arith.constant dense<0.000000e+00> : vector<8x8xf32>
    %168 = tpu.matmul %166, %167, %cst_76 {dimension_numbers = #tpu.dot_dimension_numbers<[1], [1], [0], [0], [0, 0, 1, 0], [], []>} : vector<8x8xbf16>, vector<8x8xbf16>, vector<8x8xf32> -> vector<8x8xf32>
    %cst_77 = arith.constant 0.353553385 : f32
    %169 = vector.broadcast %cst_77 : f32 to vector<8x8xf32>
    %170 = arith.mulf %168, %169 : vector<8x8xf32>
    %cst_78 = arith.constant dense<0xFF800000> : vector<8xf32>
    %171 = vector.multi_reduction <maximumf>, %170, %cst_78 [1] : vector<8x8xf32> to vector<8xf32>
    %172 = vector.shape_cast %171 : vector<8xf32> to vector<8x1xf32>
    %173 = vector.broadcast %172 : vector<8x1xf32> to vector<8x8xf32>
    %174 = arith.subf %170, %173 : vector<8x8xf32>
    %175 = math.exp %174 : vector<8x8xf32>
    %cst_79 = arith.constant dense<0.000000e+00> : vector<8xf32>
    %176 = vector.multi_reduction <add>, %175, %cst_79 [1] : vector<8x8xf32> to vector<8xf32>
    %177 = vector.shape_cast %176 : vector<8xf32> to vector<8x1xf32>
    %178 = vector.broadcast %177 : vector<8x1xf32> to vector<8x8xf32>
    %179 = arith.divf %175, %178 : vector<8x8xf32>
    %180 = arith.truncf %179 : vector<8x8xf32> to vector<8x8xbf16>
    %181 = vector.extract_strided_slice %146 {offsets = [0, 8], sizes = [8, 8], strides = [1, 1]} : vector<8x32xbf16> to vector<8x8xbf16>
    %cst_80 = arith.constant dense<0.000000e+00> : vector<8x8xf32>
    %182 = tpu.matmul %180, %181, %cst_80 {dimension_numbers = #tpu.dot_dimension_numbers<[1], [0], [0], [1], [0, 0, 1, 1], [], []>} : vector<8x8xbf16>, vector<8x8xbf16>, vector<8x8xf32> -> vector<8x8xf32>
    %183 = arith.truncf %182 : vector<8x8xf32> to vector<8x8xbf16>
    %c0_81 = arith.constant 0 : index
    %c8_82 = arith.constant 8 : index
    %184 = vector.load %arg26[%c0_81, %c8_82] : memref<8x32xbf16, #tpu.memory_space<vmem>>, vector<8x8xbf16>
    tpu.vector_store %arg26[%c0_81, %c8_82], %183 {strides = array<i32>} : memref<8x32xbf16, #tpu.memory_space<vmem>>, vector<8x8xbf16>,
    %185 = vector.extract_strided_slice %138 {offsets = [0, 16], sizes = [8, 8], strides = [1, 1]} : vector<8x32xbf16> to vector<8x8xbf16>
    %186 = vector.extract_strided_slice %144 {offsets = [0, 16], sizes = [8, 8], strides = [1, 1]} : vector<8x32xbf16> to vector<8x8xbf16>
    %cst_83 = arith.constant dense<0.000000e+00> : vector<8x8xf32>
    %187 = tpu.matmul %185, %186, %cst_83 {dimension_numbers = #tpu.dot_dimension_numbers<[1], [1], [0], [0], [0, 0, 1, 0], [], []>} : vector<8x8xbf16>, vector<8x8xbf16>, vector<8x8xf32> -> vector<8x8xf32>
    %cst_84 = arith.constant 0.353553385 : f32
    %188 = vector.broadcast %cst_84 : f32 to vector<8x8xf32>
    %189 = arith.mulf %187, %188 : vector<8x8xf32>
    %cst_85 = arith.constant dense<0xFF800000> : vector<8xf32>
    %190 = vector.multi_reduction <maximumf>, %189, %cst_85 [1] : vector<8x8xf32> to vector<8xf32>
    %191 = vector.shape_cast %190 : vector<8xf32> to vector<8x1xf32>
    %192 = vector.broadcast %191 : vector<8x1xf32> to vector<8x8xf32>
    %193 = arith.subf %189, %192 : vector<8x8xf32>
    %194 = math.exp %193 : vector<8x8xf32>
    %cst_86 = arith.constant dense<0.000000e+00> : vector<8xf32>
    %195 = vector.multi_reduction <add>, %194, %cst_86 [1] : vector<8x8xf32> to vector<8xf32>
    %196 = vector.shape_cast %195 : vector<8xf32> to vector<8x1xf32>
    %197 = vector.broadcast %196 : vector<8x1xf32> to vector<8x8xf32>
    %198 = arith.divf %194, %197 : vector<8x8xf32>
    %199 = arith.truncf %198 : vector<8x8xf32> to vector<8x8xbf16>
    %200 = vector.extract_strided_slice %146 {offsets = [0, 16], sizes = [8, 8], strides = [1, 1]} : vector<8x32xbf16> to vector<8x8xbf16>
    %cst_87 = arith.constant dense<0.000000e+00> : vector<8x8xf32>
    %201 = tpu.matmul %199, %200, %cst_87 {dimension_numbers = #tpu.dot_dimension_numbers<[1], [0], [0], [1], [0, 0, 1, 1], [], []>} : vector<8x8xbf16>, vector<8x8xbf16>, vector<8x8xf32> -> vector<8x8xf32>
    %202 = arith.truncf %201 : vector<8x8xf32> to vector<8x8xbf16>
    %c0_88 = arith.constant 0 : index
    %c16_89 = arith.constant 16 : index
    %203 = vector.load %arg26[%c0_88, %c16_89] : memref<8x32xbf16, #tpu.memory_space<vmem>>, vector<8x8xbf16>
    tpu.vector_store %arg26[%c0_88, %c16_89], %202 {strides = array<i32>} : memref<8x32xbf16, #tpu.memory_space<vmem>>, vector<8x8xbf16>,
    %204 = vector.extract_strided_slice %138 {offsets = [0, 24], sizes = [8, 8], strides = [1, 1]} : vector<8x32xbf16> to vector<8x8xbf16>
    %205 = vector.extract_strided_slice %144 {offsets = [0, 24], sizes = [8, 8], strides = [1, 1]} : vector<8x32xbf16> to vector<8x8xbf16>
    %cst_90 = arith.constant dense<0.000000e+00> : vector<8x8xf32>
    %206 = tpu.matmul %204, %205, %cst_90 {dimension_numbers = #tpu.dot_dimension_numbers<[1], [1], [0], [0], [0, 0, 1, 0], [], []>} : vector<8x8xbf16>, vector<8x8xbf16>, vector<8x8xf32> -> vector<8x8xf32>
    %cst_91 = arith.constant 0.353553385 : f32
    %207 = vector.broadcast %cst_91 : f32 to vector<8x8xf32>
    %208 = arith.mulf %206, %207 : vector<8x8xf32>
    %cst_92 = arith.constant dense<0xFF800000> : vector<8xf32>
    %209 = vector.multi_reduction <maximumf>, %208, %cst_92 [1] : vector<8x8xf32> to vector<8xf32>
    %210 = vector.shape_cast %209 : vector<8xf32> to vector<8x1xf32>
    %211 = vector.broadcast %210 : vector<8x1xf32> to vector<8x8xf32>
    %212 = arith.subf %208, %211 : vector<8x8xf32>
    %213 = math.exp %212 : vector<8x8xf32>
    %cst_93 = arith.constant dense<0.000000e+00> : vector<8xf32>
    %214 = vector.multi_reduction <add>, %213, %cst_93 [1] : vector<8x8xf32> to vector<8xf32>
    %215 = vector.shape_cast %214 : vector<8xf32> to vector<8x1xf32>
    %216 = vector.broadcast %215 : vector<8x1xf32> to vector<8x8xf32>
    %217 = arith.divf %213, %216 : vector<8x8xf32>
    %218 = arith.truncf %217 : vector<8x8xf32> to vector<8x8xbf16>
    %219 = vector.extract_strided_slice %146 {offsets = [0, 24], sizes = [8, 8], strides = [1, 1]} : vector<8x32xbf16> to vector<8x8xbf16>
    %cst_94 = arith.constant dense<0.000000e+00> : vector<8x8xf32>
    %220 = tpu.matmul %218, %219, %cst_94 {dimension_numbers = #tpu.dot_dimension_numbers<[1], [0], [0], [1], [0, 0, 1, 1], [], []>} : vector<8x8xbf16>, vector<8x8xbf16>, vector<8x8xf32> -> vector<8x8xf32>
    %221 = arith.truncf %220 : vector<8x8xf32> to vector<8x8xbf16>
    %c0_95 = arith.constant 0 : index
    %c24_96 = arith.constant 24 : index
    %222 = vector.load %arg26[%c0_95, %c24_96] : memref<8x32xbf16, #tpu.memory_space<vmem>>, vector<8x8xbf16>
    tpu.vector_store %arg26[%c0_95, %c24_96], %221 {strides = array<i32>} : memref<8x32xbf16, #tpu.memory_space<vmem>>, vector<8x8xbf16>,
    %c0_97 = arith.constant 0 : index
    %c0_98 = arith.constant 0 : index
    %223 = vector.load %arg26[%c0_97, %c0_98] : memref<8x32xbf16, #tpu.memory_space<vmem>>, vector<8x32xbf16>
    %cst_99 = arith.constant dense<0.000000e+00> : vector<8x32xf32>
    %224 = tpu.matmul %223, %132, %cst_99 {dimension_numbers = #tpu.dot_dimension_numbers<[1], [0], [0], [1], [0, 0, 1, 1], [], []>} : vector<8x32xbf16>, vector<32x32xbf16>, vector<8x32xf32> -> vector<8x32xf32>
    %225 = vector.broadcast %133 : vector<1x32xf32> to vector<8x32xf32>
    %226 = arith.addf %224, %225 : vector<8x32xf32>
    %227 = arith.addf %127, %226 : vector<8x32xf32>
    %c0_100 = arith.constant 0 : index
    %c0_101 = arith.constant 0 : index
    %228 = vector.load %arg17[%c0_100, %c0_101] : memref<1x32xf32, #tpu.memory_space<vmem>>, vector<1x32xf32>
    %c0_102 = arith.constant 0 : index
    %c0_103 = arith.constant 0 : index
    %229 = vector.load %arg18[%c0_102, %c0_103] : memref<1x32xf32, #tpu.memory_space<vmem>>, vector<1x32xf32>
    %cst_104 = arith.constant dense<0.000000e+00> : vector<8xf32>
    %230 = vector.multi_reduction <add>, %227, %cst_104 [1] : vector<8x32xf32> to vector<8xf32>
    %231 = vector.shape_cast %230 : vector<8xf32> to vector<8x1xf32>
    %cst_105 = arith.constant 3.200000e+01 : f32
    %232 = vector.broadcast %cst_105 : f32 to vector<8x1xf32>
    %233 = arith.divf %231, %232 : vector<8x1xf32>
    %234 = vector.broadcast %233 : vector<8x1xf32> to vector<8x32xf32>
    %235 = arith.subf %227, %234 : vector<8x32xf32>
    %236 = arith.mulf %235, %235 : vector<8x32xf32>
    %cst_106 = arith.constant dense<0.000000e+00> : vector<8xf32>
    %237 = vector.multi_reduction <add>, %236, %cst_106 [1] : vector<8x32xf32> to vector<8xf32>
    %238 = vector.shape_cast %237 : vector<8xf32> to vector<8x1xf32>
    %cst_107 = arith.constant 3.200000e+01 : f32
    %239 = vector.broadcast %cst_107 : f32 to vector<8x1xf32>
    %240 = arith.divf %238, %239 : vector<8x1xf32>
    %241 = vector.broadcast %233 : vector<8x1xf32> to vector<8x32xf32>
    %242 = arith.subf %227, %241 : vector<8x32xf32>
    %cst_108 = arith.constant 9.99999974E-6 : f32
    %243 = vector.broadcast %cst_108 : f32 to vector<8x1xf32>
    %244 = arith.addf %240, %243 : vector<8x1xf32>
    %245 = math.rsqrt %244 : vector<8x1xf32>
    %246 = vector.broadcast %245 : vector<8x1xf32> to vector<8x32xf32>
    %247 = arith.mulf %242, %246 : vector<8x32xf32>
    %248 = vector.broadcast %228 : vector<1x32xf32> to vector<8x32xf32>
    %249 = arith.mulf %247, %248 : vector<8x32xf32>
    %250 = vector.broadcast %229 : vector<1x32xf32> to vector<8x32xf32>
    %251 = arith.addf %249, %250 : vector<8x32xf32>
    %252 = arith.truncf %251 : vector<8x32xf32> to vector<8x32xbf16>
    %c0_109 = arith.constant 0 : index
    %c0_110 = arith.constant 0 : index
    %253 = vector.load %arg19[%c0_109, %c0_110] : memref<32x64xbf16, #tpu.memory_space<vmem>>, vector<32x64xbf16>
    %cst_111 = arith.constant dense<0.000000e+00> : vector<8x64xf32>
    %254 = tpu.matmul %252, %253, %cst_111 {dimension_numbers = #tpu.dot_dimension_numbers<[1], [0], [0], [1], [0, 0, 1, 1], [], []>} : vector<8x32xbf16>, vector<32x64xbf16>, vector<8x64xf32> -> vector<8x64xf32>
    %c0_112 = arith.constant 0 : index
    %c0_113 = arith.constant 0 : index
    %255 = vector.load %arg20[%c0_112, %c0_113] : memref<1x64xf32, #tpu.memory_space<vmem>>, vector<1x64xf32>
    %256 = vector.broadcast %255 : vector<1x64xf32> to vector<8x64xf32>
    %257 = arith.addf %254, %256 : vector<8x64xf32>
    %cst_114 = arith.constant 0.000000e+00 : f32
    %258 = vector.broadcast %cst_114 : f32 to vector<8x64xf32>
    %259 = arith.maximumf %257, %258 : vector<8x64xf32>
    %260 = arith.truncf %259 : vector<8x64xf32> to vector<8x64xbf16>
    %c0_115 = arith.constant 0 : index
    %c0_116 = arith.constant 0 : index
    %261 = vector.load %arg21[%c0_115, %c0_116] : memref<64x32xbf16, #tpu.memory_space<vmem>>, vector<64x32xbf16>
    %cst_117 = arith.constant dense<0.000000e+00> : vector<8x32xf32>
    %262 = tpu.matmul %260, %261, %cst_117 {dimension_numbers = #tpu.dot_dimension_numbers<[1], [0], [0], [1], [0, 0, 1, 1], [], []>} : vector<8x64xbf16>, vector<64x32xbf16>, vector<8x32xf32> -> vector<8x32xf32>
    %c0_118 = arith.constant 0 : index
    %c0_119 = arith.constant 0 : index
    %263 = vector.load %arg22[%c0_118, %c0_119] : memref<1x32xf32, #tpu.memory_space<vmem>>, vector<1x32xf32>
    %264 = vector.broadcast %263 : vector<1x32xf32> to vector<8x32xf32>
    %265 = arith.addf %262, %264 : vector<8x32xf32>
    %266 = arith.addf %251, %265 : vector<8x32xf32>
    %c0_120 = arith.constant 0 : index
    %c0_121 = arith.constant 0 : index
    %267 = vector.load %arg23[%c0_120, %c0_121] : memref<1x32xf32, #tpu.memory_space<vmem>>, vector<1x32xf32>
    %c0_122 = arith.constant 0 : index
    %c0_123 = arith.constant 0 : index
    %268 = vector.load %arg24[%c0_122, %c0_123] : memref<1x32xf32, #tpu.memory_space<vmem>>, vector<1x32xf32>
    %cst_124 = arith.constant dense<0.000000e+00> : vector<8xf32>
    %269 = vector.multi_reduction <add>, %266, %cst_124 [1] : vector<8x32xf32> to vector<8xf32>
    %270 = vector.shape_cast %269 : vector<8xf32> to vector<8x1xf32>
    %cst_125 = arith.constant 3.200000e+01 : f32
    %271 = vector.broadcast %cst_125 : f32 to vector<8x1xf32>
    %272 = arith.divf %270, %271 : vector<8x1xf32>
    %273 = vector.broadcast %272 : vector<8x1xf32> to vector<8x32xf32>
    %274 = arith.subf %266, %273 : vector<8x32xf32>
    %275 = arith.mulf %274, %274 : vector<8x32xf32>
    %cst_126 = arith.constant dense<0.000000e+00> : vector<8xf32>
    %276 = vector.multi_reduction <add>, %275, %cst_126 [1] : vector<8x32xf32> to vector<8xf32>
    %277 = vector.shape_cast %276 : vector<8xf32> to vector<8x1xf32>
    %cst_127 = arith.constant 3.200000e+01 : f32
    %278 = vector.broadcast %cst_127 : f32 to vector<8x1xf32>
    %279 = arith.divf %277, %278 : vector<8x1xf32>
    %280 = vector.broadcast %272 : vector<8x1xf32> to vector<8x32xf32>
    %281 = arith.subf %266, %280 : vector<8x32xf32>
    %cst_128 = arith.constant 9.99999974E-6 : f32
    %282 = vector.broadcast %cst_128 : f32 to vector<8x1xf32>
    %283 = arith.addf %279, %282 : vector<8x1xf32>
    %284 = math.rsqrt %283 : vector<8x1xf32>
    %285 = vector.broadcast %284 : vector<8x1xf32> to vector<8x32xf32>
    %286 = arith.mulf %281, %285 : vector<8x32xf32>
    %287 = vector.broadcast %267 : vector<1x32xf32> to vector<8x32xf32>
    %288 = arith.mulf %286, %287 : vector<8x32xf32>
    %289 = vector.broadcast %268 : vector<1x32xf32> to vector<8x32xf32>
    %290 = arith.addf %288, %289 : vector<8x32xf32>
    %c0_129 = arith.constant 0 : index
    %c0_130 = arith.constant 0 : index
    %c0_131 = arith.constant 0 : index
    %291 = vector.load %arg25[%c0_129, %c0_130, %c0_131] : memref<1x8x32xf32, #tpu.memory_space<vmem>>, vector<1x8x32xf32>
    %292 = vector.shape_cast %291 : vector<1x8x32xf32> to vector<8x32xf32>
    %293 = vector.shape_cast %290 : vector<8x32xf32> to vector<1x8x32xf32>
    tpu.vector_store %arg25[%c0_129, %c0_130, %c0_131], %293 {strides = array<i32>} : memref<1x8x32xf32, #tpu.memory_space<vmem>>, vector<1x8x32xf32>,
    return
  }
  func.func @transform_0(%arg0: i32) -> (i32, i32, i32) {
    %c0_i32 = arith.constant 0 : i32
    %c0_i32_0 = arith.constant 0 : i32
    %c0_i32_1 = arith.constant 0 : i32
    return %arg0, %c0_i32, %c0_i32_0 : i32, i32, i32
  }
  func.func @transform_1(%arg0: i32) -> (i32, i32, i32) {
    %c0_i32 = arith.constant 0 : i32
    %c0_i32_0 = arith.constant 0 : i32
    %c0_i32_1 = arith.constant 0 : i32
    return %arg0, %c0_i32, %c0_i32_0 : i32, i32, i32
  }
  func.func @transform_2(%arg0: i32) -> (i32, i32) {
    %c0_i32 = arith.constant 0 : i32
    %c0_i32_0 = arith.constant 0 : i32
    %c0_i32_1 = arith.constant 0 : i32
    return %c0_i32, %c0_i32_0 : i32, i32
  }
  func.func @transform_3(%arg0: i32) -> (i32, i32) {
    %c0_i32 = arith.constant 0 : i32
    %c0_i32_0 = arith.constant 0 : i32
    %c0_i32_1 = arith.constant 0 : i32
    return %c0_i32, %c0_i32_0 : i32, i32
  }
  func.func @transform_4(%arg0: i32) -> (i32, i32) {
    %c0_i32 = arith.constant 0 : i32
    %c0_i32_0 = arith.constant 0 : i32
    %c0_i32_1 = arith.constant 0 : i32
    return %c0_i32, %c0_i32_0 : i32, i32
  }
  func.func @transform_5(%arg0: i32) -> (i32, i32) {
    %c0_i32 = arith.constant 0 : i32
    %c0_i32_0 = arith.constant 0 : i32
    %c0_i32_1 = arith.constant 0 : i32
    return %c0_i32, %c0_i32_0 : i32, i32
  }
  func.func @transform_6(%arg0: i32) -> (i32, i32) {
    %c0_i32 = arith.constant 0 : i32
    %c0_i32_0 = arith.constant 0 : i32
    %c0_i32_1 = arith.constant 0 : i32
    return %c0_i32, %c0_i32_0 : i32, i32
  }
  func.func @transform_7(%arg0: i32) -> (i32, i32) {
    %c0_i32 = arith.constant 0 : i32
    %c0_i32_0 = arith.constant 0 : i32
    %c0_i32_1 = arith.constant 0 : i32
    return %c0_i32, %c0_i32_0 : i32, i32
  }
  func.func @transform_8(%arg0: i32) -> (i32, i32) {
    %c0_i32 = arith.constant 0 : i32
    %c0_i32_0 = arith.constant 0 : i32
    %c0_i32_1 = arith.constant 0 : i32
    return %c0_i32, %c0_i32_0 : i32, i32
  }
  func.func @transform_9(%arg0: i32) -> (i32, i32) {
    %c0_i32 = arith.constant 0 : i32
    %c0_i32_0 = arith.constant 0 : i32
    %c0_i32_1 = arith.constant 0 : i32
    return %c0_i32, %c0_i32_0 : i32, i32
  }
  func.func @transform_10(%arg0: i32) -> (i32, i32) {
    %c0_i32 = arith.constant 0 : i32
    %c0_i32_0 = arith.constant 0 : i32
    %c0_i32_1 = arith.constant 0 : i32
    return %c0_i32, %c0_i32_0 : i32, i32
  }
  func.func @transform_11(%arg0: i32) -> (i32, i32) {
    %c0_i32 = arith.constant 0 : i32
    %c0_i32_0 = arith.constant 0 : i32
    %c0_i32_1 = arith.constant 0 : i32
    return %c0_i32, %c0_i32_0 : i32, i32
  }
  func.func @transform_12(%arg0: i32) -> (i32, i32) {
    %c0_i32 = arith.constant 0 : i32
    %c0_i32_0 = arith.constant 0 : i32
    %c0_i32_1 = arith.constant 0 : i32
    return %c0_i32, %c0_i32_0 : i32, i32
  }
  func.func @transform_13(%arg0: i32) -> (i32, i32) {
    %c0_i32 = arith.constant 0 : i32
    %c0_i32_0 = arith.constant 0 : i32
    %c0_i32_1 = arith.constant 0 : i32
    return %c0_i32, %c0_i32_0 : i32, i32
  }
  func.func @transform_14(%arg0: i32) -> (i32, i32) {
    %c0_i32 = arith.constant 0 : i32
    %c0_i32_0 = arith.constant 0 : i32
    %c0_i32_1 = arith.constant 0 : i32
    return %c0_i32, %c0_i32_0 : i32, i32
  }
  func.func @transform_15(%arg0: i32) -> (i32, i32) {
    %c0_i32 = arith.constant 0 : i32
    %c0_i32_0 = arith.constant 0 : i32
    %c0_i32_1 = arith.constant 0 : i32
    return %c0_i32, %c0_i32_0 : i32, i32
  }
  func.func @transform_16(%arg0: i32) -> (i32, i32) {
    %c0_i32 = arith.constant 0 : i32
    %c0_i32_0 = arith.constant 0 : i32
    %c0_i32_1 = arith.constant 0 : i32
    return %c0_i32, %c0_i32_0 : i32, i32
  }
  func.func @transform_17(%arg0: i32) -> (i32, i32) {
    %c0_i32 = arith.constant 0 : i32
    %c0_i32_0 = arith.constant 0 : i32
    %c0_i32_1 = arith.constant 0 : i32
    return %c0_i32, %c0_i32_0 : i32, i32
  }
  func.func @transform_18(%arg0: i32) -> (i32, i32) {
    %c0_i32 = arith.constant 0 : i32
    %c0_i32_0 = arith.constant 0 : i32
    %c0_i32_1 = arith.constant 0 : i32
    return %c0_i32, %c0_i32_0 : i32, i32
  }
  func.func @transform_19(%arg0: i32) -> (i32, i32) {
    %c0_i32 = arith.constant 0 : i32
    %c0_i32_0 = arith.constant 0 : i32
    %c0_i32_1 = arith.constant 0 : i32
    return %c0_i32, %c0_i32_0 : i32, i32
  }
  func.func @transform_20(%arg0: i32) -> (i32, i32) {
    %c0_i32 = arith.constant 0 : i32
    %c0_i32_0 = arith.constant 0 : i32
    %c0_i32_1 = arith.constant 0 : i32
    return %c0_i32, %c0_i32_0 : i32, i32
  }
  func.func @transform_21(%arg0: i32) -> (i32, i32) {
    %c0_i32 = arith.constant 0 : i32
    %c0_i32_0 = arith.constant 0 : i32
    %c0_i32_1 = arith.constant 0 : i32
    return %c0_i32, %c0_i32_0 : i32, i32
  }
  func.func @transform_22(%arg0: i32) -> (i32, i32) {
    %c0_i32 = arith.constant 0 : i32
    %c0_i32_0 = arith.constant 0 : i32
    %c0_i32_1 = arith.constant 0 : i32
    return %c0_i32, %c0_i32_0 : i32, i32
  }
  func.func @transform_23(%arg0: i32) -> (i32, i32) {
    %c0_i32 = arith.constant 0 : i32
    %c0_i32_0 = arith.constant 0 : i32
    %c0_i32_1 = arith.constant 0 : i32
    return %c0_i32, %c0_i32_0 : i32, i32
  }
  func.func @transform_24(%arg0: i32) -> (i32, i32, i32) {
    %c0_i32 = arith.constant 0 : i32
    %c0_i32_0 = arith.constant 0 : i32
    %c0_i32_1 = arith.constant 0 : i32
    return %arg0, %c0_i32, %c0_i32_0 : i32, i32, i32
  }
}

module attributes {stable_mosaic.version = 11 : i64} {
  func.func @_decoder_layer_kernel(%arg0: i32, %arg1: memref<1x8x32xf32, #tpu.memory_space<vmem>>, %arg2: memref<1x8x32xf32, #tpu.memory_space<vmem>>, %arg3: memref<32x32xbf16, #tpu.memory_space<vmem>>, %arg4: memref<1x32xf32, #tpu.memory_space<vmem>>, %arg5: memref<32x64xbf16, #tpu.memory_space<vmem>>, %arg6: memref<1x64xf32, #tpu.memory_space<vmem>>, %arg7: memref<32x32xbf16, #tpu.memory_space<vmem>>, %arg8: memref<1x32xf32, #tpu.memory_space<vmem>>, %arg9: memref<1x32xf32, #tpu.memory_space<vmem>>, %arg10: memref<1x32xf32, #tpu.memory_space<vmem>>, %arg11: memref<32x32xbf16, #tpu.memory_space<vmem>>, %arg12: memref<1x32xf32, #tpu.memory_space<vmem>>, %arg13: memref<32x64xbf16, #tpu.memory_space<vmem>>, %arg14: memref<1x64xf32, #tpu.memory_space<vmem>>, %arg15: memref<32x32xbf16, #tpu.memory_space<vmem>>, %arg16: memref<1x32xf32, #tpu.memory_space<vmem>>, %arg17: memref<1x32xf32, #tpu.memory_space<vmem>>, %arg18: memref<1x32xf32, #tpu.memory_space<vmem>>, %arg19: memref<32x64xbf16, #tpu.memory_space<vmem>>, %arg20: memref<1x64xf32, #tpu.memory_space<vmem>>, %arg21: memref<64x32xbf16, #tpu.memory_space<vmem>>, %arg22: memref<1x32xf32, #tpu.memory_space<vmem>>, %arg23: memref<1x32xf32, #tpu.memory_space<vmem>>, %arg24: memref<1x32xf32, #tpu.memory_space<vmem>>, %arg25: memref<1x8x32xf32, #tpu.memory_space<vmem>>, %arg26: memref<8x32xbf16, #tpu.memory_space<vmem>>) attributes {dimension_semantics = [#tpu.dimension_semantics<parallel>], iteration_bounds = array<i64: 2>, scalar_prefetch = 0 : i64, scratch_operands = 1 : i64, tpu.core_type = #tpu.core_type<tc>, window_params = [{transform_indices = @transform_0, window_bounds = array<i64: 1, 8, 32>}, {transform_indices = @transform_1, window_bounds = array<i64: 1, 8, 32>}, {pipeline_mode = #tpu.pipeline_mode<synchronous>, transform_indices = @transform_2, window_bounds = array<i64: 32, 32>}, {pipeline_mode = #tpu.pipeline_mode<synchronous>, transform_indices = @transform_3, window_bounds = array<i64: 1, 32>}, {pipeline_mode = #tpu.pipeline_mode<synchronous>, transform_indices = @transform_4, window_bounds = array<i64: 32, 64>}, {pipeline_mode = #tpu.pipeline_mode<synchronous>, transform_indices = @transform_5, window_bounds = array<i64: 1, 64>}, {pipeline_mode = #tpu.pipeline_mode<synchronous>, transform_indices = @transform_6, window_bounds = array<i64: 32, 32>}, {pipeline_mode = #tpu.pipeline_mode<synchronous>, transform_indices = @transform_7, window_bounds = array<i64: 1, 32>}, {pipeline_mode = #tpu.pipeline_mode<synchronous>, transform_indices = @transform_8, window_bounds = array<i64: 1, 32>}, {pipeline_mode = #tpu.pipeline_mode<synchronous>, transform_indices = @transform_9, window_bounds = array<i64: 1, 32>}, {pipeline_mode = #tpu.pipeline_mode<synchronous>, transform_indices = @transform_10, window_bounds = array<i64: 32, 32>}, {pipeline_mode = #tpu.pipeline_mode<synchronous>, transform_indices = @transform_11, window_bounds = array<i64: 1, 32>}, {pipeline_mode = #tpu.pipeline_mode<synchronous>, transform_indices = @transform_12, window_bounds = array<i64: 32, 64>}, {pipeline_mode = #tpu.pipeline_mode<synchronous>, transform_indices = @transform_13, window_bounds = array<i64: 1, 64>}, {pipeline_mode = #tpu.pipeline_mode<synchronous>, transform_indices = @transform_14, window_bounds = array<i64: 32, 32>}, {pipeline_mode = #tpu.pipeline_mode<synchronous>, transform_indices = @transform_15, window_bounds = array<i64: 1, 32>}, {pipeline_mode = #tpu.pipeline_mode<synchronous>, transform_indices = @transform_16, window_bounds = array<i64: 1, 32>}, {pipeline_mode = #tpu.pipeline_mode<synchronous>, transform_indices = @transform_17, window_bounds = array<i64: 1, 32>}, {pipeline_mode = #tpu.pipeline_mode<synchronous>, transform_indices = @transform_18, window_bounds = array<i64: 32, 64>}, {pipeline_mode = #tpu.pipeline_mode<synchronous>, transform_indices = @transform_19, window_bounds = array<i64: 1, 64>}, {pipeline_mode = #tpu.pipeline_mode<synchronous>, transform_indices = @transform_20, window_bounds = array<i64: 64, 32>}, {pipeline_mode = #tpu.pipeline_mode<synchronous>, transform_indices = @transform_21, window_bounds = array<i64: 1, 32>}, {pipeline_mode = #tpu.pipeline_mode<synchronous>, transform_indices = @transform_22, window_bounds = array<i64: 1, 32>}, {pipeline_mode = #tpu.pipeline_mode<synchronous>, transform_indices = @transform_23, window_bounds = array<i64: 1, 32>}, {transform_indices = @transform_24, window_bounds = array<i64: 1, 8, 32>}]} {
    %c0 = arith.constant 0 : index
    %c0_0 = arith.constant 0 : index
    %c0_1 = arith.constant 0 : index
    %0 = vector.load %arg1[%c0, %c0_0, %c0_1] : memref<1x8x32xf32, #tpu.memory_space<vmem>>, vector<1x8x32xf32>
    %1 = vector.shape_cast %0 : vector<1x8x32xf32> to vector<8x32xf32>
    %c0_2 = arith.constant 0 : index
    %c0_3 = arith.constant 0 : index
    %c0_4 = arith.constant 0 : index
    %2 = vector.load %arg2[%c0_2, %c0_3, %c0_4] : memref<1x8x32xf32, #tpu.memory_space<vmem>>, vector<1x8x32xf32>
    %3 = vector.shape_cast %2 : vector<1x8x32xf32> to vector<8x32xf32>
    %c0_5 = arith.constant 0 : index
    %c0_6 = arith.constant 0 : index
    %4 = vector.load %arg3[%c0_5, %c0_6] : memref<32x32xbf16, #tpu.memory_space<vmem>>, vector<32x32xbf16>
    %c0_7 = arith.constant 0 : index
    %c0_8 = arith.constant 0 : index
    %5 = vector.load %arg4[%c0_7, %c0_8] : memref<1x32xf32, #tpu.memory_space<vmem>>, vector<1x32xf32>
    %c0_9 = arith.constant 0 : index
    %c0_10 = arith.constant 0 : index
    %6 = vector.load %arg5[%c0_9, %c0_10] : memref<32x64xbf16, #tpu.memory_space<vmem>>, vector<32x64xbf16>
    %c0_11 = arith.constant 0 : index
    %c0_12 = arith.constant 0 : index
    %7 = vector.load %arg6[%c0_11, %c0_12] : memref<1x64xf32, #tpu.memory_space<vmem>>, vector<1x64xf32>
    %c0_13 = arith.constant 0 : index
    %c0_14 = arith.constant 0 : index
    %8 = vector.load %arg7[%c0_13, %c0_14] : memref<32x32xbf16, #tpu.memory_space<vmem>>, vector<32x32xbf16>
    %c0_15 = arith.constant 0 : index
    %c0_16 = arith.constant 0 : index
    %9 = vector.load %arg8[%c0_15, %c0_16] : memref<1x32xf32, #tpu.memory_space<vmem>>, vector<1x32xf32>
    %10 = arith.truncf %1 : vector<8x32xf32> to vector<8x32xbf16>
    %cst = arith.constant dense<0.000000e+00> : vector<8x32xf32>
    %11 = tpu.matmul %10, %4, %cst {dimension_numbers = #tpu.dot_dimension_numbers<[1], [0], [0], [1], [0, 0, 1, 1], [], []>} : vector<8x32xbf16>, vector<32x32xbf16>, vector<8x32xf32> -> vector<8x32xf32>
    %12 = vector.broadcast %5 : vector<1x32xf32> to vector<8x32xf32>
    %13 = arith.addf %11, %12 : vector<8x32xf32>
    %14 = arith.truncf %13 : vector<8x32xf32> to vector<8x32xbf16>
    %15 = arith.truncf %1 : vector<8x32xf32> to vector<8x32xbf16>
    %cst_17 = arith.constant dense<0.000000e+00> : vector<8x64xf32>
    %16 = tpu.matmul %15, %6, %cst_17 {dimension_numbers = #tpu.dot_dimension_numbers<[1], [0], [0], [1], [0, 0, 1, 1], [], []>} : vector<8x32xbf16>, vector<32x64xbf16>, vector<8x64xf32> -> vector<8x64xf32>
    %17 = vector.broadcast %7 : vector<1x64xf32> to vector<8x64xf32>
    %18 = arith.addf %16, %17 : vector<8x64xf32>
    %19 = vector.extract_strided_slice %18 {offsets = [0, 0], sizes = [8, 32], strides = [1, 1]} : vector<8x64xf32> to vector<8x32xf32>
    %20 = arith.truncf %19 : vector<8x32xf32> to vector<8x32xbf16>
    %21 = vector.extract_strided_slice %18 {offsets = [0, 32], sizes = [8, 32], strides = [1, 1]} : vector<8x64xf32> to vector<8x32xf32>
    %22 = arith.truncf %21 : vector<8x32xf32> to vector<8x32xbf16>
    %23 = vector.extract_strided_slice %14 {offsets = [0, 0], sizes = [8, 8], strides = [1, 1]} : vector<8x32xbf16> to vector<8x8xbf16>
    %24 = vector.extract_strided_slice %20 {offsets = [0, 0], sizes = [8, 8], strides = [1, 1]} : vector<8x32xbf16> to vector<8x8xbf16>
    %cst_18 = arith.constant dense<0.000000e+00> : vector<8x8xf32>
    %25 = tpu.matmul %23, %24, %cst_18 {dimension_numbers = #tpu.dot_dimension_numbers<[1], [1], [0], [0], [0, 0, 1, 0], [], []>} : vector<8x8xbf16>, vector<8x8xbf16>, vector<8x8xf32> -> vector<8x8xf32>
    %cst_19 = arith.constant 0.353553385 : f32
    %26 = vector.broadcast %cst_19 : f32 to vector<8x8xf32>
    %27 = arith.mulf %25, %26 : vector<8x8xf32>
    %cst_20 = arith.constant dense<0xFF800000> : vector<8xf32>
    %28 = vector.multi_reduction <maximumf>, %27, %cst_20 [1] : vector<8x8xf32> to vector<8xf32>
    %29 = vector.shape_cast %28 : vector<8xf32> to vector<8x1xf32>
    %30 = vector.broadcast %29 : vector<8x1xf32> to vector<8x8xf32>
    %31 = arith.subf %27, %30 : vector<8x8xf32>
    %32 = math.exp %31 : vector<8x8xf32>
    %cst_21 = arith.constant dense<0.000000e+00> : vector<8xf32>
    %33 = vector.multi_reduction <add>, %32, %cst_21 [1] : vector<8x8xf32> to vector<8xf32>
    %34 = vector.shape_cast %33 : vector<8xf32> to vector<8x1xf32>
    %35 = vector.broadcast %34 : vector<8x1xf32> to vector<8x8xf32>
    %36 = arith.divf %32, %35 : vector<8x8xf32>
    %37 = arith.truncf %36 : vector<8x8xf32> to vector<8x8xbf16>
    %38 = vector.extract_strided_slice %22 {offsets = [0, 0], sizes = [8, 8], strides = [1, 1]} : vector<8x32xbf16> to vector<8x8xbf16>
    %cst_22 = arith.constant dense<0.000000e+00> : vector<8x8xf32>
    %39 = tpu.matmul %37, %38, %cst_22 {dimension_numbers = #tpu.dot_dimension_numbers<[1], [0], [0], [1], [0, 0, 1, 1], [], []>} : vector<8x8xbf16>, vector<8x8xbf16>, vector<8x8xf32> -> vector<8x8xf32>
    %40 = arith.truncf %39 : vector<8x8xf32> to vector<8x8xbf16>
    %c0_23 = arith.constant 0 : index
    %c0_24 = arith.constant 0 : index
    %41 = vector.load %arg26[%c0_23, %c0_24] : memref<8x32xbf16, #tpu.memory_space<vmem>>, vector<8x8xbf16>
    tpu.vector_store %arg26[%c0_23, %c0_24], %40 {strides = array<i32>} : memref<8x32xbf16, #tpu.memory_space<vmem>>, vector<8x8xbf16>,
    %42 = vector.extract_strided_slice %14 {offsets = [0, 8], sizes = [8, 8], strides = [1, 1]} : vector<8x32xbf16> to vector<8x8xbf16>
    %43 = vector.extract_strided_slice %20 {offsets = [0, 8], sizes = [8, 8], strides = [1, 1]} : vector<8x32xbf16> to vector<8x8xbf16>
    %cst_25 = arith.constant dense<0.000000e+00> : vector<8x8xf32>
    %44 = tpu.matmul %42, %43, %cst_25 {dimension_numbers = #tpu.dot_dimension_numbers<[1], [1], [0], [0], [0, 0, 1, 0], [], []>} : vector<8x8xbf16>, vector<8x8xbf16>, vector<8x8xf32> -> vector<8x8xf32>
    %cst_26 = arith.constant 0.353553385 : f32
    %45 = vector.broadcast %cst_26 : f32 to vector<8x8xf32>
    %46 = arith.mulf %44, %45 : vector<8x8xf32>
    %cst_27 = arith.constant dense<0xFF800000> : vector<8xf32>
    %47 = vector.multi_reduction <maximumf>, %46, %cst_27 [1] : vector<8x8xf32> to vector<8xf32>
    %48 = vector.shape_cast %47 : vector<8xf32> to vector<8x1xf32>
    %49 = vector.broadcast %48 : vector<8x1xf32> to vector<8x8xf32>
    %50 = arith.subf %46, %49 : vector<8x8xf32>
    %51 = math.exp %50 : vector<8x8xf32>
    %cst_28 = arith.constant dense<0.000000e+00> : vector<8xf32>
    %52 = vector.multi_reduction <add>, %51, %cst_28 [1] : vector<8x8xf32> to vector<8xf32>
    %53 = vector.shape_cast %52 : vector<8xf32> to vector<8x1xf32>
    %54 = vector.broadcast %53 : vector<8x1xf32> to vector<8x8xf32>
    %55 = arith.divf %51, %54 : vector<8x8xf32>
    %56 = arith.truncf %55 : vector<8x8xf32> to vector<8x8xbf16>
    %57 = vector.extract_strided_slice %22 {offsets = [0, 8], sizes = [8, 8], strides = [1, 1]} : vector<8x32xbf16> to vector<8x8xbf16>
    %cst_29 = arith.constant dense<0.000000e+00> : vector<8x8xf32>
    %58 = tpu.matmul %56, %57, %cst_29 {dimension_numbers = #tpu.dot_dimension_numbers<[1], [0], [0], [1], [0, 0, 1, 1], [], []>} : vector<8x8xbf16>, vector<8x8xbf16>, vector<8x8xf32> -> vector<8x8xf32>
    %59 = arith.truncf %58 : vector<8x8xf32> to vector<8x8xbf16>
    %c0_30 = arith.constant 0 : index
    %c8 = arith.constant 8 : index
    %60 = vector.load %arg26[%c0_30, %c8] : memref<8x32xbf16, #tpu.memory_space<vmem>>, vector<8x8xbf16>
    tpu.vector_store %arg26[%c0_30, %c8], %59 {strides = array<i32>} : memref<8x32xbf16, #tpu.memory_space<vmem>>, vector<8x8xbf16>,
    %61 = vector.extract_strided_slice %14 {offsets = [0, 16], sizes = [8, 8], strides = [1, 1]} : vector<8x32xbf16> to vector<8x8xbf16>
    %62 = vector.extract_strided_slice %20 {offsets = [0, 16], sizes = [8, 8], strides = [1, 1]} : vector<8x32xbf16> to vector<8x8xbf16>
    %cst_31 = arith.constant dense<0.000000e+00> : vector<8x8xf32>
    %63 = tpu.matmul %61, %62, %cst_31 {dimension_numbers = #tpu.dot_dimension_numbers<[1], [1], [0], [0], [0, 0, 1, 0], [], []>} : vector<8x8xbf16>, vector<8x8xbf16>, vector<8x8xf32> -> vector<8x8xf32>
    %cst_32 = arith.constant 0.353553385 : f32
    %64 = vector.broadcast %cst_32 : f32 to vector<8x8xf32>
    %65 = arith.mulf %63, %64 : vector<8x8xf32>
    %cst_33 = arith.constant dense<0xFF800000> : vector<8xf32>
    %66 = vector.multi_reduction <maximumf>, %65, %cst_33 [1] : vector<8x8xf32> to vector<8xf32>
    %67 = vector.shape_cast %66 : vector<8xf32> to vector<8x1xf32>
    %68 = vector.broadcast %67 : vector<8x1xf32> to vector<8x8xf32>
    %69 = arith.subf %65, %68 : vector<8x8xf32>
    %70 = math.exp %69 : vector<8x8xf32>
    %cst_34 = arith.constant dense<0.000000e+00> : vector<8xf32>
    %71 = vector.multi_reduction <add>, %70, %cst_34 [1] : vector<8x8xf32> to vector<8xf32>
    %72 = vector.shape_cast %71 : vector<8xf32> to vector<8x1xf32>
    %73 = vector.broadcast %72 : vector<8x1xf32> to vector<8x8xf32>
    %74 = arith.divf %70, %73 : vector<8x8xf32>
    %75 = arith.truncf %74 : vector<8x8xf32> to vector<8x8xbf16>
    %76 = vector.extract_strided_slice %22 {offsets = [0, 16], sizes = [8, 8], strides = [1, 1]} : vector<8x32xbf16> to vector<8x8xbf16>
    %cst_35 = arith.constant dense<0.000000e+00> : vector<8x8xf32>
    %77 = tpu.matmul %75, %76, %cst_35 {dimension_numbers = #tpu.dot_dimension_numbers<[1], [0], [0], [1], [0, 0, 1, 1], [], []>} : vector<8x8xbf16>, vector<8x8xbf16>, vector<8x8xf32> -> vector<8x8xf32>
    %78 = arith.truncf %77 : vector<8x8xf32> to vector<8x8xbf16>
    %c0_36 = arith.constant 0 : index
    %c16 = arith.constant 16 : index
    %79 = vector.load %arg26[%c0_36, %c16] : memref<8x32xbf16, #tpu.memory_space<vmem>>, vector<8x8xbf16>
    tpu.vector_store %arg26[%c0_36, %c16], %78 {strides = array<i32>} : memref<8x32xbf16, #tpu.memory_space<vmem>>, vector<8x8xbf16>,
    %80 = vector.extract_strided_slice %14 {offsets = [0, 24], sizes = [8, 8], strides = [1, 1]} : vector<8x32xbf16> to vector<8x8xbf16>
    %81 = vector.extract_strided_slice %20 {offsets = [0, 24], sizes = [8, 8], strides = [1, 1]} : vector<8x32xbf16> to vector<8x8xbf16>
    %cst_37 = arith.constant dense<0.000000e+00> : vector<8x8xf32>
    %82 = tpu.matmul %80, %81, %cst_37 {dimension_numbers = #tpu.dot_dimension_numbers<[1], [1], [0], [0], [0, 0, 1, 0], [], []>} : vector<8x8xbf16>, vector<8x8xbf16>, vector<8x8xf32> -> vector<8x8xf32>
    %cst_38 = arith.constant 0.353553385 : f32
    %83 = vector.broadcast %cst_38 : f32 to vector<8x8xf32>
    %84 = arith.mulf %82, %83 : vector<8x8xf32>
    %cst_39 = arith.constant dense<0xFF800000> : vector<8xf32>
    %85 = vector.multi_reduction <maximumf>, %84, %cst_39 [1] : vector<8x8xf32> to vector<8xf32>
    %86 = vector.shape_cast %85 : vector<8xf32> to vector<8x1xf32>
    %87 = vector.broadcast %86 : vector<8x1xf32> to vector<8x8xf32>
    %88 = arith.subf %84, %87 : vector<8x8xf32>
    %89 = math.exp %88 : vector<8x8xf32>
    %cst_40 = arith.constant dense<0.000000e+00> : vector<8xf32>
    %90 = vector.multi_reduction <add>, %89, %cst_40 [1] : vector<8x8xf32> to vector<8xf32>
    %91 = vector.shape_cast %90 : vector<8xf32> to vector<8x1xf32>
    %92 = vector.broadcast %91 : vector<8x1xf32> to vector<8x8xf32>
    %93 = arith.divf %89, %92 : vector<8x8xf32>
    %94 = arith.truncf %93 : vector<8x8xf32> to vector<8x8xbf16>
    %95 = vector.extract_strided_slice %22 {offsets = [0, 24], sizes = [8, 8], strides = [1, 1]} : vector<8x32xbf16> to vector<8x8xbf16>
    %cst_41 = arith.constant dense<0.000000e+00> : vector<8x8xf32>
    %96 = tpu.matmul %94, %95, %cst_41 {dimension_numbers = #tpu.dot_dimension_numbers<[1], [0], [0], [1], [0, 0, 1, 1], [], []>} : vector<8x8xbf16>, vector<8x8xbf16>, vector<8x8xf32> -> vector<8x8xf32>
    %97 = arith.truncf %96 : vector<8x8xf32> to vector<8x8xbf16>
    %c0_42 = arith.constant 0 : index
    %c24 = arith.constant 24 : index
    %98 = vector.load %arg26[%c0_42, %c24] : memref<8x32xbf16, #tpu.memory_space<vmem>>, vector<8x8xbf16>
    tpu.vector_store %arg26[%c0_42, %c24], %97 {strides = array<i32>} : memref<8x32xbf16, #tpu.memory_space<vmem>>, vector<8x8xbf16>,
    %c0_43 = arith.constant 0 : index
    %c0_44 = arith.constant 0 : index
    %99 = vector.load %arg26[%c0_43, %c0_44] : memref<8x32xbf16, #tpu.memory_space<vmem>>, vector<8x32xbf16>
    %cst_45 = arith.constant dense<0.000000e+00> : vector<8x32xf32>
    %100 = tpu.matmul %99, %8, %cst_45 {dimension_numbers = #tpu.dot_dimension_numbers<[1], [0], [0], [1], [0, 0, 1, 1], [], []>} : vector<8x32xbf16>, vector<32x32xbf16>, vector<8x32xf32> -> vector<8x32xf32>
    %101 = vector.broadcast %9 : vector<1x32xf32> to vector<8x32xf32>
    %102 = arith.addf %100, %101 : vector<8x32xf32>
    %103 = arith.addf %1, %102 : vector<8x32xf32>
    %c0_46 = arith.constant 0 : index
    %c0_47 = arith.constant 0 : index
    %104 = vector.load %arg9[%c0_46, %c0_47] : memref<1x32xf32, #tpu.memory_space<vmem>>, vector<1x32xf32>
    %c0_48 = arith.constant 0 : index
    %c0_49 = arith.constant 0 : index
    %105 = vector.load %arg10[%c0_48, %c0_49] : memref<1x32xf32, #tpu.memory_space<vmem>>, vector<1x32xf32>
    %cst_50 = arith.constant dense<0.000000e+00> : vector<8xf32>
    %106 = vector.multi_reduction <add>, %103, %cst_50 [1] : vector<8x32xf32> to vector<8xf32>
    %107 = vector.shape_cast %106 : vector<8xf32> to vector<8x1xf32>
    %cst_51 = arith.constant 3.200000e+01 : f32
    %108 = vector.broadcast %cst_51 : f32 to vector<8x1xf32>
    %109 = arith.divf %107, %108 : vector<8x1xf32>
    %110 = vector.broadcast %109 : vector<8x1xf32> to vector<8x32xf32>
    %111 = arith.subf %103, %110 : vector<8x32xf32>
    %112 = arith.mulf %111, %111 : vector<8x32xf32>
    %cst_52 = arith.constant dense<0.000000e+00> : vector<8xf32>
    %113 = vector.multi_reduction <add>, %112, %cst_52 [1] : vector<8x32xf32> to vector<8xf32>
    %114 = vector.shape_cast %113 : vector<8xf32> to vector<8x1xf32>
    %cst_53 = arith.constant 3.200000e+01 : f32
    %115 = vector.broadcast %cst_53 : f32 to vector<8x1xf32>
    %116 = arith.divf %114, %115 : vector<8x1xf32>
    %117 = vector.broadcast %109 : vector<8x1xf32> to vector<8x32xf32>
    %118 = arith.subf %103, %117 : vector<8x32xf32>
    %cst_54 = arith.constant 9.99999974E-6 : f32
    %119 = vector.broadcast %cst_54 : f32 to vector<8x1xf32>
    %120 = arith.addf %116, %119 : vector<8x1xf32>
    %121 = math.rsqrt %120 : vector<8x1xf32>
    %122 = vector.broadcast %121 : vector<8x1xf32> to vector<8x32xf32>
    %123 = arith.mulf %118, %122 : vector<8x32xf32>
    %124 = vector.broadcast %104 : vector<1x32xf32> to vector<8x32xf32>
    %125 = arith.mulf %123, %124 : vector<8x32xf32>
    %126 = vector.broadcast %105 : vector<1x32xf32> to vector<8x32xf32>
    %127 = arith.addf %125, %126 : vector<8x32xf32>
    %c0_55 = arith.constant 0 : index
    %c0_56 = arith.constant 0 : index
    %128 = vector.load %arg11[%c0_55, %c0_56] : memref<32x32xbf16, #tpu.memory_space<vmem>>, vector<32x32xbf16>
    %c0_57 = arith.constant 0 : index
    %c0_58 = arith.constant 0 : index
    %129 = vector.load %arg12[%c0_57, %c0_58] : memref<1x32xf32, #tpu.memory_space<vmem>>, vector<1x32xf32>
    %c0_59 = arith.constant 0 : index
    %c0_60 = arith.constant 0 : index
    %130 = vector.load %arg13[%c0_59, %c0_60] : memref<32x64xbf16, #tpu.memory_space<vmem>>, vector<32x64xbf16>
    %c0_61 = arith.constant 0 : index
    %c0_62 = arith.constant 0 : index
    %131 = vector.load %arg14[%c0_61, %c0_62] : memref<1x64xf32, #tpu.memory_space<vmem>>, vector<1x64xf32>
    %c0_63 = arith.constant 0 : index
    %c0_64 = arith.constant 0 : index
    %132 = vector.load %arg15[%c0_63, %c0_64] : memref<32x32xbf16, #tpu.memory_space<vmem>>, vector<32x32xbf16>
    %c0_65 = arith.constant 0 : index
    %c0_66 = arith.constant 0 : index
    %133 = vector.load %arg16[%c0_65, %c0_66] : memref<1x32xf32, #tpu.memory_space<vmem>>, vector<1x32xf32>
    %134 = arith.truncf %127 : vector<8x32xf32> to vector<8x32xbf16>
    %cst_67 = arith.constant dense<0.000000e+00> : vector<8x32xf32>
    %135 = tpu.matmul %134, %128, %cst_67 {dimension_numbers = #tpu.dot_dimension_numbers<[1], [0], [0], [1], [0, 0, 1, 1], [], []>} : vector<8x32xbf16>, vector<32x32xbf16>, vector<8x32xf32> -> vector<8x32xf32>
    %136 = vector.broadcast %129 : vector<1x32xf32> to vector<8x32xf32>
    %137 = arith.addf %135, %136 : vector<8x32xf32>
    %138 = arith.truncf %137 : vector<8x32xf32> to vector<8x32xbf16>
    %139 = arith.truncf %3 : vector<8x32xf32> to vector<8x32xbf16>
    %cst_68 = arith.constant dense<0.000000e+00> : vector<8x64xf32>
    %140 = tpu.matmul %139, %130, %cst_68 {dimension_numbers = #tpu.dot_dimension_numbers<[1], [0], [0], [1], [0, 0, 1, 1], [], []>} : vector<8x32xbf16>, vector<32x64xbf16>, vector<8x64xf32> -> vector<8x64xf32>
    %141 = vector.broadcast %131 : vector<1x64xf32> to vector<8x64xf32>
    %142 = arith.addf %140, %141 : vector<8x64xf32>
    %143 = vector.extract_strided_slice %142 {offsets = [0, 0], sizes = [8, 32], strides = [1, 1]} : vector<8x64xf32> to vector<8x32xf32>
    %144 = arith.truncf %143 : vector<8x32xf32> to vector<8x32xbf16>
    %145 = vector.extract_strided_slice %142 {offsets = [0, 32], sizes = [8, 32], strides = [1, 1]} : vector<8x64xf32> to vector<8x32xf32>
    %146 = arith.truncf %145 : vector<8x32xf32> to vector<8x32xbf16>
    %147 = vector.extract_strided_slice %138 {offsets = [0, 0], sizes = [8, 8], strides = [1, 1]} : vector<8x32xbf16> to vector<8x8xbf16>
    %148 = vector.extract_strided_slice %144 {offsets = [0, 0], sizes = [8, 8], strides = [1, 1]} : vector<8x32xbf16> to vector<8x8xbf16>
    %cst_69 = arith.constant dense<0.000000e+00> : vector<8x8xf32>
    %149 = tpu.matmul %147, %148, %cst_69 {dimension_numbers = #tpu.dot_dimension_numbers<[1], [1], [0], [0], [0, 0, 1, 0], [], []>} : vector<8x8xbf16>, vector<8x8xbf16>, vector<8x8xf32> -> vector<8x8xf32>
    %cst_70 = arith.constant 0.353553385 : f32
    %150 = vector.broadcast %cst_70 : f32 to vector<8x8xf32>
    %151 = arith.mulf %149, %150 : vector<8x8xf32>
    %cst_71 = arith.constant dense<0xFF800000> : vector<8xf32>
    %152 = vector.multi_reduction <maximumf>, %151, %cst_71 [1] : vector<8x8xf32> to vector<8xf32>
    %153 = vector.shape_cast %152 : vector<8xf32> to vector<8x1xf32>
    %154 = vector.broadcast %153 : vector<8x1xf32> to vector<8x8xf32>
    %155 = arith.subf %151, %154 : vector<8x8xf32>
    %156 = math.exp %155 : vector<8x8xf32>
    %cst_72 = arith.constant dense<0.000000e+00> : vector<8xf32>
    %157 = vector.multi_reduction <add>, %156, %cst_72 [1] : vector<8x8xf32> to vector<8xf32>
    %158 = vector.shape_cast %157 : vector<8xf32> to vector<8x1xf32>
    %159 = vector.broadcast %158 : vector<8x1xf32> to vector<8x8xf32>
    %160 = arith.divf %156, %159 : vector<8x8xf32>
    %161 = arith.truncf %160 : vector<8x8xf32> to vector<8x8xbf16>
    %162 = vector.extract_strided_slice %146 {offsets = [0, 0], sizes = [8, 8], strides = [1, 1]} : vector<8x32xbf16> to vector<8x8xbf16>
    %cst_73 = arith.constant dense<0.000000e+00> : vector<8x8xf32>
    %163 = tpu.matmul %161, %162, %cst_73 {dimension_numbers = #tpu.dot_dimension_numbers<[1], [0], [0], [1], [0, 0, 1, 1], [], []>} : vector<8x8xbf16>, vector<8x8xbf16>, vector<8x8xf32> -> vector<8x8xf32>
    %164 = arith.truncf %163 : vector<8x8xf32> to vector<8x8xbf16>
    %c0_74 = arith.constant 0 : index
    %c0_75 = arith.constant 0 : index
    %165 = vector.load %arg26[%c0_74, %c0_75] : memref<8x32xbf16, #tpu.memory_space<vmem>>, vector<8x8xbf16>
    tpu.vector_store %arg26[%c0_74, %c0_75], %164 {strides = array<i32>} : memref<8x32xbf16, #tpu.memory_space<vmem>>, vector<8x8xbf16>,
    %166 = vector.extract_strided_slice %138 {offsets = [0, 8], sizes = [8, 8], strides = [1, 1]} : vector<8x32xbf16> to vector<8x8xbf16>
    %167 = vector.extract_strided_slice %144 {offsets = [0, 8], sizes = [8, 8], strides = [1, 1]} : vector<8x32xbf16> to vector<8x8xbf16>
    %cst_76 = arith.constant dense<0.000000e+00> : vector<8x8xf32>
    %168 = tpu.matmul %166, %167, %cst_76 {dimension_numbers = #tpu.dot_dimension_numbers<[1], [1], [0], [0], [0, 0, 1, 0], [], []>} : vector<8x8xbf16>, vector<8x8xbf16>, vector<8x8xf32> -> vector<8x8xf32>
    %cst_77 = arith.constant 0.353553385 : f32
    %169 = vector.broadcast %cst_77 : f32 to vector<8x8xf32>
    %170 = arith.mulf %168, %169 : vector<8x8xf32>
    %cst_78 = arith.constant dense<0xFF800000> : vector<8xf32>
    %171 = vector.multi_reduction <maximumf>, %170, %cst_78 [1] : vector<8x8xf32> to vector<8xf32>
    %172 = vector.shape_cast %171 : vector<8xf32> to vector<8x1xf32>
    %173 = vector.broadcast %172 : vector<8x1xf32> to vector<8x8xf32>
    %174 = arith.subf %170, %173 : vector<8x8xf32>
    %175 = math.exp %174 : vector<8x8xf32>
    %cst_79 = arith.constant dense<0.000000e+00> : vector<8xf32>
    %176 = vector.multi_reduction <add>, %175, %cst_79 [1] : vector<8x8xf32> to vector<8xf32>
    %177 = vector.shape_cast %176 : vector<8xf32> to vector<8x1xf32>
    %178 = vector.broadcast %177 : vector<8x1xf32> to vector<8x8xf32>
    %179 = arith.divf %175, %178 : vector<8x8xf32>
    %180 = arith.truncf %179 : vector<8x8xf32> to vector<8x8xbf16>
    %181 = vector.extract_strided_slice %146 {offsets = [0, 8], sizes = [8, 8], strides = [1, 1]} : vector<8x32xbf16> to vector<8x8xbf16>
    %cst_80 = arith.constant dense<0.000000e+00> : vector<8x8xf32>
    %182 = tpu.matmul %180, %181, %cst_80 {dimension_numbers = #tpu.dot_dimension_numbers<[1], [0], [0], [1], [0, 0, 1, 1], [], []>} : vector<8x8xbf16>, vector<8x8xbf16>, vector<8x8xf32> -> vector<8x8xf32>
    %183 = arith.truncf %182 : vector<8x8xf32> to vector<8x8xbf16>
    %c0_81 = arith.constant 0 : index
    %c8_82 = arith.constant 8 : index
    %184 = vector.load %arg26[%c0_81, %c8_82] : memref<8x32xbf16, #tpu.memory_space<vmem>>, vector<8x8xbf16>
    tpu.vector_store %arg26[%c0_81, %c8_82], %183 {strides = array<i32>} : memref<8x32xbf16, #tpu.memory_space<vmem>>, vector<8x8xbf16>,
    %185 = vector.extract_strided_slice %138 {offsets = [0, 16], sizes = [8, 8], strides = [1, 1]} : vector<8x32xbf16> to vector<8x8xbf16>
    %186 = vector.extract_strided_slice %144 {offsets = [0, 16], sizes = [8, 8], strides = [1, 1]} : vector<8x32xbf16> to vector<8x8xbf16>
    %cst_83 = arith.constant dense<0.000000e+00> : vector<8x8xf32>
    %187 = tpu.matmul %185, %186, %cst_83 {dimension_numbers = #tpu.dot_dimension_numbers<[1], [1], [0], [0], [0, 0, 1, 0], [], []>} : vector<8x8xbf16>, vector<8x8xbf16>, vector<8x8xf32> -> vector<8x8xf32>
    %cst_84 = arith.constant 0.353553385 : f32
    %188 = vector.broadcast %cst_84 : f32 to vector<8x8xf32>
    %189 = arith.mulf %187, %188 : vector<8x8xf32>
    %cst_85 = arith.constant dense<0xFF800000> : vector<8xf32>
    %190 = vector.multi_reduction <maximumf>, %189, %cst_85 [1] : vector<8x8xf32> to vector<8xf32>
    %191 = vector.shape_cast %190 : vector<8xf32> to vector<8x1xf32>
    %192 = vector.broadcast %191 : vector<8x1xf32> to vector<8x8xf32>
    %193 = arith.subf %189, %192 : vector<8x8xf32>
    %194 = math.exp %193 : vector<8x8xf32>
    %cst_86 = arith.constant dense<0.000000e+00> : vector<8xf32>
    %195 = vector.multi_reduction <add>, %194, %cst_86 [1] : vector<8x8xf32> to vector<8xf32>
    %196 = vector.shape_cast %195 : vector<8xf32> to vector<8x1xf32>
    %197 = vector.broadcast %196 : vector<8x1xf32> to vector<8x8xf32>
    %198 = arith.divf %194, %197 : vector<8x8xf32>
    %199 = arith.truncf %198 : vector<8x8xf32> to vector<8x8xbf16>
    %200 = vector.extract_strided_slice %146 {offsets = [0, 16], sizes = [8, 8], strides = [1, 1]} : vector<8x32xbf16> to vector<8x8xbf16>
    %cst_87 = arith.constant dense<0.000000e+00> : vector<8x8xf32>
    %201 = tpu.matmul %199, %200, %cst_87 {dimension_numbers = #tpu.dot_dimension_numbers<[1], [0], [0], [1], [0, 0, 1, 1], [], []>} : vector<8x8xbf16>, vector<8x8xbf16>, vector<8x8xf32> -> vector<8x8xf32>
    %202 = arith.truncf %201 : vector<8x8xf32> to vector<8x8xbf16>
    %c0_88 = arith.constant 0 : index
    %c16_89 = arith.constant 16 : index
    %203 = vector.load %arg26[%c0_88, %c16_89] : memref<8x32xbf16, #tpu.memory_space<vmem>>, vector<8x8xbf16>
    tpu.vector_store %arg26[%c0_88, %c16_89], %202 {strides = array<i32>} : memref<8x32xbf16, #tpu.memory_space<vmem>>, vector<8x8xbf16>,
    %204 = vector.extract_strided_slice %138 {offsets = [0, 24], sizes = [8, 8], strides = [1, 1]} : vector<8x32xbf16> to vector<8x8xbf16>
    %205 = vector.extract_strided_slice %144 {offsets = [0, 24], sizes = [8, 8], strides = [1, 1]} : vector<8x32xbf16> to vector<8x8xbf16>
    %cst_90 = arith.constant dense<0.000000e+00> : vector<8x8xf32>
    %206 = tpu.matmul %204, %205, %cst_90 {dimension_numbers = #tpu.dot_dimension_numbers<[1], [1], [0], [0], [0, 0, 1, 0], [], []>} : vector<8x8xbf16>, vector<8x8xbf16>, vector<8x8xf32> -> vector<8x8xf32>
    %cst_91 = arith.constant 0.353553385 : f32
    %207 = vector.broadcast %cst_91 : f32 to vector<8x8xf32>
    %208 = arith.mulf %206, %207 : vector<8x8xf32>
    %cst_92 = arith.constant dense<0xFF800000> : vector<8xf32>
    %209 = vector.multi_reduction <maximumf>, %208, %cst_92 [1] : vector<8x8xf32> to vector<8xf32>
    %210 = vector.shape_cast %209 : vector<8xf32> to vector<8x1xf32>
    %211 = vector.broadcast %210 : vector<8x1xf32> to vector<8x8xf32>
    %212 = arith.subf %208, %211 : vector<8x8xf32>
    %213 = math.exp %212 : vector<8x8xf32>
    %cst_93 = arith.constant dense<0.000000e+00> : vector<8xf32>
    %214 = vector.multi_reduction <add>, %213, %cst_93 [1] : vector<8x8xf32> to vector<8xf32>
    %215 = vector.shape_cast %214 : vector<8xf32> to vector<8x1xf32>
    %216 = vector.broadcast %215 : vector<8x1xf32> to vector<8x8xf32>
    %217 = arith.divf %213, %216 : vector<8x8xf32>
    %218 = arith.truncf %217 : vector<8x8xf32> to vector<8x8xbf16>
    %219 = vector.extract_strided_slice %146 {offsets = [0, 24], sizes = [8, 8], strides = [1, 1]} : vector<8x32xbf16> to vector<8x8xbf16>
    %cst_94 = arith.constant dense<0.000000e+00> : vector<8x8xf32>
    %220 = tpu.matmul %218, %219, %cst_94 {dimension_numbers = #tpu.dot_dimension_numbers<[1], [0], [0], [1], [0, 0, 1, 1], [], []>} : vector<8x8xbf16>, vector<8x8xbf16>, vector<8x8xf32> -> vector<8x8xf32>
    %221 = arith.truncf %220 : vector<8x8xf32> to vector<8x8xbf16>
    %c0_95 = arith.constant 0 : index
    %c24_96 = arith.constant 24 : index
    %222 = vector.load %arg26[%c0_95, %c24_96] : memref<8x32xbf16, #tpu.memory_space<vmem>>, vector<8x8xbf16>
    tpu.vector_store %arg26[%c0_95, %c24_96], %221 {strides = array<i32>} : memref<8x32xbf16, #tpu.memory_space<vmem>>, vector<8x8xbf16>,
    %c0_97 = arith.constant 0 : index
    %c0_98 = arith.constant 0 : index
    %223 = vector.load %arg26[%c0_97, %c0_98] : memref<8x32xbf16, #tpu.memory_space<vmem>>, vector<8x32xbf16>
    %cst_99 = arith.constant dense<0.000000e+00> : vector<8x32xf32>
    %224 = tpu.matmul %223, %132, %cst_99 {dimension_numbers = #tpu.dot_dimension_numbers<[1], [0], [0], [1], [0, 0, 1, 1], [], []>} : vector<8x32xbf16>, vector<32x32xbf16>, vector<8x32xf32> -> vector<8x32xf32>
    %225 = vector.broadcast %133 : vector<1x32xf32> to vector<8x32xf32>
    %226 = arith.addf %224, %225 : vector<8x32xf32>
    %227 = arith.addf %127, %226 : vector<8x32xf32>
    %c0_100 = arith.constant 0 : index
    %c0_101 = arith.constant 0 : index
    %228 = vector.load %arg17[%c0_100, %c0_101] : memref<1x32xf32, #tpu.memory_space<vmem>>, vector<1x32xf32>
    %c0_102 = arith.constant 0 : index
    %c0_103 = arith.constant 0 : index
    %229 = vector.load %arg18[%c0_102, %c0_103] : memref<1x32xf32, #tpu.memory_space<vmem>>, vector<1x32xf32>
    %cst_104 = arith.constant dense<0.000000e+00> : vector<8xf32>
    %230 = vector.multi_reduction <add>, %227, %cst_104 [1] : vector<8x32xf32> to vector<8xf32>
    %231 = vector.shape_cast %230 : vector<8xf32> to vector<8x1xf32>
    %cst_105 = arith.constant 3.200000e+01 : f32
    %232 = vector.broadcast %cst_105 : f32 to vector<8x1xf32>
    %233 = arith.divf %231, %232 : vector<8x1xf32>
    %234 = vector.broadcast %233 : vector<8x1xf32> to vector<8x32xf32>
    %235 = arith.subf %227, %234 : vector<8x32xf32>
    %236 = arith.mulf %235, %235 : vector<8x32xf32>
    %cst_106 = arith.constant dense<0.000000e+00> : vector<8xf32>
    %237 = vector.multi_reduction <add>, %236, %cst_106 [1] : vector<8x32xf32> to vector<8xf32>
    %238 = vector.shape_cast %237 : vector<8xf32> to vector<8x1xf32>
    %cst_107 = arith.constant 3.200000e+01 : f32
    %239 = vector.broadcast %cst_107 : f32 to vector<8x1xf32>
    %240 = arith.divf %238, %239 : vector<8x1xf32>
    %241 = vector.broadcast %233 : vector<8x1xf32> to vector<8x32xf32>
    %242 = arith.subf %227, %241 : vector<8x32xf32>
    %cst_108 = arith.constant 9.99999974E-6 : f32
    %243 = vector.broadcast %cst_108 : f32 to vector<8x1xf32>
    %244 = arith.addf %240, %243 : vector<8x1xf32>
    %245 = math.rsqrt %244 : vector<8x1xf32>
    %246 = vector.broadcast %245 : vector<8x1xf32> to vector<8x32xf32>
    %247 = arith.mulf %242, %246 : vector<8x32xf32>
    %248 = vector.broadcast %228 : vector<1x32xf32> to vector<8x32xf32>
    %249 = arith.mulf %247, %248 : vector<8x32xf32>
    %250 = vector.broadcast %229 : vector<1x32xf32> to vector<8x32xf32>
    %251 = arith.addf %249, %250 : vector<8x32xf32>
    %252 = arith.truncf %251 : vector<8x32xf32> to vector<8x32xbf16>
    %c0_109 = arith.constant 0 : index
    %c0_110 = arith.constant 0 : index
    %253 = vector.load %arg19[%c0_109, %c0_110] : memref<32x64xbf16, #tpu.memory_space<vmem>>, vector<32x64xbf16>
    %cst_111 = arith.constant dense<0.000000e+00> : vector<8x64xf32>
    %254 = tpu.matmul %252, %253, %cst_111 {dimension_numbers = #tpu.dot_dimension_numbers<[1], [0], [0], [1], [0, 0, 1, 1], [], []>} : vector<8x32xbf16>, vector<32x64xbf16>, vector<8x64xf32> -> vector<8x64xf32>
    %c0_112 = arith.constant 0 : index
    %c0_113 = arith.constant 0 : index
    %255 = vector.load %arg20[%c0_112, %c0_113] : memref<1x64xf32, #tpu.memory_space<vmem>>, vector<1x64xf32>
    %256 = vector.broadcast %255 : vector<1x64xf32> to vector<8x64xf32>
    %257 = arith.addf %254, %256 : vector<8x64xf32>
    %cst_114 = arith.constant 0.000000e+00 : f32
    %258 = vector.broadcast %cst_114 : f32 to vector<8x64xf32>
    %259 = arith.maximumf %257, %258 : vector<8x64xf32>
    %260 = arith.truncf %259 : vector<8x64xf32> to vector<8x64xbf16>
    %c0_115 = arith.constant 0 : index
    %c0_116 = arith.constant 0 : index
    %261 = vector.load %arg21[%c0_115, %c0_116] : memref<64x32xbf16, #tpu.memory_space<vmem>>, vector<64x32xbf16>
    %cst_117 = arith.constant dense<0.000000e+00> : vector<8x32xf32>
    %262 = tpu.matmul %260, %261, %cst_117 {dimension_numbers = #tpu.dot_dimension_numbers<[1], [0], [0], [1], [0, 0, 1, 1], [], []>} : vector<8x64xbf16>, vector<64x32xbf16>, vector<8x32xf32> -> vector<8x32xf32>
    %c0_118 = arith.constant 0 : index
    %c0_119 = arith.constant 0 : index
    %263 = vector.load %arg22[%c0_118, %c0_119] : memref<1x32xf32, #tpu.memory_space<vmem>>, vector<1x32xf32>
    %264 = vector.broadcast %263 : vector<1x32xf32> to vector<8x32xf32>
    %265 = arith.addf %262, %264 : vector<8x32xf32>
    %266 = arith.addf %251, %265 : vector<8x32xf32>
    %c0_120 = arith.constant 0 : index
    %c0_121 = arith.constant 0 : index
    %267 = vector.load %arg23[%c0_120, %c0_121] : memref<1x32xf32, #tpu.memory_space<vmem>>, vector<1x32xf32>
    %c0_122 = arith.constant 0 : index
    %c0_123 = arith.constant 0 : index
    %268 = vector.load %arg24[%c0_122, %c0_123] : memref<1x32xf32, #tpu.memory_space<vmem>>, vector<1x32xf32>
    %cst_124 = arith.constant dense<0.000000e+00> : vector<8xf32>
    %269 = vector.multi_reduction <add>, %266, %cst_124 [1] : vector<8x32xf32> to vector<8xf32>
    %270 = vector.shape_cast %269 : vector<8xf32> to vector<8x1xf32>
    %cst_125 = arith.constant 3.200000e+01 : f32
    %271 = vector.broadcast %cst_125 : f32 to vector<8x1xf32>
    %272 = arith.divf %270, %271 : vector<8x1xf32>
    %273 = vector.broadcast %272 : vector<8x1xf32> to vector<8x32xf32>
    %274 = arith.subf %266, %273 : vector<8x32xf32>
    %275 = arith.mulf %274, %274 : vector<8x32xf32>
    %cst_126 = arith.constant dense<0.000000e+00> : vector<8xf32>
    %276 = vector.multi_reduction <add>, %275, %cst_126 [1] : vector<8x32xf32> to vector<8xf32>
    %277 = vector.shape_cast %276 : vector<8xf32> to vector<8x1xf32>
    %cst_127 = arith.constant 3.200000e+01 : f32
    %278 = vector.broadcast %cst_127 : f32 to vector<8x1xf32>
    %279 = arith.divf %277, %278 : vector<8x1xf32>
    %280 = vector.broadcast %272 : vector<8x1xf32> to vector<8x32xf32>
    %281 = arith.subf %266, %280 : vector<8x32xf32>
    %cst_128 = arith.constant 9.99999974E-6 : f32
    %282 = vector.broadcast %cst_128 : f32 to vector<8x1xf32>
    %283 = arith.addf %279, %282 : vector<8x1xf32>
    %284 = math.rsqrt %283 : vector<8x1xf32>
    %285 = vector.broadcast %284 : vector<8x1xf32> to vector<8x32xf32>
    %286 = arith.mulf %281, %285 : vector<8x32xf32>
    %287 = vector.broadcast %267 : vector<1x32xf32> to vector<8x32xf32>
    %288 = arith.mulf %286, %287 : vector<8x32xf32>
    %289 = vector.broadcast %268 : vector<1x32xf32> to vector<8x32xf32>
    %290 = arith.addf %288, %289 : vector<8x32xf32>
    %c0_129 = arith.constant 0 : index
    %c0_130 = arith.constant 0 : index
    %c0_131 = arith.constant 0 : index
    %291 = vector.load %arg25[%c0_129, %c0_130, %c0_131] : memref<1x8x32xf32, #tpu.memory_space<vmem>>, vector<1x8x32xf32>
    %292 = vector.shape_cast %291 : vector<1x8x32xf32> to vector<8x32xf32>
    %293 = vector.shape_cast %290 : vector<8x32xf32> to vector<1x8x32xf32>
    tpu.vector_store %arg25[%c0_129, %c0_130, %c0_131], %293 {strides = array<i32>} : memref<1x8x32xf32, #tpu.memory_space<vmem>>, vector<1x8x32xf32>,
    return
  }
  func.func @transform_0(%arg0: i32) -> (i32, i32, i32) {
    %c0_i32 = arith.constant 0 : i32
    %c0_i32_0 = arith.constant 0 : i32
    %c0_i32_1 = arith.constant 0 : i32
    return %arg0, %c0_i32, %c0_i32_0 : i32, i32, i32
  }
  func.func @transform_1(%arg0: i32) -> (i32, i32, i32) {
    %c0_i32 = arith.constant 0 : i32
    %c0_i32_0 = arith.constant 0 : i32
    %c0_i32_1 = arith.constant 0 : i32
    return %arg0, %c0_i32, %c0_i32_0 : i32, i32, i32
  }
  func.func @transform_2(%arg0: i32) -> (i32, i32) {
    %c0_i32 = arith.constant 0 : i32
    %c0_i32_0 = arith.constant 0 : i32
    %c0_i32_1 = arith.constant 0 : i32
    return %c0_i32, %c0_i32_0 : i32, i32
  }
  func.func @transform_3(%arg0: i32) -> (i32, i32) {
    %c0_i32 = arith.constant 0 : i32
    %c0_i32_0 = arith.constant 0 : i32
    %c0_i32_1 = arith.constant 0 : i32
    return %c0_i32, %c0_i32_0 : i32, i32
  }
  func.func @transform_4(%arg0: i32) -> (i32, i32) {
    %c0_i32 = arith.constant 0 : i32
    %c0_i32_0 = arith.constant 0 : i32
    %c0_i32_1 = arith.constant 0 : i32
    return %c0_i32, %c0_i32_0 : i32, i32
  }
  func.func @transform_5(%arg0: i32) -> (i32, i32) {
    %c0_i32 = arith.constant 0 : i32
    %c0_i32_0 = arith.constant 0 : i32
    %c0_i32_1 = arith.constant 0 : i32
    return %c0_i32, %c0_i32_0 : i32, i32
  }
  func.func @transform_6(%arg0: i32) -> (i32, i32) {
    %c0_i32 = arith.constant 0 : i32
    %c0_i32_0 = arith.constant 0 : i32
    %c0_i32_1 = arith.constant 0 : i32
    return %c0_i32, %c0_i32_0 : i32, i32
  }
  func.func @transform_7(%arg0: i32) -> (i32, i32) {
    %c0_i32 = arith.constant 0 : i32
    %c0_i32_0 = arith.constant 0 : i32
    %c0_i32_1 = arith.constant 0 : i32
    return %c0_i32, %c0_i32_0 : i32, i32
  }
  func.func @transform_8(%arg0: i32) -> (i32, i32) {
    %c0_i32 = arith.constant 0 : i32
    %c0_i32_0 = arith.constant 0 : i32
    %c0_i32_1 = arith.constant 0 : i32
    return %c0_i32, %c0_i32_0 : i32, i32
  }
  func.func @transform_9(%arg0: i32) -> (i32, i32) {
    %c0_i32 = arith.constant 0 : i32
    %c0_i32_0 = arith.constant 0 : i32
    %c0_i32_1 = arith.constant 0 : i32
    return %c0_i32, %c0_i32_0 : i32, i32
  }
  func.func @transform_10(%arg0: i32) -> (i32, i32) {
    %c0_i32 = arith.constant 0 : i32
    %c0_i32_0 = arith.constant 0 : i32
    %c0_i32_1 = arith.constant 0 : i32
    return %c0_i32, %c0_i32_0 : i32, i32
  }
  func.func @transform_11(%arg0: i32) -> (i32, i32) {
    %c0_i32 = arith.constant 0 : i32
    %c0_i32_0 = arith.constant 0 : i32
    %c0_i32_1 = arith.constant 0 : i32
    return %c0_i32, %c0_i32_0 : i32, i32
  }
  func.func @transform_12(%arg0: i32) -> (i32, i32) {
    %c0_i32 = arith.constant 0 : i32
    %c0_i32_0 = arith.constant 0 : i32
    %c0_i32_1 = arith.constant 0 : i32
    return %c0_i32, %c0_i32_0 : i32, i32
  }
  func.func @transform_13(%arg0: i32) -> (i32, i32) {
    %c0_i32 = arith.constant 0 : i32
    %c0_i32_0 = arith.constant 0 : i32
    %c0_i32_1 = arith.constant 0 : i32
    return %c0_i32, %c0_i32_0 : i32, i32
  }
  func.func @transform_14(%arg0: i32) -> (i32, i32) {
    %c0_i32 = arith.constant 0 : i32
    %c0_i32_0 = arith.constant 0 : i32
    %c0_i32_1 = arith.constant 0 : i32
    return %c0_i32, %c0_i32_0 : i32, i32
  }
  func.func @transform_15(%arg0: i32) -> (i32, i32) {
    %c0_i32 = arith.constant 0 : i32
    %c0_i32_0 = arith.constant 0 : i32
    %c0_i32_1 = arith.constant 0 : i32
    return %c0_i32, %c0_i32_0 : i32, i32
  }
  func.func @transform_16(%arg0: i32) -> (i32, i32) {
    %c0_i32 = arith.constant 0 : i32
    %c0_i32_0 = arith.constant 0 : i32
    %c0_i32_1 = arith.constant 0 : i32
    return %c0_i32, %c0_i32_0 : i32, i32
  }
  func.func @transform_17(%arg0: i32) -> (i32, i32) {
    %c0_i32 = arith.constant 0 : i32
    %c0_i32_0 = arith.constant 0 : i32
    %c0_i32_1 = arith.constant 0 : i32
    return %c0_i32, %c0_i32_0 : i32, i32
  }
  func.func @transform_18(%arg0: i32) -> (i32, i32) {
    %c0_i32 = arith.constant 0 : i32
    %c0_i32_0 = arith.constant 0 : i32
    %c0_i32_1 = arith.constant 0 : i32
    return %c0_i32, %c0_i32_0 : i32, i32
  }
  func.func @transform_19(%arg0: i32) -> (i32, i32) {
    %c0_i32 = arith.constant 0 : i32
    %c0_i32_0 = arith.constant 0 : i32
    %c0_i32_1 = arith.constant 0 : i32
    return %c0_i32, %c0_i32_0 : i32, i32
  }
  func.func @transform_20(%arg0: i32) -> (i32, i32) {
    %c0_i32 = arith.constant 0 : i32
    %c0_i32_0 = arith.constant 0 : i32
    %c0_i32_1 = arith.constant 0 : i32
    return %c0_i32, %c0_i32_0 : i32, i32
  }
  func.func @transform_21(%arg0: i32) -> (i32, i32) {
    %c0_i32 = arith.constant 0 : i32
    %c0_i32_0 = arith.constant 0 : i32
    %c0_i32_1 = arith.constant 0 : i32
    return %c0_i32, %c0_i32_0 : i32, i32
  }
  func.func @transform_22(%arg0: i32) -> (i32, i32) {
    %c0_i32 = arith.constant 0 : i32
    %c0_i32_0 = arith.constant 0 : i32
    %c0_i32_1 = arith.constant 0 : i32
    return %c0_i32, %c0_i32_0 : i32, i32
  }
  func.func @transform_23(%arg0: i32) -> (i32, i32) {
    %c0_i32 = arith.constant 0 : i32
    %c0_i32_0 = arith.constant 0 : i32
    %c0_i32_1 = arith.constant 0 : i32
    return %c0_i32, %c0_i32_0 : i32, i32
  }
  func.func @transform_24(%arg0: i32) -> (i32, i32, i32) {
    %c0_i32 = arith.constant 0 : i32
    %c0_i32_0 = arith.constant 0 : i32
    %c0_i32_1 = arith.constant 0 : i32
    return %arg0, %c0_i32, %c0_i32_0 : i32, i32, i32
  }
}

</mosaic_0001>

<bundles_post_ra>
// kernel: transformer_decoder_forward.5
= control target key start
LH: loop header
LB: loop body
LE: loop exit
PB: predicated region body
PF: predicated region fallthrough
CT: control target
= control target key end

     0   :  { %s159_s0 = inlined_call_operand.vmem [shape: f32[16,32], index: 0, kind: input, shape index: {}]   ;;  %s160_s1 = inlined_call_operand.vmem [shape: bf16[32,128], index: 1, kind: input, shape index: {}]   ;;  %s161_s2 = inlined_call_operand.vmem [shape: f32[1,128], index: 2, kind: input, shape index: {}]   ;;  %s162_s3 = inlined_call_operand.hbm [shape: f32[16,128], index: 3, kind: output, shape index: {}]  }
   0x1   :  { %v87_v0 = vld [vmem:[%s160_s1 + $0x8] sm:$0xff]  ;;  %v86_v1 = vld [vmem:[%s160_s1] sm:$0xff] }
   0x2   :  { %49 = vmatpush.bf16.msra.mxu0 %v87_v0  ;;  %v16_v2 = vld [vmem:[%s159_s0] sm:$0xff]  ;;  %v17_v3 = vld [vmem:[%s159_s0 + $0x8] sm:$0xff] }
   0x3   :  { %8 = vsyncpa [#allocation3], 0  ;;  %v18_v4 = vpack.c.bf16 %v17_v3, %v16_v2  ;;  %vm39_vm0 = vcmask 261120   ;;  %v91_v5 = vld [vmem:[%s161_s2] ss:$0 sm:$0xff]  ;;  %s118_s1 = smov [#allocation2]  }
   0x4   :  { %s63_s22 = sshll.u32 %s118_s1, 4  ;;  %s65_s25 = sshll.u32 %s162_s3, 4  ;;  %s64_s22 = int_to_ptr.vmem [resolvable:$true] %s63_s22  ;;  %s66_s25 = int_to_ptr.hbm [resolvable:$true] %s65_s25 }
   0x5   :  { %s119_s0 = smov 128   ;;  %s120_s26 = smov 8  }
   0x6   :  { %50 = vmatpush.bf16.msra.mxu0 %v86_v1 }
   0x9   :  { %85 = vmatmul.msk.bf16.vlgmr.msra.gmra.mxu0 %vm39_vm0, %v18_v4 }
  0x86   :  { %v52_v6 = vpop.f32.mrf.mxu0 }
  0x87   :  { %v53_v7 = vadd.f32 %v91_v5, %v52_v6 }
  0x89   :  { %57 = vst [vmem:[#allocation2] sm:$0xff] %v53_v7 }
  0x8e   :  { %v54_v8 = vpop.f32.mrf.mxu0 }
  0x8f   :  { %v55_v9 = vadd.f32 %v91_v5, %v54_v8 }
  0x91   :  { %58 = vst [vmem:[#allocation2 + $0x8] sm:$0xff] %v55_v9 }
  0x92   :  { %71 = dma.vmem_to_hbm [thread:$0]  %s64_s22, 256, %s66_s25, [#allocation3], %s119_s0, %s119_s0, %s120_s26  }
  0x93   :  { %116 = dma.done.wait [#allocation3], 256  }
  0x94   :  { %117 = vsyncadd [#allocation3], 4294967040 }
  0x95   :  { %76 = vsyncpa [#allocation3], 1 }

// kernel: transformer_decoder_forward.4
= control target key start
LH: loop header
LB: loop body
LE: loop exit
PB: predicated region body
PF: predicated region fallthrough
CT: control target
= control target key end

     0   :  { %s3143_s0 = inlined_call_operand.vmem [shape: f32[2,8,32], index: 0, kind: input, shape index: {}]   ;;  %s3144_s1 = inlined_call_operand.vmem [shape: f32[2,8,32], index: 1, kind: input, shape index: {}]   ;;  %s3145_s2 = inlined_call_operand.vmem [shape: bf16[32,32], index: 2, kind: input, shape index: {}]   ;;  %s3146_s3 = inlined_call_operand.vmem [shape: f32[1,32], index: 3, kind: input, shape index: {}]   ;;  %s3147_s4 = inlined_call_operand.vmem [shape: bf16[32,64], index: 4, kind: input, shape index: {}]   ;;  %s3148_s5 = inlined_call_operand.vmem [shape: f32[1,64], index: 5, kind: input, shape index: {}]   ;;  %s3149_s6 = inlined_call_operand.vmem [shape: bf16[32,32], index: 6, kind: input, shape index: {}]   ;;  %s3150_s7 = inlined_call_operand.vmem [shape: f32[1,32], index: 7, kind: input, shape index: {}]   ;;  %s3151_s8 = inlined_call_operand.vmem [shape: f32[1,32], index: 8, kind: input, shape index: {}]   ;;  %s3152_s9 = inlined_call_operand.vmem [shape: f32[1,32], index: 9, kind: input, shape index: {}]   ;;  %s3153_s10 = inlined_call_operand.vmem [shape: bf16[32,32], index: 10, kind: input, shape index: {}]   ;;  %s3154_s11 = inlined_call_operand.hbm [shape: f32[1,32], index: 11, kind: input, shape index: {}]   ;;  %s3155_s12 = inlined_call_operand.vmem [shape: bf16[32,64], index: 12, kind: input, shape index: {}]   ;;  %s3156_s13 = inlined_call_operand.hbm [shape: f32[1,64], index: 13, kind: input, shape index: {}]   ;;  %s3157_s14 = inlined_call_operand.vmem [shape: bf16[32,32], index: 14, kind: input, shape index: {}]   ;;  %s3158_s15 = inlined_call_operand.hbm [shape: f32[1,32], index: 15, kind: input, shape index: {}]   ;;  %s3159_s16 = inlined_call_operand.hbm [shape: f32[1,32], index: 16, kind: input, shape index: {}]   ;;  %s3160_s17 = inlined_call_operand.hbm [shape: f32[1,32], index: 17, kind: input, shape index: {}]   ;;  %s3161_s18 = inlined_call_operand.vmem [shape: bf16[32,64], index: 18, kind: input, shape index: {}]   ;;  %s3162_s19 = inlined_call_operand.hbm [shape: f32[1,64], index: 19, kind: input, shape index: {}]   ;;  %s3163_s20 = inlined_call_operand.vmem [shape: bf16[64,32], index: 20, kind: input, shape index: {}]   ;;  %s3164_s21 = inlined_call_operand.hbm [shape: f32[1,32], index: 21, kind: input, shape index: {}]   ;;  %s3165_s22 = inlined_call_operand.hbm [shape: f32[1,32], index: 22, kind: input, shape index: {}]   ;;  %s3166_s23 = inlined_call_operand.hbm [shape: f32[1,32], index: 23, kind: input, shape index: {}]   ;;  %s3167_s24 = inlined_call_operand.vmem [shape: f32[2,8,32], index: 24, kind: output, shape index: {}]  }
   0x1   :  { %3178 = sst [smem:[#allocation22_spill]] %s3143_s0 }
   0x2   :  { %3179 = sst [smem:[#allocation23_spill]] %s3144_s1 }
   0x3   :  { %3180 = sst [smem:[#allocation24_spill]] %s3145_s2 }
   0x4   :  { %3181 = sst [smem:[#allocation25_spill]] %s3146_s3 }
   0x5   :  { %3182 = sst [smem:[#allocation26_spill]] %s3147_s4 }
   0x6   :  { %3183 = sst [smem:[#allocation27_spill]] %s3148_s5 }
   0x7   :  { %3184 = sst [smem:[#allocation28_spill]] %s3149_s6 }
   0x8   :  { %3185 = sst [smem:[#allocation29_spill]] %s3150_s7 }
   0x9   :  { %3186 = sst [smem:[#allocation30_spill]] %s3151_s8 }
   0xa   :  { %3187 = sst [smem:[#allocation31_spill]] %s3156_s13 }
   0xb   :  { %3188 = sst [smem:[#allocation32_spill]] %s3159_s16 }
   0xc   :  { %3189 = sst [smem:[#allocation33_spill]] %s3162_s19 }
   0xd   :  { %29 = vsyncpa [#allocation4], 0 }
   0xe   :  { %30 = vsyncpa [#allocation6], 0 }
   0xf   :  { %31 = vsyncpa [#allocation9], 0 }
  0x10   :  { %32 = vsyncpa [#allocation12], 0 }
  0x11   :  { %33 = vsyncpa [#allocation15], 0  ;;  %s2818_s5 = smov 0  }
  0x12 LB: > { %s3190_s13 = sld [smem:[#allocation31_spill]]  ;;  %s2827_s6 = sadd.s32 4294967295, %s2671_s5   ;;  %s2671_s5 = sphi %s2818_s5, %s39_s5  }
  0x13   : > { %p2071_p0 = scmp.ge.s32.totalorder %s2671_s5, 1  ;;  %p584_p1 = scmp.lt.s32.totalorder %s2671_s5, 3 }
  0x14   : > { %p2275_p2 = scmp.eq.s32.totalorder %s2827_s6, 0  ;;  %s2673_s29 = smov [#allocation5]  }
  0x15   : > { %p2832_p3 = pnand %p2071_p0, %p584_p1  ;;  %s640_s0 = sshll.u32 %s2673_s29, 4  ;;  %s641_s0 = int_to_ptr.vmem [resolvable:$true] %s640_s0 }
  0x16   : > { %s3192_s16 = sld [smem:[#allocation32_spill]]  ;;  %s2674_s26 = smov [#allocation8]  }
  0x17   : > { %p2247_p4 = pneg %p2832_p3  ;;  %s3193_s19 = sld [smem:[#allocation33_spill]] }
  0x18   : > { %s638_s28 = sshll.u32 %s3190_s13, 4  ;;  %s667_s27 = sshll.u32 %s2674_s26, 4  ;;  %s639_s28 = int_to_ptr.hbm [resolvable:$true] %s638_s28  ;;  %s668_s27 = int_to_ptr.vmem [resolvable:$true] %s667_s27 }
  0x19   : > { %p2846_p5 = pnand %p2275_p2, %p2247_p4  ;;  %s2675_s29 = smov [#allocation11]  }
  0x1a   : > { %s694_s7 = sshll.u32 %s2675_s29, 4  ;;  %s719_s8 = sshll.u32 %s3165_s22, 4  ;;  %s695_s7 = int_to_ptr.vmem [resolvable:$true] %s694_s7  ;;  %s720_s8 = int_to_ptr.hbm [resolvable:$true] %s719_s8 }
  0x1b   : > { %2253 = dma.hbm_to_vmem [thread:$0]  (!%p2846_p5), %s639_s28, 16, %s641_s0, [#allocation6]  }
  0x1c   : > { %s665_s3 = sshll.u32 %s3192_s16, 4  ;;  %s623_s16 = sshll.u32 %s3154_s11, 4  ;;  %s666_s3 = int_to_ptr.hbm [resolvable:$true] %s665_s3  ;;  %s624_s16 = int_to_ptr.hbm [resolvable:$true] %s623_s16 }
  0x1d   : > { %s692_s4 = sshll.u32 %s3193_s19, 4  ;;  %s2676_s19 = smov [#allocation14]   ;;  %s693_s4 = int_to_ptr.hbm [resolvable:$true] %s692_s4 }
  0x1e   : > { %2259 = dma.hbm_to_vmem [thread:$0]  (!%p2846_p5), %s666_s3, 16, %s668_s27, [#allocation9]  }
  0x1f   : > { %2265 = dma.hbm_to_vmem [thread:$0]  (!%p2846_p5), %s693_s4, 16, %s695_s7, [#allocation12]  }
  0x20   : > { %s721_s28 = sshll.u32 %s2676_s19, 4  ;;  %s2677_s0 = smov [#allocation3]   ;;  %s722_s28 = int_to_ptr.vmem [resolvable:$true] %s721_s28 }
  0x21   : > { %2271 = dma.hbm_to_vmem [thread:$0]  (!%p2846_p5), %s720_s8, 16, %s722_s28, [#allocation15]  }
  0x22   : > { %s625_s3 = sshll.u32 %s2677_s0, 4  ;;  %s653_s30 = sshll.u32 %s3158_s15, 4  ;;  %s626_s3 = int_to_ptr.vmem [resolvable:$true] %s625_s3  ;;  %s654_s30 = int_to_ptr.hbm [resolvable:$true] %s653_s30 }
  0x23   : > { %2250 = dma.hbm_to_vmem [thread:$0]  (!%p2846_p5), %s624_s16, 16, %s626_s3, [#allocation4]  }
  0x24   : > { %s677_s7 = sshll.u32 %s3160_s17, 4  ;;  %s2678_s19 = smov [#allocation7]   ;;  %s678_s7 = int_to_ptr.hbm [resolvable:$true] %s677_s7 }
  0x25   : > { %s655_s25 = sshll.u32 %s2678_s19, 4  ;;  %s2679_s8 = smov [#allocation10]   ;;  %s656_s25 = int_to_ptr.vmem [resolvable:$true] %s655_s25 }
  0x26   : > { %2256 = dma.hbm_to_vmem [thread:$0]  (!%p2846_p5), %s654_s30, 16, %s656_s25, [#allocation6]  }
  0x27   : > { %s679_s26 = sshll.u32 %s2679_s8, 4  ;;  %s707_s27 = sshll.u32 %s3164_s21, 4  ;;  %s680_s26 = int_to_ptr.vmem [resolvable:$true] %s679_s26  ;;  %s708_s27 = int_to_ptr.hbm [resolvable:$true] %s707_s27 }
  0x28   : > { %2262 = dma.hbm_to_vmem [thread:$0]  (!%p2846_p5), %s678_s7, 16, %s680_s26, [#allocation9]  }
  0x29   : > { %s731_s29 = sshll.u32 %s3166_s23, 4  ;;  %s2680_s13 = smov [#allocation13]   ;;  %s732_s29 = int_to_ptr.hbm [resolvable:$true] %s731_s29 }
  0x2a   : > { %s709_s4 = sshll.u32 %s2680_s13, 4  ;;  %s2681_s30 = smov [#allocation16]   ;;  %s710_s4 = int_to_ptr.vmem [resolvable:$true] %s709_s4 }
  0x2b   : > { %2268 = dma.hbm_to_vmem [thread:$0]  (!%p2846_p5), %s708_s27, 16, %s710_s4, [#allocation12]  }
  0x2c   : > { %s733_s19 = sshll.u32 %s2681_s30, 4  ;;  %760 = sbr.rel (%p2832_p3) target bundleno = 3556 (0xde4), region = 116  ;;  %s734_s19 = int_to_ptr.vmem [resolvable:$true] %s733_s19 }
  0x2d   : > { %2274 = dma.hbm_to_vmem [thread:$0]  (!%p2846_p5), %s732_s29, 16, %s734_s19, [#allocation15]  }
  0x31   : > { %2650 = dma.done.wait (%p2275_p2), [#allocation4], 16  }
  0x32   : > { %2652 = vsyncadd (%p2275_p2), [#allocation4], 4294967280 }
  0x33   : > { %2654 = dma.done.wait (%p2275_p2), [#allocation6], 32  }
  0x34   : > { %2656 = vsyncadd (%p2275_p2), [#allocation6], 4294967264 }
  0x35   : > { %2658 = dma.done.wait (%p2275_p2), [#allocation9], 32  }
  0x36   : > { %2660 = vsyncadd (%p2275_p2), [#allocation9], 4294967264 }
  0x37   : > { %2662 = dma.done.wait (%p2275_p2), [#allocation12], 32  }
  0x38   : > { %2664 = vsyncadd (%p2275_p2), [#allocation12], 4294967264 }
  0x39   : > { %2666 = dma.done.wait (%p2275_p2), [#allocation15], 32  }
  0x3a   : > { %2668 = vsyncadd (%p2275_p2), [#allocation15], 4294967264  ;;  %p869_p6 = scmp.lt.s32.totalorder %s2827_s6, 1  ;;  %s3195_s25 = sld [smem:[#allocation22_spill]]  ;;  %vm915_vm0 = vcmask 261120   ;;  %vm962_vm1 = vcmask 64512  }
  0x3b   : > { %s3196_s0 = sld [smem:[#allocation24_spill]]  ;;  %s2683_s28 = smov 120   ;;  %vm1016_vm2 = vcmask 1043456   ;;  %vm1034_vm7 = vcmask 60416  }
  0x3c   : > { %s3212_s6 = smov (!%p869_p6, %s2827_s6), 1  ;;  %s3197_s3 = sld [smem:[#allocation26_spill]] }
  0x3d   : > { %s2910_s2 = sshll.u32 %s3212_s6, 3  ;;  %s3198_s1 = sld [smem:[#allocation25_spill]] }
  0x3e   : > { %s3199_s26 = sld [smem:[#allocation27_spill]]  ;;  %s2684_s27 = smov 112  }
  0x3f   : > { %s2685_s16 = smov 104   ;;  %s3177_s29 = smov 88  }
  0x40   : > { %s872_s8 = scalar_lea.vmem %s3195_s25, %s2910_s2  ;;  %s3174_s13 = smov 80  }
  0x41   : > { %v2194_v0 = vld [vmem:[%s3196_s0 + $0x8] sm:$0xff]  ;;  %v2193_v2 = vld [vmem:[%s3196_s0] sm:$0xff]  ;;  %s3175_s4 = smov 72   ;;  %s3171_s6 = smov 16  }
  0x42   : > { %v2196_v1 = vld [vmem:[%s3197_s3 + $0x8] sm:$0xff]  ;;  %v2195_v3 = vld [vmem:[%s3197_s3] sm:$0xff]  ;;  %925 = vmatpush.bf16.msra.mxu0 %v2194_v0  ;;  %s3173_s30 = smov 8   ;;  %s3172_s19 = smov 24  }
  0x43   : > { %954 = vmatpush.bf16.msra.mxu1 %v2196_v1  ;;  %v2928_v4 = vld [vmem:[%s872_s8] sm:$0xff]  ;;  %s3176_s8 = smov 96   ;;  %s3200_s25 = sld [smem:[#allocation28_spill]] }
  0x44   : > { %v899_v5 = vpack.c.bf16 %v2928_v4, %v2928_v4  ;;  %v2321_v6 = vld [vmem:[%s3198_s1] ss:$0 sm:$0xff]  ;;  %s3202_s7 = sld [smem:[#allocation23_spill]] }
  0x45   : > { %v2322_v7 = vld [vmem:[%s3199_s26] ss:$0 sm:$0xff]  ;;  %s3210_s26 = smov 16  }
  0x46   : > { %926 = vmatpush.bf16.msra.mxu0 %v2193_v2 }
  0x47   : > { %955 = vmatpush.bf16.msra.mxu1 %v2195_v3 }
  0x49   : > { %2103 = vmatmul.msk.bf16.vlgmr.msra.gmra.mxu0 %vm915_vm0, %v899_v5 }
  0x4a   : > { %2112 = vmatmul.msk.bf16.vlgmr.msra.gmra.mxu1 %vm915_vm0, %v899_v5 }
  0xc6   : > { %v928_v8 = vpop.f32.mrf.mxu0 }
  0xc7   : > { %v957_v9 = vpop.f32.mrf.mxu1  ;;  %v929_v10 = vadd.f32 %v2321_v6, %v928_v8 }
  0xc8   : > { %v958_v11 = vadd.f32 %v2322_v7, %v957_v9 }
  0xc9   : > { %v932_v12 = vpack.c.bf16 %v929_v10, %v929_v10 }
  0xca   : > { %v961_v13 = vpack.c.bf16 %v958_v11, %v958_v11 }
  0xcb   : > { %v1037_v14 = vunpack.c.l.b16 %v932_v12 }
  0xcc   : > { %v1009_v15 = vunpack.c.l.b16 %v961_v13  ;;  %v967_v16 = vsel %vm962_vm1, %v961_v13, 0 }
  0xcd   : > { %976 = vmatpush.bf16.xpose.msra.mxu2 %v967_v16  ;;  %v1038_v17 = vpack.c.b16 %v1037_v14, %v1037_v14 }
  0xce   : > { %v2941_v18 = vpack.c.b16 %v1009_v15, %v1009_v15  ;;  %v930_v19 = vpop.f32.mrf.mxu0 }
  0xcf   : > { %v959_v20 = vpop.f32.mrf.mxu1  ;;  %1039 = vrot.lane.b32.xlu2 %v1038_v17, %s2683_s28 }
  0xd0   : > { %1011 = vrot.lane.b32.xlu1 %v2941_v18, %s3176_s8 }
  0xd4   : > { %2113 = vmatmul.msk.bf16.vlgmr.msra.gmra.mxu2 %vm962_vm1, %v932_v12 }
  0xd7   : > { %1118 = vrot.lane.b32.xlu2 %v2941_v18, %s2684_s27 }
  0xd8   : > { %1041 = vrot.lane.b32.xlu1 %v2941_v18, %s2683_s28 }
  0xdf   : > { %1193 = vrot.lane.b32.xlu2 %v1038_v17, %s2685_s16 }
  0xe0   : > { %1116 = vrot.lane.b32.xlu1 %v1038_v17, %s2684_s27 }
 0x129   : > { %v1040_v21 = vpop.permute.xlu2 %1039 }
 0x131   : > { %v1119_v22 = vpop.permute.xlu2 %1118 }
 0x132   : > { %v1124_v23 = vsel %vm962_vm1, %v1119_v22, 0 }
 0x133   : > { %1133 = vmatpush.bf16.xpose.msrb.mxu1 %v1124_v23 }
 0x139   : > { %v1194_v57 = vpop.permute.xlu2 %1193 }
 0x142   : > { %v1012_v24 = vpop.permute.xlu1 %1011 }
 0x143   : > { %v1018_v25 = vsel %vm1016_vm2, %v1012_v24, 0 }
 0x144   : > { %1027 = vmatpush.bf16.msra.mxu3 %v1018_v25 }
 0x14a   : > { %v1042_v26 = vpop.permute.xlu1 %1041 }
 0x14b   : > { %v1047_v27 = vsel %vm962_vm1, %v1042_v26, 0 }
 0x14c   : > { %1056 = vmatpush.bf16.xpose.msrb.mxu3 %v1047_v27 }
 0x152   : > { %v1117_v28 = vpop.permute.xlu1 %1116 }
 0x153   : > { %2117 = vmatmul.msk.bf16.vlgmr.msrb.gmra.mxu1 %vm962_vm1, %v1117_v28 }
 0x157   : > { %v978_v29 = vpop.f32.mrf.mxu2 }
 0x158   : > { %v982_v30 = vmul.f32 0.35355338, %v978_v29 }
 0x15a   : > { %v983_v31 = vsel %vm962_vm1, %v982_v30, -inf }
 0x15b   : > { %984 = vmax.xlane.f32.xlu0 %v983_v31 }
 0x15f   : > { %v980_v32 = vpop.f32.mrf.mxu2 }
 0x1ce   : > { %v985_v33 = vpop.xlane.xlu0 %984 }
 0x1cf   : > { %v986_v34 = vsub.f32 %v982_v30, %v985_v33 }
 0x1d0   : > { %v1135_v35 = vpop.f32.mrf.mxu1 }
 0x1d1   : > { %v987_v36 = vmul.f32 1.442695, %v986_v34  ;;  %v1139_v37 = vmul.f32 0.35355338, %v1135_v35 }
 0x1d3   : > { %2335 = vpow2.f32 %v987_v36  ;;  %v1140_v38 = vsel %vm962_vm1, %v1139_v37, -inf }
 0x1d4   : > { %1141 = vmax.xlane.f32.xlu2 %v1140_v38 }
 0x1d8   : > { %v1137_v39 = vpop.f32.mrf.mxu1 }
 0x1d9   : > { %v2336_v40 = vpop.eup %2335 }
 0x1da   : > { %v989_v41 = vsel %vm962_vm1, %v2336_v40, 0.0 }
 0x1db   : > { %990 = vadd.xlane.f32.xlu0 %v989_v41 }
 0x1ef   : > { %1195 = vrot.lane.b32.xlu0 %v2941_v18, %s2685_s16 }
 0x247   : > { %v1142_v60 = vpop.xlane.xlu2 %1141 }
 0x248   : > { %v1143_v62 = vsub.f32 %v1139_v37, %v1142_v60 }
 0x24a   : > { %v1144_v63 = vmul.f32 1.442695, %v1143_v62 }
 0x24e   : > { %v991_v42 = vpop.xlane.xlu0 %990 }
 0x24f   : > { %2337 = vrcp.f32 %v991_v42  ;;  %v1003_v46 = vand.u32 2147483648, %v991_v42  ;;  %v1001_v48 = vand.u32 2147483647, %v991_v42  ;;  %vm997_vm4 = vweird.f32 %v991_v42 }
 0x250   : > { %2339 = vpow2.f32 %v1144_v63 }
 0x251   : > { %v1004_v50 = vor.u32 1.1754944e-38, %v1003_v46  ;;  %vm1002_vm6 = vcmp.eq.f32.partialorder %v1001_v48, 8.507059e+37 }
 0x255   : > { %v2338_v43 = vpop.eup %2337 }
 0x256   : > { %v993_v44 = vmul.f32 %v2338_v43, %v991_v42  ;;  %vm998_vm3 = vweird.f32 %v2338_v43  ;;  %v2340_v3 = vpop.eup %2339 }
 0x257   : > { %vm999_vm5 = vmor %vm997_vm4, %vm998_vm3  ;;  %v1146_v6 = vsel %vm962_vm1, %v2340_v3, 0.0 }
 0x258   : > { %v994_v45 = vsub.f32 1.0, %v993_v44 }
 0x25a   : > { %v995_v47 = vmul.f32 %v2338_v43, %v994_v45 }
 0x25c   : > { %v996_v49 = vadd.f32 %v2338_v43, %v995_v47 }
 0x25e   : > { %v1000_v51 = vsel %vm999_vm5, %v2338_v43, %v996_v49 }
 0x25f   : > { %v1005_v52 = vsel %vm1002_vm6, %v1004_v50, %v1000_v51 }
 0x260   : > { %v1006_v53 = vmul.f32 %v2336_v40, %v1005_v52 }
 0x261   : > { %v1196_v54 = vpop.permute.xlu0 %1195 }
 0x262   : > { %v1201_v55 = vsel %vm962_vm1, %v1196_v54, 0  ;;  %v1007_v56 = vpack.c.bf16 %v1006_v53, %v1006_v53 }
 0x264   : > { %2114 = vmatmul.msk.bf16.vlgmr.msra.gmra.mxu3 %vm962_vm1, %v1007_v56 }
 0x265   : > { %1210 = vmatpush.bf16.xpose.msra.mxu3 %v1201_v55 }
 0x274   : > { %2115 = vmatmul.msk.bf16.vlgmr.msrb.gmra.mxu3 %vm962_vm1, %v1040_v21 }
 0x284   : > { %2119 = vmatmul.msk.bf16.vlgmr.msra.gmra.mxu3 %vm962_vm1, %v1194_v57 }
 0x2e7   : > { %v1029_v58 = vpop.f32.mrf.mxu3 }
 0x2e8   : > { %v1033_v59 = vpack.c.bf16 %v1029_v58, %v1029_v58 }
 0x2ea   : > { %1035 = vst.msk [vmem:[#allocation2] sm:$0xf] %vm1034_vm7, %v1033_v59 }
 0x2ef   : > { %v1031_v61 = vpop.f32.mrf.mxu3 }
 0x2f7   : > { %v1058_v0 = vpop.f32.mrf.mxu3 }
 0x2f8   : > { %v1062_v1 = vmul.f32 0.35355338, %v1058_v0 }
 0x2fa   : > { %v1063_v2 = vsel %vm962_vm1, %v1062_v1, -inf }
 0x2fb   : > { %1064 = vmax.xlane.f32.xlu1 %v1063_v2 }
 0x2ff   : > { %v1060_v5 = vpop.f32.mrf.mxu3 }
 0x303   : > { %1147 = vadd.xlane.f32.xlu1 %v1146_v6 }
 0x307   : > { %v1212_v7 = vpop.f32.mrf.mxu3 }
 0x308   : > { %v1216_v8 = vmul.f32 0.35355338, %v1212_v7 }
 0x30a   : > { %v1217_v9 = vsel %vm962_vm1, %v1216_v8, -inf }
 0x30b   : > { %1218 = vmax.xlane.f32.xlu0 %v1217_v9 }
 0x30f   : > { %v1214_v10 = vpop.f32.mrf.mxu3 }
 0x31c   : > { %1088 = vrot.lane.b32.xlu1 %v2941_v18, %s3177_s29 }
 0x31f   : > { %1165 = vrot.lane.b32.xlu0 %v2941_v18, %s3174_s13  ;;  %s3203_s13 = sld [smem:[#allocation30_spill]] }
 0x36e   : > { %v1065_v11 = vpop.xlane.xlu1 %1064 }
 0x36f   : > { %v1066_v12 = vsub.f32 %v1062_v1, %v1065_v11 }
 0x371   : > { %v1067_v13 = vmul.f32 1.442695, %v1066_v12  ;;  %v2198_v12 = vld [vmem:[%s3200_s25 + $0x8] sm:$0xff] }
 0x372   : > { %1295 = vmatpush.bf16.msra.mxu1 %v2198_v12 }
 0x373   : > { %2341 = vpow2.f32 %v1067_v13  ;;  %v2197_v13 = vld [vmem:[%s3200_s25] sm:$0xff] }
 0x376   : > { %v1148_v14 = vpop.xlane.xlu1 %1147  ;;  %1296 = vmatpush.bf16.msra.mxu1 %v2197_v13 }
 0x377   : > { %2343 = vrcp.f32 %v1148_v14  ;;  %v1160_v26 = vand.u32 2147483648, %v1148_v14  ;;  %vm1154_vm9 = vweird.f32 %v1148_v14  ;;  %v1158_v27 = vand.u32 2147483647, %v1148_v14 }
 0x379   : > { %v2342_v15 = vpop.eup %2341  ;;  %v1161_v31 = vor.u32 1.1754944e-38, %v1160_v26  ;;  %vm1159_vm11 = vcmp.eq.f32.partialorder %v1158_v27, 8.507059e+37 }
 0x37a   : > { %v1069_v16 = vsel %vm962_vm1, %v2342_v15, 0.0 }
 0x37b   : > { %1070 = vadd.xlane.f32.xlu2 %v1069_v16 }
 0x37d   : > { %v2344_v17 = vpop.eup %2343 }
 0x37e   : > { %v1150_v19 = vmul.f32 %v2344_v17, %v1148_v14  ;;  %v1219_v20 = vpop.xlane.xlu0 %1218  ;;  %vm1155_vm8 = vweird.f32 %v2344_v17 }
 0x37f   : > { %v1220_v21 = vsub.f32 %v1216_v8, %v1219_v20  ;;  %vm1156_vm10 = vmor %vm1154_vm9, %vm1155_vm8  ;;  %vm1114_vm8 = vcmask 126016   ;;  %vm1191_vm9 = vcmask 191616  }
 0x380   : > { %v1151_v22 = vsub.f32 1.0, %v1150_v19 }
 0x381   : > { %v1221_v23 = vmul.f32 1.442695, %v1220_v21 }
 0x382   : > { %v1152_v24 = vmul.f32 %v2344_v17, %v1151_v22 }
 0x383   : > { %2345 = vpow2.f32 %v1221_v23 }
 0x384   : > { %v1153_v25 = vadd.f32 %v2344_v17, %v1152_v24 }
 0x386   : > { %v1157_v30 = vsel %vm1156_vm10, %v2344_v17, %v1153_v25  ;;  %vm1268_vm10 = vcmask 257216   ;;  %v2692_v25 = vmov 32.0  }
 0x387   : > { %v1162_v32 = vsel %vm1159_vm11, %v1161_v31, %v1157_v30 }
 0x388   : > { %v1163_v35 = vmul.f32 %v2340_v3, %v1162_v32 }
 0x389   : > { %v2346_v28 = vpop.eup %2345 }
 0x38a   : > { %v1223_v29 = vsel %vm962_vm1, %v2346_v28, 0.0  ;;  %v1164_v38 = vpack.c.bf16 %v1163_v35, %v1163_v35 }
 0x38b   : > { %1224 = vadd.xlane.f32.xlu2 %v1223_v29 }
 0x38e   : > { %v1089_v33 = vpop.permute.xlu1 %1088 }
 0x38f   : > { %v1094_v34 = vsel %vm1016_vm2, %v1089_v33, 0 }
 0x390   : > { %1103 = vmatpush.bf16.msrb.mxu0 %v1094_v34 }
 0x391   : > { %v1166_v36 = vpop.permute.xlu0 %1165 }
 0x392   : > { %v1171_v37 = vsel %vm1016_vm2, %v1166_v36, 0  ;;  %v2202_v36 = vld [vmem:[%s3155_s12 + $0x8] sm:$0xff] }
 0x393   : > { %1180 = vmatpush.bf16.msrb.mxu2 %v1171_v37  ;;  %1415 = vmatpush.bf16.msrb.mxu3 %v2202_v36 }
 0x396   : > { %2118 = vmatmul.msk.bf16.vlgmr.msrb.gmra.mxu2 %vm962_vm1, %v1164_v38  ;;  %v2201_v38 = vld [vmem:[%s3155_s12] sm:$0xff] }
 0x397   : > { %1416 = vmatpush.bf16.msrb.mxu3 %v2201_v38 }
 0x3a3   : > { %1242 = vrot.lane.b32.xlu2 %v2941_v18, %s3175_s4 }
 0x3ee   : > { %v1071_v39 = vpop.xlane.xlu2 %1070 }
 0x3ef   : > { %2347 = vrcp.f32 %v1071_v39  ;;  %v1083_v44 = vand.u32 2147483648, %v1071_v39  ;;  %v1081_v45 = vand.u32 2147483647, %v1071_v39  ;;  %vm1077_vm13 = vweird.f32 %v1071_v39 }
 0x3f1   : > { %v1084_v47 = vor.u32 1.1754944e-38, %v1083_v44  ;;  %vm1082_vm15 = vcmp.eq.f32.partialorder %v1081_v45, 8.507059e+37 }
 0x3f5   : > { %v2348_v40 = vpop.eup %2347 }
 0x3f6   : > { %v1073_v41 = vmul.f32 %v2348_v40, %v1071_v39  ;;  %vm1078_vm12 = vweird.f32 %v2348_v40 }
 0x3f7   : > { %vm1079_vm14 = vmor %vm1077_vm13, %vm1078_vm12 }
 0x3f8   : > { %v1074_v42 = vsub.f32 1.0, %v1073_v41  ;;  %v2199_v41 = vld [vmem:[%s3153_s10] sm:$0xff] }
 0x3fa   : > { %v1075_v43 = vmul.f32 %v2348_v40, %v1074_v42 }
 0x3fc   : > { %v1076_v46 = vadd.f32 %v2348_v40, %v1075_v43 }
 0x3fe   : > { %v1225_v48 = vpop.xlane.xlu2 %1224  ;;  %v1080_v49 = vsel %vm1079_vm14, %v2348_v40, %v1076_v46  ;;  %v2200_v40 = vld [vmem:[%s3153_s10 + $0x8] sm:$0xff] }
 0x3ff   : > { %2349 = vrcp.f32 %v1225_v48  ;;  %v1085_v50 = vsel %vm1082_vm15, %v1084_v47, %v1080_v49  ;;  %v1237_v57 = vand.u32 2147483648, %v1225_v48  ;;  %v1235_v59 = vand.u32 2147483647, %v1225_v48  ;;  %1382 = vmatpush.bf16.msra.mxu2 %v2200_v40 }
 0x400   : > { %v1086_v51 = vmul.f32 %v2342_v15, %v1085_v50  ;;  %vm1231_vm4 = vweird.f32 %v1225_v48  ;;  %2351 = vrcp.f32 %v2692_v25 }
 0x401   : > { %v1238_v61 = vor.u32 1.1754944e-38, %v1237_v57  ;;  %vm1236_vm6 = vcmp.eq.f32.partialorder %v1235_v59, 8.507059e+37  ;;  %v2326_v57 = vld [vmem:[#allocation5] ss:$0 sm:$0xff] }
 0x402   : > { %v1087_v18 = vpack.c.bf16 %v1086_v51, %v1086_v51  ;;  %v2324_v51 = vld [vmem:[%s3203_s13] ss:$0 sm:$0xff] }
 0x403   : > { %1383 = vmatpush.bf16.msra.mxu2 %v2199_v41 }
 0x404   : > { %2116 = vmatmul.msk.bf16.vlgmr.msrb.gmra.mxu0 %vm962_vm1, %v1087_v18 }
 0x405   : > { %v2350_v52 = vpop.eup %2349 }
 0x406   : > { %v1227_v53 = vmul.f32 %v2350_v52, %v1225_v48  ;;  %v1243_v54 = vpop.permute.xlu2 %1242  ;;  %vm1232_vm3 = vweird.f32 %v2350_v52  ;;  %v2352_v26 = vpop.eup %2351 }
 0x407   : > { %v1248_v55 = vsel %vm1016_vm2, %v1243_v54, 0  ;;  %vm1233_vm5 = vmor %vm1231_vm4, %vm1232_vm3  ;;  %v1309_v27 = vmul.f32 32.0, %v2352_v26  ;;  %vm1313_vm11 = vweird.f32 %v2352_v26 }
 0x408   : > { %v1228_v56 = vsub.f32 1.0, %v1227_v53  ;;  %1257 = vmatpush.bf16.msra.mxu0 %v1248_v55 }
 0x40a   : > { %v1229_v58 = vmul.f32 %v2350_v52, %v1228_v56 }
 0x40c   : > { %v1230_v60 = vadd.f32 %v2350_v52, %v1229_v58 }
 0x40e   : > { %v1234_v62 = vsel %vm1233_vm5, %v2350_v52, %v1230_v60  ;;  %v2325_v52 = vld [vmem:[%s3152_s9] ss:$0 sm:$0xff] }
 0x40f   : > { %v1239_v63 = vsel %vm1236_vm6, %v1238_v61, %v1234_v62 }
 0x410   : > { %v1240_v0 = vmul.f32 %v2346_v28, %v1239_v63  ;;  %v1310_v28 = vsub.f32 1.0, %v1309_v27 }
 0x412   : > { %v1241_v1 = vpack.c.bf16 %v1240_v0, %v1240_v0  ;;  %v1311_v29 = vmul.f32 %v2352_v26, %v1310_v28 }
 0x414   : > { %2120 = vmatmul.msk.bf16.vlgmr.msra.gmra.mxu0 %vm962_vm1, %v1241_v1  ;;  %v1312_v30 = vadd.f32 %v2352_v26, %v1311_v29  ;;  %v2327_v1 = vld [vmem:[#allocation3] ss:$0 sm:$0xff] }
 0x416   : > { %v3002_v31 = vsel %vm1313_vm11, %v2352_v26, %v1312_v30 }
 0x419   : > { %v1182_v2 = vpop.f32.mrf.mxu2 }
 0x41a   : > { %v1186_v3 = vpack.c.bf16 %v1182_v2, %v1182_v2 }
 0x41c   : > { %1188 = vrot.lane.b32.xlu1 %v1186_v3, %s3171_s6  ;;  %s3201_s6 = sld [smem:[#allocation29_spill]] }
 0x421   : > { %v1184_v5 = vpop.f32.mrf.mxu2 }
 0x422   : > { %v2323_v19 = vld [vmem:[%s3201_s6] ss:$0 sm:$0xff]  ;;  %s876_s6 = scalar_lea.vmem %s3202_s7, %s2910_s2  ;;  %s3208_s7 = smov 8  }
 0x423   : > { %v883_v37 = vld [vmem:[%s876_s6] sm:$0xff]  ;;  %s3209_s6 = smov 24  }
 0x424   : > { %v1390_v39 = vpack.c.bf16 %v883_v37, %v883_v37 }
 0x426   : > { %2147 = vmatmul.msk.bf16.vlgmr.msrb.gmra.mxu3 %vm915_vm0, %v1390_v39 }
 0x481   : > { %v1105_v6 = vpop.f32.mrf.mxu0 }
 0x482   : > { %v1109_v7 = vpack.c.bf16 %v1105_v6, %v1105_v6 }
 0x484   : > { %1111 = vrot.lane.b32.xlu0 %v1109_v7, %s3173_s30  ;;  %s880_s30 = scalar_lea.vmem %s3167_s24, %s2910_s2 }
 0x489   : > { %v1107_v8 = vpop.f32.mrf.mxu0 }
 0x48e   : > { %v1189_v15 = vpop.permute.xlu1 %1188 }
 0x491   : > { %v1259_v9 = vpop.f32.mrf.mxu0 }
 0x492   : > { %v1263_v10 = vpack.c.bf16 %v1259_v9, %v1259_v9 }
 0x494   : > { %1265 = vrot.lane.b32.xlu2 %v1263_v10, %s3172_s19  ;;  %s3207_s19 = smov 80  }
 0x499   : > { %v1261_v11 = vpop.f32.mrf.mxu0 }
 0x4a9   : > { %v1418_v58 = vpop.f32.mrf.mxu3 }
 0x4aa   : > { %v1419_v59 = vadd.f32 %v2326_v57, %v1418_v58 }
 0x4ac   : > { %v1422_v60 = vpack.c.bf16 %v1419_v59, %v1419_v59 }
 0x4ae   : > { %v1427_v61 = vsel %vm962_vm1, %v1422_v60, 0  ;;  %v1469_v62 = vunpack.c.l.b16 %v1422_v60 }
 0x4af   : > { %1436 = vmatpush.bf16.xpose.msrb.mxu0 %v1427_v61 }
 0x4b0   : > { %v3036_v63 = vpack.c.b16 %v1469_v62, %v1469_v62 }
 0x4b1   : > { %v1420_v0 = vpop.f32.mrf.mxu3 }
 0x4b2   : > { %1499 = vrot.lane.b32.xlu2 %v3036_v63, %s2683_s28 }
 0x4ee   : > { %v1266_v16 = vpop.permute.xlu2 %1265 }
 0x4f6   : > { %v1112_v14 = vpop.permute.xlu0 %1111 }
 0x4f7   : > { %1115 = vst.msk [vmem:[#allocation2] sm:$0xf] %vm1114_vm8, %v1112_v14 }
 0x4f8   : > { %1192 = vst.msk [vmem:[#allocation2] sm:$0xf] %vm1191_vm9, %v1189_v15 }
 0x4f9   : > { %1269 = vst.msk [vmem:[#allocation2] sm:$0xf] %vm1268_vm10, %v1266_v16 }
 0x500   : > { %v1270_v17 = vld [vmem:[#allocation2] sm:$0xf] }
 0x501   : > { %2129 = vmatmul.msk.bf16.vlgmr.msra.gmra.mxu1 %vm915_vm0, %v1270_v17 }
 0x50c   : > { %v1500_v9 = vpop.permute.xlu2 %1499 }
 0x50d   : > { %v1505_v10 = vsel %vm962_vm1, %v1500_v9, 0 }
 0x50e   : > { %1514 = vmatpush.bf16.xpose.msrb.mxu2 %v1505_v10 }
 0x57e   : > { %v1298_v20 = vpop.f32.mrf.mxu1 }
 0x57f   : > { %v1299_v21 = vadd.f32 %v2323_v19, %v1298_v20 }
 0x581   : > { %v1302_v22 = vadd.f32 %v1299_v21, %v2928_v4 }
 0x583   : > { %v1305_v23 = vsel %vm915_vm0, %v1302_v22, 0.0 }
 0x584   : > { %1306 = vadd.xlane.f32.xlu0 %v1305_v23 }
 0x586   : > { %v1300_v24 = vpop.f32.mrf.mxu1 }
 0x5f7   : > { %v1307_v32 = vpop.xlane.xlu0 %1306 }
 0x5f8   : > { %v1315_v33 = vmul.f32 %v3002_v31, %v1307_v32 }
 0x5fa   : > { %v1316_v34 = vsub.f32 %v1302_v22, %v1315_v33 }
 0x5fc   : > { %v1317_v4 = vmul.f32 %v1316_v34, %v1316_v34 }
 0x5fe   : > { %v1318_v35 = vsel %vm915_vm0, %v1317_v4, 0.0 }
 0x5ff   : > { %1319 = vadd.xlane.f32.xlu1 %v1318_v35 }
 0x672   : > { %v1320_v42 = vpop.xlane.xlu1 %1319 }
 0x673   : > { %v1321_v43 = vmul.f32 %v1320_v42, %v3002_v31 }
 0x675   : > { %v1322_v44 = vadd.f32 1e-05, %v1321_v43 }
 0x677   : > { %2353 = vrsqrt.f32 %v1322_v44  ;;  %vm1329_vm13 = vweird.f32 %v1322_v44 }
 0x67d   : > { %v2354_v45 = vpop.eup %2353 }
 0x67e   : > { %v1324_v46 = vmul.f32 %v2354_v45, %v1322_v44  ;;  %vm1330_vm12 = vweird.f32 %v2354_v45 }
 0x67f   : > { %vm1331_vm14 = vmor %vm1329_vm13, %vm1330_vm12 }
 0x680   : > { %v1325_v47 = vmul.f32 %v2354_v45, %v1324_v46 }
 0x682   : > { %v1326_v48 = vmul.f32 0.5, %v1325_v47 }
 0x684   : > { %v1327_v49 = vsub.f32 1.5, %v1326_v48 }
 0x686   : > { %v1328_v50 = vmul.f32 %v2354_v45, %v1327_v49 }
 0x688   : > { %v1332_v18 = vsel %vm1331_vm14, %v2354_v45, %v1328_v50 }
 0x689   : > { %v1333_v53 = vmul.f32 %v1332_v18, %v1316_v34 }
 0x68b   : > { %v1337_v54 = vmul.f32 %v2324_v51, %v1333_v53 }
 0x68d   : > { %v3030_v55 = vadd.f32 %v2325_v52, %v1337_v54 }
 0x68f   : > { %v1357_v56 = vpack.c.bf16 %v3030_v55, %v3030_v55 }
 0x691   : > { %2138 = vmatmul.msk.bf16.vlgmr.msra.gmra.mxu2 %vm915_vm0, %v1357_v56 }
 0x714   : > { %v1385_v2 = vpop.f32.mrf.mxu2 }
 0x715   : > { %v1386_v3 = vadd.f32 %v2327_v1, %v1385_v2 }
 0x717   : > { %v1389_v5 = vpack.c.bf16 %v1386_v3, %v1386_v3 }
 0x719   : > { %v1495_v6 = vunpack.c.l.b16 %v1389_v5  ;;  %2148 = vmatmul.msk.bf16.vlgmr.msrb.gmra.mxu0 %vm962_vm1, %v1389_v5 }
 0x71b   : > { %v1496_v7 = vpack.c.b16 %v1495_v6, %v1495_v6 }
 0x71c   : > { %v1387_v8 = vpop.f32.mrf.mxu2 }
 0x71d   : > { %1573 = vrot.lane.b32.xlu0 %v1496_v7, %s2684_s27  ;;  %1497 = vrot.lane.b32.xlu2 %v1496_v7, %s2683_s28  ;;  %s3204_s28 = smov 88  }
 0x725   : > { %1651 = vrot.lane.b32.xlu2 %v3036_v63, %s2685_s16 }
 0x72d   : > { %1649 = vrot.lane.b32.xlu2 %v1496_v7, %s2685_s16  ;;  %s3206_s16 = smov 72  }
 0x735   : > { %1575 = vrot.lane.b32.xlu2 %v3036_v63, %s2684_s27  ;;  %s3205_s27 = smov 96  }
 0x777   : > { %v1498_v11 = vpop.permute.xlu2 %1497 }
 0x778   : > { %2150 = vmatmul.msk.bf16.vlgmr.msrb.gmra.mxu2 %vm962_vm1, %v1498_v11 }
 0x77f   : > { %v1652_v12 = vpop.permute.xlu2 %1651 }
 0x780   : > { %v1657_v13 = vsel %vm962_vm1, %v1652_v12, 0 }
 0x781   : > { %1666 = vmatpush.bf16.xpose.msra.mxu2 %v1657_v13 }
 0x787   : > { %v1650_v14 = vpop.permute.xlu2 %1649 }
 0x788   : > { %2154 = vmatmul.msk.bf16.vlgmr.msra.gmra.mxu2 %vm962_vm1, %v1650_v14 }
 0x78f   : > { %v1576_v15 = vpop.permute.xlu2 %1575  ;;  %v1574_v19 = vpop.permute.xlu0 %1573 }
 0x790   : > { %v1581_v16 = vsel %vm962_vm1, %v1576_v15, 0 }
 0x791   : > { %1590 = vmatpush.bf16.xpose.msra.mxu0 %v1581_v16 }
 0x796   : > { %v1438_v17 = vpop.f32.mrf.mxu0 }
 0x797   : > { %v1442_v20 = vmul.f32 0.35355338, %v1438_v17 }
 0x798   : > { %2152 = vmatmul.msk.bf16.vlgmr.msra.gmra.mxu0 %vm962_vm1, %v1574_v19 }
 0x799   : > { %v1443_v21 = vsel %vm962_vm1, %v1442_v20, -inf }
 0x79a   : > { %1444 = vmax.xlane.f32.xlu2 %v1443_v21 }
 0x79e   : > { %v1440_v22 = vpop.f32.mrf.mxu0 }
 0x7fb   : > { %v1516_v23 = vpop.f32.mrf.mxu2 }
 0x7fc   : > { %v1520_v34 = vmul.f32 0.35355338, %v1516_v23 }
 0x7fe   : > { %v1521_v35 = vsel %vm962_vm1, %v1520_v34, -inf }
 0x803   : > { %v1518_v24 = vpop.f32.mrf.mxu2 }
 0x80b   : > { %v1668_v25 = vpop.f32.mrf.mxu2 }
 0x80c   : > { %v1672_v38 = vmul.f32 0.35355338, %v1668_v25 }
 0x80d   : > { %v1445_v27 = vpop.xlane.xlu2 %1444 }
 0x80e   : > { %v1446_v30 = vsub.f32 %v1442_v20, %v1445_v27  ;;  %v1673_v39 = vsel %vm962_vm1, %v1672_v38, -inf }
 0x810   : > { %v1447_v33 = vmul.f32 1.442695, %v1446_v30 }
 0x812   : > { %2355 = vpow2.f32 %v1447_v33 }
 0x813   : > { %v1670_v26 = vpop.f32.mrf.mxu2 }
 0x815   : > { %v1592_v28 = vpop.f32.mrf.mxu0 }
 0x816   : > { %v1596_v29 = vmul.f32 0.35355338, %v1592_v28 }
 0x818   : > { %v1597_v32 = vsel %vm962_vm1, %v1596_v29, -inf  ;;  %v2356_v36 = vpop.eup %2355 }
 0x819   : > { %1598 = vmax.xlane.f32.xlu1 %v1597_v32  ;;  %v1449_v37 = vsel %vm962_vm1, %v2356_v36, 0.0 }
 0x81d   : > { %v1594_v4 = vpop.f32.mrf.mxu0 }
 0x821   : > { %1522 = vmax.xlane.f32.xlu1 %v1521_v35 }
 0x829   : > { %1450 = vadd.xlane.f32.xlu1 %v1449_v37 }
 0x831   : > { %1674 = vmax.xlane.f32.xlu1 %v1673_v39 }
 0x84a   : > { %1546 = vrot.lane.b32.xlu1 %v3036_v63, %s3204_s28 }
 0x88c   : > { %v1599_v40 = vpop.xlane.xlu1 %1598 }
 0x88d   : > { %v1600_v41 = vsub.f32 %v1596_v29, %v1599_v40 }
 0x88f   : > { %v1601_v42 = vmul.f32 1.442695, %v1600_v41 }
 0x891   : > { %2357 = vpow2.f32 %v1601_v42 }
 0x894   : > { %v1523_v43 = vpop.xlane.xlu1 %1522 }
 0x895   : > { %v1524_v44 = vsub.f32 %v1520_v34, %v1523_v43 }
 0x897   : > { %v3061_v45 = vpop.eup %2357  ;;  %v1525_v46 = vmul.f32 1.442695, %v1524_v44 }
 0x898   : > { %v1603_v47 = vsel %vm962_vm1, %v3061_v45, 0.0 }
 0x899   : > { %2359 = vpow2.f32 %v1525_v46  ;;  %1604 = vadd.xlane.f32.xlu2 %v1603_v47 }
 0x89c   : > { %v1451_v48 = vpop.xlane.xlu1 %1450 }
 0x89d   : > { %v1463_v0 = vand.u32 2147483648, %v1451_v48  ;;  %vm1457_vm3 = vweird.f32 %v1451_v48  ;;  %v1461_v1 = vand.u32 2147483647, %v1451_v48 }
 0x89f   : > { %v2360_v49 = vpop.eup %2359  ;;  %v1464_v5 = vor.u32 1.1754944e-38, %v1463_v0  ;;  %vm1462_vm5 = vcmp.eq.f32.partialorder %v1461_v1, 8.507059e+37 }
 0x8a0   : > { %v1527_v50 = vsel %vm962_vm1, %v2360_v49, 0.0 }
 0x8a1   : > { %1528 = vadd.xlane.f32.xlu0 %v1527_v50 }
 0x8a4   : > { %v1675_v51 = vpop.xlane.xlu1 %1674 }
 0x8a5   : > { %v1676_v18 = vsub.f32 %v1672_v38, %v1675_v51 }
 0x8a7   : > { %v1677_v52 = vmul.f32 1.442695, %v1676_v18 }
 0x8a9   : > { %2361 = vpow2.f32 %v1677_v52 }
 0x8aa   : > { %2363 = vrcp.f32 %v1451_v48 }
 0x8af   : > { %v3066_v53 = vpop.eup %2361 }
 0x8b0   : > { %v1679_v54 = vsel %vm962_vm1, %v3066_v53, 0.0  ;;  %v2364_v58 = vpop.eup %2363 }
 0x8b1   : > { %1471 = vrot.lane.b32.xlu2 %v3036_v63, %s3205_s27  ;;  %1680 = vadd.xlane.f32.xlu1 %v1679_v54  ;;  %v1453_v59 = vmul.f32 %v2364_v58, %v1451_v48  ;;  %vm1458_vm15 = vweird.f32 %v2364_v58 }
 0x8b2   : > { %vm1459_vm4 = vmor %vm1457_vm3, %vm1458_vm15 }
 0x8b3   : > { %v1454_v60 = vsub.f32 1.0, %v1453_v59 }
 0x8b5   : > { %1698 = vrot.lane.b32.xlu0 %v3036_v63, %s3206_s16  ;;  %v1455_v61 = vmul.f32 %v2364_v58, %v1454_v60 }
 0x8b7   : > { %v1456_v62 = vadd.f32 %v2364_v58, %v1455_v61 }
 0x8b9   : > { %v1460_v3 = vsel %vm1459_vm4, %v2364_v58, %v1456_v62 }
 0x8ba   : > { %v1465_v6 = vsel %vm1462_vm5, %v1464_v5, %v1460_v3  ;;  %v2203_v3 = vld [vmem:[%s3157_s14] sm:$0xff] }
 0x8bb   : > { %v1466_v7 = vmul.f32 %v2356_v36, %v1465_v6 }
 0x8bc   : > { %v1547_v56 = vpop.permute.xlu1 %1546 }
 0x8bd   : > { %v1552_v57 = vsel %vm1016_vm2, %v1547_v56, 0  ;;  %v1467_v10 = vpack.c.bf16 %v1466_v7, %v1466_v7 }
 0x8be   : > { %1561 = vmatpush.bf16.msra.mxu3 %v1552_v57 }
 0x8ca   : > { %1622 = vrot.lane.b32.xlu1 %v3036_v63, %s3207_s19 }
 0x90c   : > { %v3077_v2 = vpop.xlane.xlu2 %1604 }
 0x90d   : > { %v1617_v38 = vand.u32 2147483648, %v3077_v2  ;;  %vm1611_vm4 = vweird.f32 %v3077_v2  ;;  %v1615_v40 = vand.u32 2147483647, %v3077_v2 }
 0x90f   : > { %v1618_v46 = vor.u32 1.1754944e-38, %v1617_v38 }
 0x914   : > { %v1472_v8 = vpop.permute.xlu2 %1471  ;;  %v1529_v63 = vpop.xlane.xlu0 %1528 }
 0x915   : > { %v1477_v9 = vsel %vm1016_vm2, %v1472_v8, 0  ;;  %2365 = vrcp.f32 %v1529_v63  ;;  %v1541_v14 = vand.u32 2147483648, %v1529_v63  ;;  %v1539_v16 = vand.u32 2147483647, %v1529_v63 }
 0x916   : > { %1486 = vmatpush.bf16.msrb.mxu1 %v1477_v9  ;;  %2367 = vrcp.f32 %v3077_v2  ;;  %vm1535_vm11 = vweird.f32 %v1529_v63 }
 0x917   : > { %v1542_v20 = vor.u32 1.1754944e-38, %v1541_v14  ;;  %vm1540_vm13 = vcmp.eq.f32.partialorder %v1539_v16, 8.507059e+37 }
 0x919   : > { %2149 = vmatmul.msk.bf16.vlgmr.msrb.gmra.mxu1 %vm962_vm1, %v1467_v10 }
 0x91b   : > { %v2366_v11 = vpop.eup %2365 }
 0x91c   : > { %v1531_v12 = vmul.f32 %v2366_v11, %v1529_v63  ;;  %vm1536_vm6 = vweird.f32 %v2366_v11  ;;  %v2368_v17 = vpop.eup %2367  ;;  %v2328_v63 = vld [vmem:[#allocation7] ss:$0 sm:$0xff] }
 0x91d   : > { %vm1537_vm12 = vmor %vm1535_vm11, %vm1536_vm6  ;;  %v1607_v23 = vmul.f32 %v2368_v17, %v3077_v2  ;;  %vm1612_vm15 = vweird.f32 %v2368_v17  ;;  %v2204_v2 = vld [vmem:[%s3157_s14 + $0x8] sm:$0xff] }
 0x91e   : > { %v1532_v13 = vsub.f32 1.0, %v1531_v12  ;;  %vm1613_vm6 = vmor %vm1611_vm4, %vm1612_vm15  ;;  %1750 = vmatpush.bf16.msrb.mxu0 %v2204_v2 }
 0x91f   : > { %v1608_v29 = vsub.f32 1.0, %v1607_v23 }
 0x920   : > { %v1533_v15 = vmul.f32 %v2366_v11, %v1532_v13 }
 0x921   : > { %v1609_v33 = vmul.f32 %v2368_v17, %v1608_v29 }
 0x922   : > { %v1534_v19 = vadd.f32 %v2366_v11, %v1533_v15  ;;  %1751 = vmatpush.bf16.msrb.mxu0 %v2203_v3 }
 0x923   : > { %v1610_v37 = vadd.f32 %v2368_v17, %v1609_v33  ;;  %v2329_v33 = vld [vmem:[#allocation8] ss:$0 sm:$0xff] }
 0x924   : > { %v1538_v21 = vsel %vm1537_vm12, %v2366_v11, %v1534_v19  ;;  %v1681_v22 = vpop.xlane.xlu1 %1680  ;;  %vm1616_vm12 = vcmp.eq.f32.partialorder %v1615_v40, 8.507059e+37  ;;  %v2207_v40 = vld [vmem:[%s3163_s20] sm:$0xff] }
 0x925   : > { %v1543_v24 = vsel %vm1540_vm13, %v1542_v20, %v1538_v21  ;;  %2369 = vrcp.f32 %v1681_v22  ;;  %v1693_v4 = vand.u32 2147483648, %v1681_v22  ;;  %v1691_v36 = vand.u32 2147483647, %v1681_v22  ;;  %v2206_v20 = vld [vmem:[%s3161_s18 + $0x8] sm:$0xff]  ;;  %v2210_v21 = vld [vmem:[%s3163_s20 + $0x18] sm:$0xff] }
 0x926   : > { %v1544_v25 = vmul.f32 %v2360_v49, %v1543_v24  ;;  %vm1687_vm3 = vweird.f32 %v1681_v22  ;;  %v1614_v43 = vsel %vm1613_vm6, %v2368_v17, %v1610_v37  ;;  %1873 = vmatpush.bf16.msrb.mxu2 %v2210_v21  ;;  %v2209_v24 = vld [vmem:[%s3163_s20 + $0x10] sm:$0xff] }
 0x927   : > { %v1699_v26 = vpop.permute.xlu0 %1698  ;;  %v1694_v41 = vor.u32 1.1754944e-38, %v1693_v4  ;;  %vm1692_vm11 = vcmp.eq.f32.partialorder %v1691_v36, 8.507059e+37  ;;  %v1619_v48 = vsel %vm1616_vm12, %v1618_v46, %v1614_v43  ;;  %v2330_v4 = vld [vmem:[#allocation10] ss:$0 sm:$0xff] }
 0x928   : > { %v1704_v27 = vsel %vm1016_vm2, %v1699_v26, 0  ;;  %v1545_v28 = vpack.c.bf16 %v1544_v25, %v1544_v25  ;;  %v1620_v50 = vmul.f32 %v3061_v45, %v1619_v48  ;;  %v2332_v48 = vld [vmem:[#allocation13] ss:$0 sm:$0xff] }
 0x929   : > { %1713 = vmatpush.bf16.msrb.mxu3 %v1704_v27 }
 0x92a   : > { %2151 = vmatmul.msk.bf16.vlgmr.msra.gmra.mxu3 %vm962_vm1, %v1545_v28  ;;  %v1621_v52 = vpack.c.bf16 %v1620_v50, %v1620_v50  ;;  %1874 = vmatpush.bf16.msrb.mxu2 %v2209_v24 }
 0x92b   : > { %v2370_v30 = vpop.eup %2369 }
 0x92c   : > { %v1683_v32 = vmul.f32 %v2370_v30, %v1681_v22  ;;  %vm1688_vm14 = vweird.f32 %v2370_v30 }
 0x92d   : > { %vm1689_vm5 = vmor %vm1687_vm3, %vm1688_vm14 }
 0x92e   : > { %v1684_v34 = vsub.f32 1.0, %v1683_v32 }
 0x930   : > { %v1685_v35 = vmul.f32 %v2370_v30, %v1684_v34 }
 0x932   : > { %v1686_v39 = vadd.f32 %v2370_v30, %v1685_v35 }
 0x934   : > { %v1690_v42 = vsel %vm1689_vm5, %v2370_v30, %v1686_v39  ;;  %v2208_v39 = vld [vmem:[%s3163_s20 + $0x8] sm:$0xff] }
 0x935   : > { %v1695_v44 = vsel %vm1692_vm11, %v1694_v41, %v1690_v42  ;;  %1875 = vmatpush.bf16.msrb.mxu2 %v2208_v39  ;;  %v2331_v41 = vld [vmem:[#allocation11] ss:$0 sm:$0xff] }
 0x936   : > { %v1696_v47 = vmul.f32 %v3066_v53, %v1695_v44 }
 0x938   : > { %v1697_v49 = vpack.c.bf16 %v1696_v47, %v1696_v47 }
 0x939   : > { %1876 = vmatpush.bf16.msrb.mxu2 %v2207_v40 }
 0x93a   : > { %2155 = vmatmul.msk.bf16.vlgmr.msrb.gmra.mxu3 %vm962_vm1, %v1697_v49 }
 0x93c   : > { %v1623_v51 = vpop.permute.xlu1 %1622 }
 0x93d   : > { %v1628_v18 = vsel %vm1016_vm2, %v1623_v51, 0 }
 0x93e   : > { %1637 = vmatpush.bf16.msra.mxu1 %v1628_v18 }
 0x941   : > { %2153 = vmatmul.msk.bf16.vlgmr.msra.gmra.mxu1 %vm962_vm1, %v1621_v52 }
 0x942   : > { %1820 = vmatpush.bf16.msrb.mxu1 %v2206_v20 }
 0x996   : > { %v1488_v54 = vpop.f32.mrf.mxu1 }
 0x997   : > { %v1492_v56 = vpack.c.bf16 %v1488_v54, %v1488_v54 }
 0x999   : > { %1493 = vst.msk [vmem:[#allocation2] sm:$0xf] %vm1034_vm7, %v1492_v56 }
 0x99e   : > { %v1490_v57 = vpop.f32.mrf.mxu1 }
 0x9ad   : > { %v1563_v53 = vpop.f32.mrf.mxu3 }
 0x9ae   : > { %v1567_v58 = vpack.c.bf16 %v1563_v53, %v1563_v53 }
 0x9b0   : > { %1569 = vrot.lane.b32.xlu1 %v1567_v58, %s3208_s7 }
 0x9b5   : > { %v1565_v59 = vpop.f32.mrf.mxu3 }
 0x9bd   : > { %v1715_v60 = vpop.f32.mrf.mxu3 }
 0x9be   : > { %v1719_v61 = vpack.c.bf16 %v1715_v60, %v1715_v60  ;;  %v1639_v45 = vpop.f32.mrf.mxu1 }
 0x9bf   : > { %v1643_v62 = vpack.c.bf16 %v1639_v45, %v1639_v45 }
 0x9c0   : > { %1721 = vrot.lane.b32.xlu0 %v1719_v61, %s3209_s6 }
 0x9c1   : > { %1645 = vrot.lane.b32.xlu2 %v1643_v62, %s3210_s26 }
 0x9c5   : > { %v1717_v0 = vpop.f32.mrf.mxu3 }
 0x9c6   : > { %v1641_v1 = vpop.f32.mrf.mxu1 }
 0xa1b   : > { %v1646_v6 = vpop.permute.xlu2 %1645 }
 0xa22   : > { %v1570_v5 = vpop.permute.xlu1 %1569 }
 0xa23   : > { %1572 = vst.msk [vmem:[#allocation2] sm:$0xf] %vm1114_vm8, %v1570_v5  ;;  %vm1865_vm8 = vcmask 523264   ;;  %v2333_v5 = vld [vmem:[#allocation14] ss:$0 sm:$0xff] }
 0xa24   : > { %1648 = vst.msk [vmem:[#allocation2] sm:$0xf] %vm1191_vm9, %v1646_v6 }
 0xa32   : > { %v1722_v7 = vpop.permute.xlu0 %1721 }
 0xa33   : > { %1724 = vst.msk [vmem:[#allocation2] sm:$0xf] %vm1268_vm10, %v1722_v7  ;;  %v2334_v7 = vld [vmem:[#allocation16] ss:$0 sm:$0xff] }
 0xa3a   : > { %v1725_v8 = vld [vmem:[#allocation2] sm:$0xf] }
 0xa3b   : > { %2164 = vmatmul.msk.bf16.vlgmr.msrb.gmra.mxu0 %vm915_vm0, %v1725_v8 }
 0xab8   : > { %v1753_v9 = vpop.f32.mrf.mxu0 }
 0xab9   : > { %v1754_v10 = vadd.f32 %v2328_v63, %v1753_v9 }
 0xabb   : > { %v1757_v11 = vadd.f32 %v1754_v10, %v3030_v55  ;;  %v2205_v55 = vld [vmem:[%s3161_s18] sm:$0xff] }
 0xabc   : > { %1821 = vmatpush.bf16.msrb.mxu1 %v2205_v55 }
 0xabd   : > { %v1760_v12 = vsel %vm915_vm0, %v1757_v11, 0.0 }
 0xabe   : > { %1761 = vadd.xlane.f32.xlu1 %v1760_v12 }
 0xac0   : > { %v1755_v13 = vpop.f32.mrf.mxu0 }
 0xb31   : > { %v1762_v14 = vpop.xlane.xlu1 %1761 }
 0xb32   : > { %v1763_v15 = vmul.f32 %v1762_v14, %v3002_v31 }
 0xb34   : > { %v1764_v16 = vsub.f32 %v1757_v11, %v1763_v15 }
 0xb36   : > { %v1765_v17 = vmul.f32 %v1764_v16, %v1764_v16 }
 0xb38   : > { %v1766_v19 = vsel %vm915_vm0, %v1765_v17, 0.0 }
 0xb39   : > { %1767 = vadd.xlane.f32.xlu2 %v1766_v19 }
 0xbac   : > { %v1768_v22 = vpop.xlane.xlu2 %1767 }
 0xbad   : > { %v1769_v23 = vmul.f32 %v1768_v22, %v3002_v31 }
 0xbaf   : > { %v1770_v25 = vadd.f32 1e-05, %v1769_v23 }
 0xbb1   : > { %2371 = vrsqrt.f32 %v1770_v25  ;;  %vm1777_vm2 = vweird.f32 %v1770_v25 }
 0xbb7   : > { %v2372_v26 = vpop.eup %2371 }
 0xbb8   : > { %v1772_v27 = vmul.f32 %v2372_v26, %v1770_v25  ;;  %vm1778_vm1 = vweird.f32 %v2372_v26 }
 0xbb9   : > { %vm1779_vm7 = vmor %vm1777_vm2, %vm1778_vm1 }
 0xbba   : > { %v1773_v28 = vmul.f32 %v2372_v26, %v1772_v27 }
 0xbbc   : > { %v1774_v29 = vmul.f32 0.5, %v1773_v28 }
 0xbbe   : > { %v1775_v30 = vsub.f32 1.5, %v1774_v29 }
 0xbc0   : > { %v1776_v32 = vmul.f32 %v2372_v26, %v1775_v30 }
 0xbc2   : > { %v1780_v34 = vsel %vm1779_vm7, %v2372_v26, %v1776_v32 }
 0xbc3   : > { %v1781_v35 = vmul.f32 %v1780_v34, %v1764_v16 }
 0xbc5   : > { %v1785_v36 = vmul.f32 %v2329_v33, %v1781_v35 }
 0xbc7   : > { %v1789_v37 = vadd.f32 %v2330_v4, %v1785_v36 }
 0xbc9   : > { %v1790_v38 = vpack.c.bf16 %v1789_v37, %v1789_v37 }
 0xbcb   : > { %2173 = vmatmul.msk.bf16.vlgmr.msrb.gmra.mxu1 %vm915_vm0, %v1790_v38 }
 0xc48   : > { %v1823_v42 = vpop.f32.mrf.mxu1 }
 0xc49   : > { %v1824_v43 = vadd.f32 %v2331_v41, %v1823_v42 }
 0xc4b   : > { %v1827_v44 = vmax.f32 %v1824_v43, 0.0 }
 0xc4d   : > { %v1828_v46 = vpack.c.bf16 %v1827_v44, %v1827_v44 }
 0xc4f   : > { %2190 = vmatmul.msk.bf16.vlgmr.msrb.gmra.mxu2 %vm1865_vm8, %v1828_v46 }
 0xc50   : > { %v1825_v47 = vpop.f32.mrf.mxu1 }
 0xcd2   : > { %v1878_v49 = vpop.f32.mrf.mxu2 }
 0xcd3   : > { %v1879_v50 = vadd.f32 %v2332_v48, %v1878_v49 }
 0xcd5   : > { %v1882_v51 = vadd.f32 %v1879_v50, %v1789_v37 }
 0xcd7   : > { %v1885_v18 = vsel %vm915_vm0, %v1882_v51, 0.0 }
 0xcd8   : > { %1886 = vadd.xlane.f32.xlu0 %v1885_v18 }
 0xcda   : > { %v1880_v52 = vpop.f32.mrf.mxu2 }
 0xd4b   : > { %v1887_v54 = vpop.xlane.xlu0 %1886 }
 0xd4c   : > { %v1888_v56 = vmul.f32 %v1887_v54, %v3002_v31 }
 0xd4e   : > { %v1889_v57 = vsub.f32 %v1882_v51, %v1888_v56 }
 0xd50   : > { %v1890_v53 = vmul.f32 %v1889_v57, %v1889_v57 }
 0xd52   : > { %v1891_v58 = vsel %vm915_vm0, %v1890_v53, 0.0 }
 0xd53   : > { %1892 = vadd.xlane.f32.xlu1 %v1891_v58 }
 0xdc6   : > { %v1893_v59 = vpop.xlane.xlu1 %1892 }
 0xdc7   : > { %v1894_v60 = vmul.f32 %v1893_v59, %v3002_v31 }
 0xdc9   : > { %v1895_v61 = vadd.f32 1e-05, %v1894_v60 }
 0xdcb   : > { %2373 = vrsqrt.f32 %v1895_v61  ;;  %vm1902_vm10 = vweird.f32 %v1895_v61 }
 0xdd1   : > { %v2374_v45 = vpop.eup %2373 }
 0xdd2   : > { %v1897_v62 = vmul.f32 %v2374_v45, %v1895_v61  ;;  %vm1903_vm9 = vweird.f32 %v2374_v45 }
 0xdd3   : > { %vm1904_vm13 = vmor %vm1902_vm10, %vm1903_vm9 }
 0xdd4   : > { %v1898_v0 = vmul.f32 %v2374_v45, %v1897_v62 }
 0xdd6   : > { %v1899_v1 = vmul.f32 0.5, %v1898_v0 }
 0xdd8   : > { %v1900_v2 = vsub.f32 1.5, %v1899_v1 }
 0xdda   : > { %v1901_v3 = vmul.f32 %v2374_v45, %v1900_v2 }
 0xddc   : > { %v1905_v6 = vsel %vm1904_vm13, %v2374_v45, %v1901_v3 }
 0xddd   : > { %v1906_v8 = vmul.f32 %v1905_v6, %v1889_v57 }
 0xddf   : > { %v1910_v63 = vmul.f32 %v2333_v5, %v1906_v8 }
 0xde1   : > { %v1914_v31 = vadd.f32 %v2334_v7, %v1910_v63 }
 0xde3   : > { %1915 = vst.msk [vmem:[%s880_s30] sm:$0xff] %vm915_vm0, %v1914_v31 }
 0xde4 PF: > { %s39_s5 = sadd.s32 1, %s2671_s5  }
 0xde5   : > { %p36_p7 = scmp.ge.s32.totalorder %s39_s5, 4  }
 0xde7   :  { %38 = sbr.rel (!%p36_p7) target bundleno = 18 (0x12), region = 186 }
 0xdec   :  { %1935 = vsyncpa [#allocation4], 1 }
 0xded   :  { %1937 = vsyncpa [#allocation4 + $0x1], 1 }
 0xdee   :  { %1938 = vsyncpa [#allocation6], 1 }
 0xdef   :  { %1939 = vsyncpa [#allocation9], 1 }
 0xdf0   :  { %1940 = vsyncpa [#allocation12], 1 }
 0xdf1   :  { %1941 = vsyncpa [#allocation15], 1 }

// kernel: transformer_decoder_forward.3
= control target key start
LH: loop header
LB: loop body
LE: loop exit
PB: predicated region body
PF: predicated region fallthrough
CT: control target
= control target key end

     0   :  { %s2459_s0 = inlined_call_operand.vmem [shape: f32[2,8,32], index: 0, kind: input, shape index: {}]   ;;  %s2460_s1 = inlined_call_operand.vmem [shape: f32[2,8,32], index: 1, kind: input, shape index: {}]   ;;  %s2461_s2 = inlined_call_operand.vmem [shape: bf16[32,32], index: 2, kind: input, shape index: {}]   ;;  %s2462_s3 = inlined_call_operand.vmem [shape: f32[1,32], index: 3, kind: input, shape index: {}]   ;;  %s2463_s4 = inlined_call_operand.vmem [shape: bf16[32,64], index: 4, kind: input, shape index: {}]   ;;  %s2464_s5 = inlined_call_operand.vmem [shape: f32[1,64], index: 5, kind: input, shape index: {}]   ;;  %s2465_s6 = inlined_call_operand.vmem [shape: bf16[32,32], index: 6, kind: input, shape index: {}]   ;;  %s2466_s7 = inlined_call_operand.vmem [shape: f32[1,32], index: 7, kind: input, shape index: {}]   ;;  %s2467_s8 = inlined_call_operand.vmem [shape: f32[1,32], index: 8, kind: input, shape index: {}]   ;;  %s2468_s9 = inlined_call_operand.vmem [shape: f32[1,32], index: 9, kind: input, shape index: {}]   ;;  %s2469_s10 = inlined_call_operand.vmem [shape: bf16[32,32], index: 10, kind: input, shape index: {}]   ;;  %s2470_s11 = inlined_call_operand.vmem [shape: f32[1,32], index: 11, kind: input, shape index: {}]   ;;  %s2471_s12 = inlined_call_operand.vmem [shape: bf16[32,64], index: 12, kind: input, shape index: {}]   ;;  %s2472_s13 = inlined_call_operand.vmem [shape: f32[1,64], index: 13, kind: input, shape index: {}]   ;;  %s2473_s14 = inlined_call_operand.vmem [shape: bf16[32,32], index: 14, kind: input, shape index: {}]   ;;  %s2474_s15 = inlined_call_operand.vmem [shape: f32[1,32], index: 15, kind: input, shape index: {}]   ;;  %s2475_s16 = inlined_call_operand.vmem [shape: f32[1,32], index: 16, kind: input, shape index: {}]   ;;  %s2476_s17 = inlined_call_operand.vmem [shape: f32[1,32], index: 17, kind: input, shape index: {}]   ;;  %s2477_s18 = inlined_call_operand.vmem [shape: bf16[32,64], index: 18, kind: input, shape index: {}]   ;;  %s2478_s19 = inlined_call_operand.vmem [shape: f32[1,64], index: 19, kind: input, shape index: {}]   ;;  %s2479_s20 = inlined_call_operand.vmem [shape: bf16[64,32], index: 20, kind: input, shape index: {}]   ;;  %s2480_s21 = inlined_call_operand.vmem [shape: f32[1,32], index: 21, kind: input, shape index: {}]   ;;  %s2481_s22 = inlined_call_operand.vmem [shape: f32[1,32], index: 22, kind: input, shape index: {}]   ;;  %s2482_s23 = inlined_call_operand.vmem [shape: f32[1,32], index: 23, kind: input, shape index: {}]   ;;  %s2483_s24 = inlined_call_operand.vmem [shape: f32[2,8,32], index: 24, kind: output, shape index: {}]  }
   0x1   :  { %2500 = sst [smem:[#allocation3_spill]] %s2459_s0 }
   0x2   :  { %2501 = sst [smem:[#allocation4_spill]] %s2460_s1 }
   0x3   :  { %2502 = sst [smem:[#allocation5_spill]] %s2461_s2 }
   0x4   :  { %2503 = sst [smem:[#allocation6_spill]] %s2462_s3 }
   0x5   :  { %2504 = sst [smem:[#allocation7_spill]] %s2463_s4 }
   0x6   :  { %2505 = sst [smem:[#allocation8_spill]] %s2464_s5  ;;  %s2191_s5 = smov 0  }
   0x7   :  { %2506 = sst [smem:[#allocation9_spill]] %s2465_s6 }
   0x8   :  { %2507 = sst [smem:[#allocation10_spill]] %s2466_s7 }
   0x9   :  { %2508 = sst [smem:[#allocation11_spill]] %s2467_s8 }
   0xa LB: > { %s1850_s26 = sadd.s32 4294967295, %s2053_s5   ;;  %p1854_p0 = scmp.ge.s32.totalorder %s2053_s5, 1  ;;  %s2053_s5 = sphi %s2191_s5, %s34_s5  }
   0xb   : > { %p670_p1 = scmp.lt.s32.totalorder %s2053_s5, 3 }
   0xd   : > { %p671_p2 = pnand %p1854_p0, %p670_p1 }
   0xe   : > { %s2509_s6 = sld [smem:[#allocation5_spill]] (!%p671_p2)  ;;  %p738_p3 = scmp.lt.s32.totalorder (!%p671_p2), %s1850_s26, 1 }
   0xf   : > { %674 = sbr.rel (%p671_p2) target bundleno = 3511 (0xdb7), region = 116  ;;  %s2510_s0 = sld [smem:[#allocation7_spill]] (!%p671_p2) }
  0x10   : > { %s2511_s27 = sld [smem:[#allocation3_spill]] (!%p671_p2)  ;;  %s2489_s25 = smov (!%p671_p2), 96  }
  0x11   : > { %s2512_s29 = sld [smem:[#allocation6_spill]] (!%p671_p2)  ;;  %s2498_s4 = smov (!%p671_p2), 120  }
  0x12   : > { %s2513_s3 = sld [smem:[#allocation8_spill]] (!%p671_p2)  ;;  %s2496_s1 = smov (!%p671_p2), 112  }
  0x13   : > { %s2487_s2 = smov (!%p671_p2), 80   ;;  %s2492_s7 = smov (!%p671_p2), 8  }
  0x14   : > { %v1957_v0 = vld [vmem:[%s2509_s6 + $0x8] sm:$0xff]  ;;  %v1956_v2 = vld [vmem:[%s2509_s6] sm:$0xff]  ;;  %s2529_s26 = smov (!%p738_p3, %s1850_s26), 1  ;;  %vm784_vm0 = vcmask 261120   ;;  %vm831_vm1 = vcmask 64512   ;;  %vm885_vm2 = vcmask 1043456  }
  0x15   : > { %v1959_v1 = vld [vmem:[%s2510_s0 + $0x8] sm:$0xff]  ;;  %794 = vmatpush.bf16.msra.mxu0 %v1957_v0  ;;  %v1958_v3 = vld [vmem:[%s2510_s0] sm:$0xff]  ;;  %s2211_s8 = sshll.u32 %s2529_s26, 3  ;;  %vm903_vm7 = vcmask 60416   ;;  %s2488_s26 = smov 72  }
  0x16   : > { %823 = vmatpush.bf16.msra.mxu1 %v1959_v1  ;;  %s741_s28 = scalar_lea.vmem %s2511_s27, %s2211_s8  ;;  %s2494_s27 = smov 104  }
  0x17   : > { %v2217_v4 = vld [vmem:[%s741_s28] sm:$0xff]  ;;  %s2493_s28 = smov 88   ;;  %s2491_s30 = smov 24  }
  0x18   : > { %v768_v5 = vpack.c.bf16 %v2217_v4, %v2217_v4  ;;  %v1993_v6 = vld [vmem:[%s2512_s29] ss:$0 sm:$0xff]  ;;  %s2490_s29 = smov 16  }
  0x19   : > { %795 = vmatpush.bf16.msra.mxu0 %v1956_v2  ;;  %v1994_v7 = vld [vmem:[%s2513_s3] ss:$0 sm:$0xff]  ;;  %s2516_s3 = sld [smem:[#allocation4_spill]] }
  0x1a   : > { %824 = vmatpush.bf16.msra.mxu1 %v1958_v3 }
  0x1c   : > { %1866 = vmatmul.msk.bf16.vlgmr.msra.gmra.mxu0 %vm784_vm0, %v768_v5 }
  0x1d   : > { %1875 = vmatmul.msk.bf16.vlgmr.msra.gmra.mxu1 %vm784_vm0, %v768_v5 }
  0x99   : > { %v797_v8 = vpop.f32.mrf.mxu0 }
  0x9a   : > { %v826_v9 = vpop.f32.mrf.mxu1  ;;  %v798_v10 = vadd.f32 %v1993_v6, %v797_v8 }
  0x9b   : > { %v827_v11 = vadd.f32 %v1994_v7, %v826_v9 }
  0x9c   : > { %v801_v12 = vpack.c.bf16 %v798_v10, %v798_v10 }
  0x9d   : > { %v830_v13 = vpack.c.bf16 %v827_v11, %v827_v11 }
  0x9e   : > { %v906_v14 = vunpack.c.l.b16 %v801_v12 }
  0x9f   : > { %v878_v15 = vunpack.c.l.b16 %v830_v13  ;;  %v836_v16 = vsel %vm831_vm1, %v830_v13, 0 }
  0xa0   : > { %845 = vmatpush.bf16.xpose.msra.mxu2 %v836_v16  ;;  %v907_v17 = vpack.c.b16 %v906_v14, %v906_v14 }
  0xa1   : > { %v2230_v18 = vpack.c.b16 %v878_v15, %v878_v15  ;;  %v799_v19 = vpop.f32.mrf.mxu0 }
  0xa2   : > { %v828_v20 = vpop.f32.mrf.mxu1  ;;  %908 = vrot.lane.b32.xlu2 %v907_v17, %s2498_s4 }
  0xa3   : > { %880 = vrot.lane.b32.xlu1 %v2230_v18, %s2489_s25  ;;  %s2515_s25 = sld [smem:[#allocation10_spill]] }
  0xa7   : > { %1876 = vmatmul.msk.bf16.vlgmr.msra.gmra.mxu2 %vm831_vm1, %v801_v12 }
  0xaa   : > { %987 = vrot.lane.b32.xlu2 %v2230_v18, %s2496_s1 }
  0xab   : > { %910 = vrot.lane.b32.xlu1 %v2230_v18, %s2498_s4  ;;  %s2519_s4 = smov 112  }
  0xb2   : > { %1062 = vrot.lane.b32.xlu2 %v907_v17, %s2494_s27 }
  0xb3   : > { %985 = vrot.lane.b32.xlu1 %v907_v17, %s2496_s1  ;;  %s2520_s1 = smov 104  }
  0xfc   : > { %v909_v21 = vpop.permute.xlu2 %908 }
 0x104   : > { %v988_v22 = vpop.permute.xlu2 %987 }
 0x105   : > { %v993_v23 = vsel %vm831_vm1, %v988_v22, 0 }
 0x106   : > { %1002 = vmatpush.bf16.xpose.msrb.mxu1 %v993_v23 }
 0x10c   : > { %v1063_v57 = vpop.permute.xlu2 %1062 }
 0x115   : > { %v881_v24 = vpop.permute.xlu1 %880 }
 0x116   : > { %v887_v25 = vsel %vm885_vm2, %v881_v24, 0 }
 0x117   : > { %896 = vmatpush.bf16.msra.mxu3 %v887_v25 }
 0x11d   : > { %v911_v26 = vpop.permute.xlu1 %910 }
 0x11e   : > { %v916_v27 = vsel %vm831_vm1, %v911_v26, 0 }
 0x11f   : > { %925 = vmatpush.bf16.xpose.msrb.mxu3 %v916_v27 }
 0x125   : > { %v986_v28 = vpop.permute.xlu1 %985 }
 0x126   : > { %1880 = vmatmul.msk.bf16.vlgmr.msrb.gmra.mxu1 %vm831_vm1, %v986_v28 }
 0x12a   : > { %v847_v29 = vpop.f32.mrf.mxu2 }
 0x12b   : > { %v851_v30 = vmul.f32 0.35355338, %v847_v29 }
 0x12d   : > { %v852_v31 = vsel %vm831_vm1, %v851_v30, -inf }
 0x12e   : > { %853 = vmax.xlane.f32.xlu0 %v852_v31 }
 0x132   : > { %v849_v32 = vpop.f32.mrf.mxu2 }
 0x1a1   : > { %v854_v33 = vpop.xlane.xlu0 %853 }
 0x1a2   : > { %v855_v34 = vsub.f32 %v851_v30, %v854_v33 }
 0x1a3   : > { %v1004_v35 = vpop.f32.mrf.mxu1 }
 0x1a4   : > { %v856_v36 = vmul.f32 1.442695, %v855_v34  ;;  %v1008_v37 = vmul.f32 0.35355338, %v1004_v35 }
 0x1a6   : > { %2007 = vpow2.f32 %v856_v36  ;;  %v1009_v38 = vsel %vm831_vm1, %v1008_v37, -inf }
 0x1a7   : > { %1010 = vmax.xlane.f32.xlu2 %v1009_v38 }
 0x1ab   : > { %v1006_v39 = vpop.f32.mrf.mxu1 }
 0x1ac   : > { %v2008_v40 = vpop.eup %2007 }
 0x1ad   : > { %v858_v41 = vsel %vm831_vm1, %v2008_v40, 0.0 }
 0x1ae   : > { %859 = vadd.xlane.f32.xlu0 %v858_v41 }
 0x1c2   : > { %1064 = vrot.lane.b32.xlu0 %v2230_v18, %s2494_s27  ;;  %s2517_s27 = sld [smem:[#allocation11_spill]] }
 0x21a   : > { %v1011_v60 = vpop.xlane.xlu2 %1010 }
 0x21b   : > { %v1012_v62 = vsub.f32 %v1008_v37, %v1011_v60 }
 0x21d   : > { %v1013_v63 = vmul.f32 1.442695, %v1012_v62 }
 0x221   : > { %v860_v42 = vpop.xlane.xlu0 %859 }
 0x222   : > { %2009 = vrcp.f32 %v860_v42  ;;  %v872_v46 = vand.u32 2147483648, %v860_v42  ;;  %v870_v48 = vand.u32 2147483647, %v860_v42  ;;  %vm866_vm4 = vweird.f32 %v860_v42 }
 0x223   : > { %2011 = vpow2.f32 %v1013_v63 }
 0x224   : > { %v873_v50 = vor.u32 1.1754944e-38, %v872_v46  ;;  %vm871_vm6 = vcmp.eq.f32.partialorder %v870_v48, 8.507059e+37 }
 0x228   : > { %v2010_v43 = vpop.eup %2009 }
 0x229   : > { %v862_v44 = vmul.f32 %v2010_v43, %v860_v42  ;;  %vm867_vm3 = vweird.f32 %v2010_v43  ;;  %v2012_v3 = vpop.eup %2011 }
 0x22a   : > { %vm868_vm5 = vmor %vm866_vm4, %vm867_vm3  ;;  %v1015_v6 = vsel %vm831_vm1, %v2012_v3, 0.0 }
 0x22b   : > { %v863_v45 = vsub.f32 1.0, %v862_v44 }
 0x22d   : > { %v864_v47 = vmul.f32 %v2010_v43, %v863_v45 }
 0x22f   : > { %v865_v49 = vadd.f32 %v2010_v43, %v864_v47 }
 0x231   : > { %v869_v51 = vsel %vm868_vm5, %v2010_v43, %v865_v49 }
 0x232   : > { %v874_v52 = vsel %vm871_vm6, %v873_v50, %v869_v51 }
 0x233   : > { %v875_v53 = vmul.f32 %v2008_v40, %v874_v52 }
 0x234   : > { %v1065_v54 = vpop.permute.xlu0 %1064 }
 0x235   : > { %v1070_v55 = vsel %vm831_vm1, %v1065_v54, 0  ;;  %v876_v56 = vpack.c.bf16 %v875_v53, %v875_v53 }
 0x237   : > { %1877 = vmatmul.msk.bf16.vlgmr.msra.gmra.mxu3 %vm831_vm1, %v876_v56 }
 0x238   : > { %1079 = vmatpush.bf16.xpose.msra.mxu3 %v1070_v55 }
 0x247   : > { %1878 = vmatmul.msk.bf16.vlgmr.msrb.gmra.mxu3 %vm831_vm1, %v909_v21 }
 0x257   : > { %1882 = vmatmul.msk.bf16.vlgmr.msra.gmra.mxu3 %vm831_vm1, %v1063_v57 }
 0x2ba   : > { %v898_v58 = vpop.f32.mrf.mxu3 }
 0x2bb   : > { %v902_v59 = vpack.c.bf16 %v898_v58, %v898_v58 }
 0x2bd   : > { %904 = vst.msk [vmem:[#allocation2] sm:$0xf] %vm903_vm7, %v902_v59 }
 0x2c2   : > { %v900_v61 = vpop.f32.mrf.mxu3 }
 0x2ca   : > { %v927_v0 = vpop.f32.mrf.mxu3 }
 0x2cb   : > { %v931_v1 = vmul.f32 0.35355338, %v927_v0 }
 0x2cd   : > { %v932_v2 = vsel %vm831_vm1, %v931_v1, -inf }
 0x2ce   : > { %933 = vmax.xlane.f32.xlu1 %v932_v2 }
 0x2d2   : > { %v929_v5 = vpop.f32.mrf.mxu3 }
 0x2d6   : > { %1016 = vadd.xlane.f32.xlu1 %v1015_v6 }
 0x2da   : > { %v1081_v7 = vpop.f32.mrf.mxu3 }
 0x2db   : > { %v1085_v8 = vmul.f32 0.35355338, %v1081_v7 }
 0x2dd   : > { %v1086_v9 = vsel %vm831_vm1, %v1085_v8, -inf }
 0x2de   : > { %1087 = vmax.xlane.f32.xlu0 %v1086_v9 }
 0x2e2   : > { %v1083_v10 = vpop.f32.mrf.mxu3 }
 0x2ef   : > { %957 = vrot.lane.b32.xlu1 %v2230_v18, %s2493_s28  ;;  %s2522_s28 = smov 96  }
 0x2f2   : > { %1034 = vrot.lane.b32.xlu0 %v2230_v18, %s2487_s2 }
 0x341   : > { %v934_v11 = vpop.xlane.xlu1 %933 }
 0x342   : > { %v935_v12 = vsub.f32 %v931_v1, %v934_v11 }
 0x344   : > { %v936_v13 = vmul.f32 1.442695, %v935_v12 }
 0x346   : > { %2013 = vpow2.f32 %v936_v13 }
 0x349   : > { %v1017_v14 = vpop.xlane.xlu1 %1016 }
 0x34a   : > { %2015 = vrcp.f32 %v1017_v14  ;;  %v1029_v26 = vand.u32 2147483648, %v1017_v14  ;;  %vm1023_vm9 = vweird.f32 %v1017_v14  ;;  %v1027_v27 = vand.u32 2147483647, %v1017_v14 }
 0x34c   : > { %v2014_v15 = vpop.eup %2013  ;;  %v1030_v31 = vor.u32 1.1754944e-38, %v1029_v26  ;;  %vm1028_vm11 = vcmp.eq.f32.partialorder %v1027_v27, 8.507059e+37 }
 0x34d   : > { %v938_v16 = vsel %vm831_vm1, %v2014_v15, 0.0 }
 0x34e   : > { %939 = vadd.xlane.f32.xlu2 %v938_v16 }
 0x350   : > { %v2016_v17 = vpop.eup %2015 }
 0x351   : > { %v1019_v19 = vmul.f32 %v2016_v17, %v1017_v14  ;;  %v1088_v20 = vpop.xlane.xlu0 %1087  ;;  %vm1024_vm8 = vweird.f32 %v2016_v17 }
 0x352   : > { %v1089_v21 = vsub.f32 %v1085_v8, %v1088_v20  ;;  %vm1025_vm10 = vmor %vm1023_vm9, %vm1024_vm8  ;;  %vm983_vm8 = vcmask 126016   ;;  %vm1060_vm9 = vcmask 191616  }
 0x353   : > { %v1020_v22 = vsub.f32 1.0, %v1019_v19  ;;  %v1995_v19 = vld [vmem:[%s2515_s25] ss:$0 sm:$0xff]  ;;  %s745_s25 = scalar_lea.vmem %s2516_s3, %s2211_s8  ;;  %s2525_s3 = smov 8  }
 0x354   : > { %v1090_v23 = vmul.f32 1.442695, %v1089_v21 }
 0x355   : > { %v1021_v24 = vmul.f32 %v2016_v17, %v1020_v22 }
 0x356   : > { %2017 = vpow2.f32 %v1090_v23 }
 0x357   : > { %v1022_v25 = vadd.f32 %v2016_v17, %v1021_v24 }
 0x359   : > { %v1026_v30 = vsel %vm1025_vm10, %v2016_v17, %v1022_v25  ;;  %vm1137_vm10 = vcmask 257216   ;;  %v2065_v25 = vmov 32.0  }
 0x35a   : > { %v1031_v32 = vsel %vm1028_vm11, %v1030_v31, %v1026_v30 }
 0x35b   : > { %v1032_v35 = vmul.f32 %v2012_v3, %v1031_v32 }
 0x35c   : > { %v2018_v28 = vpop.eup %2017 }
 0x35d   : > { %v1092_v29 = vsel %vm831_vm1, %v2018_v28, 0.0  ;;  %v1033_v38 = vpack.c.bf16 %v1032_v35, %v1032_v35 }
 0x35e   : > { %1093 = vadd.xlane.f32.xlu2 %v1092_v29 }
 0x361   : > { %v958_v33 = vpop.permute.xlu1 %957 }
 0x362   : > { %v963_v34 = vsel %vm885_vm2, %v958_v33, 0 }
 0x363   : > { %972 = vmatpush.bf16.msrb.mxu0 %v963_v34 }
 0x364   : > { %v1035_v36 = vpop.permute.xlu0 %1034 }
 0x365   : > { %v1040_v37 = vsel %vm885_vm2, %v1035_v36, 0  ;;  %v1965_v36 = vld [vmem:[%s2471_s12 + $0x8] sm:$0xff] }
 0x366   : > { %1049 = vmatpush.bf16.msrb.mxu2 %v1040_v37  ;;  %v752_v37 = vld [vmem:[%s745_s25] sm:$0xff]  ;;  %1284 = vmatpush.bf16.msrb.mxu3 %v1965_v36  ;;  %s2518_s25 = smov 120  }
 0x369   : > { %1881 = vmatmul.msk.bf16.vlgmr.msrb.gmra.mxu2 %vm831_vm1, %v1033_v38  ;;  %v1964_v38 = vld [vmem:[%s2471_s12] sm:$0xff] }
 0x36a   : > { %1285 = vmatpush.bf16.msrb.mxu3 %v1964_v38 }
 0x376   : > { %1111 = vrot.lane.b32.xlu2 %v2230_v18, %s2488_s26  ;;  %s2514_s26 = sld [smem:[#allocation9_spill]] }
 0x37c   : > { %v1961_v12 = vld [vmem:[%s2514_s26 + $0x8] sm:$0xff]  ;;  %v1960_v13 = vld [vmem:[%s2514_s26] sm:$0xff] }
 0x37d   : > { %1164 = vmatpush.bf16.msra.mxu1 %v1961_v12 }
 0x381   : > { %1165 = vmatpush.bf16.msra.mxu1 %v1960_v13 }
 0x3c1   : > { %v940_v39 = vpop.xlane.xlu2 %939 }
 0x3c2   : > { %2019 = vrcp.f32 %v940_v39  ;;  %v952_v44 = vand.u32 2147483648, %v940_v39  ;;  %v950_v45 = vand.u32 2147483647, %v940_v39  ;;  %vm946_vm13 = vweird.f32 %v940_v39 }
 0x3c4   : > { %v953_v47 = vor.u32 1.1754944e-38, %v952_v44  ;;  %vm951_vm15 = vcmp.eq.f32.partialorder %v950_v45, 8.507059e+37 }
 0x3c8   : > { %v2020_v40 = vpop.eup %2019 }
 0x3c9   : > { %v942_v41 = vmul.f32 %v2020_v40, %v940_v39  ;;  %vm947_vm12 = vweird.f32 %v2020_v40  ;;  %v1259_v39 = vpack.c.bf16 %v752_v37, %v752_v37 }
 0x3ca   : > { %vm948_vm14 = vmor %vm946_vm13, %vm947_vm12 }
 0x3cb   : > { %v943_v42 = vsub.f32 1.0, %v942_v41  ;;  %1910 = vmatmul.msk.bf16.vlgmr.msrb.gmra.mxu3 %vm784_vm0, %v1259_v39  ;;  %v1962_v41 = vld [vmem:[%s2469_s10] sm:$0xff] }
 0x3cd   : > { %v944_v43 = vmul.f32 %v2020_v40, %v943_v42 }
 0x3cf   : > { %v945_v46 = vadd.f32 %v2020_v40, %v944_v43 }
 0x3d1   : > { %v1094_v48 = vpop.xlane.xlu2 %1093  ;;  %v949_v49 = vsel %vm948_vm14, %v2020_v40, %v945_v46  ;;  %v1963_v40 = vld [vmem:[%s2469_s10 + $0x8] sm:$0xff] }
 0x3d2   : > { %2021 = vrcp.f32 %v1094_v48  ;;  %v954_v50 = vsel %vm951_vm15, %v953_v47, %v949_v49  ;;  %v1106_v57 = vand.u32 2147483648, %v1094_v48  ;;  %v1104_v59 = vand.u32 2147483647, %v1094_v48  ;;  %1251 = vmatpush.bf16.msra.mxu2 %v1963_v40 }
 0x3d3   : > { %v955_v51 = vmul.f32 %v2014_v15, %v954_v50  ;;  %vm1100_vm4 = vweird.f32 %v1094_v48  ;;  %2023 = vrcp.f32 %v2065_v25 }
 0x3d4   : > { %v1107_v61 = vor.u32 1.1754944e-38, %v1106_v57  ;;  %vm1105_vm6 = vcmp.eq.f32.partialorder %v1104_v59, 8.507059e+37  ;;  %v1998_v57 = vld [vmem:[%s2472_s13] ss:$0 sm:$0xff] }
 0x3d5   : > { %v956_v18 = vpack.c.bf16 %v955_v51, %v955_v51  ;;  %v1996_v51 = vld [vmem:[%s2517_s27] ss:$0 sm:$0xff]  ;;  %s2521_s27 = smov 88  }
 0x3d6   : > { %1252 = vmatpush.bf16.msra.mxu2 %v1962_v41 }
 0x3d7   : > { %1879 = vmatmul.msk.bf16.vlgmr.msrb.gmra.mxu0 %vm831_vm1, %v956_v18 }
 0x3d8   : > { %v2022_v52 = vpop.eup %2021 }
 0x3d9   : > { %v1096_v53 = vmul.f32 %v2022_v52, %v1094_v48  ;;  %v1112_v54 = vpop.permute.xlu2 %1111  ;;  %vm1101_vm3 = vweird.f32 %v2022_v52  ;;  %v2024_v26 = vpop.eup %2023 }
 0x3da   : > { %v1117_v55 = vsel %vm885_vm2, %v1112_v54, 0  ;;  %vm1102_vm5 = vmor %vm1100_vm4, %vm1101_vm3  ;;  %v1178_v27 = vmul.f32 32.0, %v2024_v26  ;;  %vm1182_vm11 = vweird.f32 %v2024_v26 }
 0x3db   : > { %v1097_v56 = vsub.f32 1.0, %v1096_v53  ;;  %1126 = vmatpush.bf16.msra.mxu0 %v1117_v55 }
 0x3dd   : > { %v1098_v58 = vmul.f32 %v2022_v52, %v1097_v56 }
 0x3df   : > { %v1099_v60 = vadd.f32 %v2022_v52, %v1098_v58 }
 0x3e1   : > { %v1103_v62 = vsel %vm1102_vm5, %v2022_v52, %v1099_v60  ;;  %v1997_v52 = vld [vmem:[%s2468_s9] ss:$0 sm:$0xff] }
 0x3e2   : > { %v1108_v63 = vsel %vm1105_vm6, %v1107_v61, %v1103_v62 }
 0x3e3   : > { %v1109_v0 = vmul.f32 %v2018_v28, %v1108_v63  ;;  %v1179_v28 = vsub.f32 1.0, %v1178_v27 }
 0x3e5   : > { %v1110_v1 = vpack.c.bf16 %v1109_v0, %v1109_v0  ;;  %v1180_v29 = vmul.f32 %v2024_v26, %v1179_v28 }
 0x3e7   : > { %1883 = vmatmul.msk.bf16.vlgmr.msra.gmra.mxu0 %vm831_vm1, %v1110_v1  ;;  %v1181_v30 = vadd.f32 %v2024_v26, %v1180_v29  ;;  %v1999_v1 = vld [vmem:[%s2470_s11] ss:$0 sm:$0xff] }
 0x3e9   : > { %v2291_v31 = vsel %vm1182_vm11, %v2024_v26, %v1181_v30 }
 0x3ec   : > { %v1051_v2 = vpop.f32.mrf.mxu2 }
 0x3ed   : > { %v1055_v3 = vpack.c.bf16 %v1051_v2, %v1051_v2 }
 0x3ef   : > { %1057 = vrot.lane.b32.xlu1 %v1055_v3, %s2490_s29  ;;  %s2527_s29 = smov 16  }
 0x3f4   : > { %v1053_v5 = vpop.f32.mrf.mxu2 }
 0x44e   : > { %v1287_v58 = vpop.f32.mrf.mxu3 }
 0x44f   : > { %v1288_v59 = vadd.f32 %v1998_v57, %v1287_v58 }
 0x451   : > { %v1291_v60 = vpack.c.bf16 %v1288_v59, %v1288_v59 }
 0x453   : > { %v1296_v61 = vsel %vm831_vm1, %v1291_v60, 0  ;;  %v1338_v62 = vunpack.c.l.b16 %v1291_v60 }
 0x454   : > { %v974_v6 = vpop.f32.mrf.mxu0  ;;  %1305 = vmatpush.bf16.xpose.msrb.mxu0 %v1296_v61 }
 0x455   : > { %v978_v7 = vpack.c.bf16 %v974_v6, %v974_v6  ;;  %v2328_v63 = vpack.c.b16 %v1338_v62, %v1338_v62 }
 0x456   : > { %v1289_v0 = vpop.f32.mrf.mxu3 }
 0x457   : > { %980 = vrot.lane.b32.xlu0 %v978_v7, %s2492_s7  ;;  %s2523_s7 = smov 72  }
 0x45c   : > { %v976_v8 = vpop.f32.mrf.mxu0 }
 0x461   : > { %v1058_v15 = vpop.permute.xlu1 %1057 }
 0x464   : > { %v1128_v9 = vpop.f32.mrf.mxu0 }
 0x465   : > { %v1132_v10 = vpack.c.bf16 %v1128_v9, %v1128_v9 }
 0x467   : > { %1134 = vrot.lane.b32.xlu2 %v1132_v10, %s2491_s30  ;;  %s2524_s30 = smov 80  }
 0x46c   : > { %v1130_v11 = vpop.f32.mrf.mxu0 }
 0x46f   : > { %1368 = vrot.lane.b32.xlu2 %v2328_v63, %s2518_s25 }
 0x4c1   : > { %v1135_v16 = vpop.permute.xlu2 %1134 }
 0x4c9   : > { %v981_v14 = vpop.permute.xlu0 %980  ;;  %v1369_v9 = vpop.permute.xlu2 %1368 }
 0x4ca   : > { %984 = vst.msk [vmem:[#allocation2] sm:$0xf] %vm983_vm8, %v981_v14  ;;  %v1374_v10 = vsel %vm831_vm1, %v1369_v9, 0 }
 0x4cb   : > { %1061 = vst.msk [vmem:[#allocation2] sm:$0xf] %vm1060_vm9, %v1058_v15  ;;  %1383 = vmatpush.bf16.xpose.msrb.mxu2 %v1374_v10 }
 0x4cc   : > { %1138 = vst.msk [vmem:[#allocation2] sm:$0xf] %vm1137_vm10, %v1135_v16 }
 0x4d3   : > { %v1139_v17 = vld [vmem:[#allocation2] sm:$0xf] }
 0x4d4   : > { %1892 = vmatmul.msk.bf16.vlgmr.msra.gmra.mxu1 %vm784_vm0, %v1139_v17 }
 0x551   : > { %v1167_v20 = vpop.f32.mrf.mxu1 }
 0x552   : > { %v1168_v21 = vadd.f32 %v1995_v19, %v1167_v20 }
 0x554   : > { %v1171_v22 = vadd.f32 %v1168_v21, %v2217_v4 }
 0x556   : > { %v1174_v23 = vsel %vm784_vm0, %v1171_v22, 0.0 }
 0x557   : > { %1175 = vadd.xlane.f32.xlu0 %v1174_v23 }
 0x559   : > { %v1169_v24 = vpop.f32.mrf.mxu1 }
 0x5ca   : > { %v1176_v32 = vpop.xlane.xlu0 %1175 }
 0x5cb   : > { %v1184_v33 = vmul.f32 %v2291_v31, %v1176_v32 }
 0x5cd   : > { %v1185_v34 = vsub.f32 %v1171_v22, %v1184_v33 }
 0x5cf   : > { %v1186_v4 = vmul.f32 %v1185_v34, %v1185_v34 }
 0x5d1   : > { %v1187_v35 = vsel %vm784_vm0, %v1186_v4, 0.0 }
 0x5d2   : > { %1188 = vadd.xlane.f32.xlu1 %v1187_v35 }
 0x645   : > { %v1189_v42 = vpop.xlane.xlu1 %1188 }
 0x646   : > { %v1190_v43 = vmul.f32 %v1189_v42, %v2291_v31 }
 0x648   : > { %v1191_v44 = vadd.f32 1e-05, %v1190_v43 }
 0x64a   : > { %2025 = vrsqrt.f32 %v1191_v44  ;;  %vm1198_vm13 = vweird.f32 %v1191_v44 }
 0x650   : > { %v2026_v45 = vpop.eup %2025 }
 0x651   : > { %v1193_v46 = vmul.f32 %v2026_v45, %v1191_v44  ;;  %vm1199_vm12 = vweird.f32 %v2026_v45 }
 0x652   : > { %vm1200_vm14 = vmor %vm1198_vm13, %vm1199_vm12 }
 0x653   : > { %v1194_v47 = vmul.f32 %v2026_v45, %v1193_v46 }
 0x655   : > { %v1195_v48 = vmul.f32 0.5, %v1194_v47 }
 0x657   : > { %v1196_v49 = vsub.f32 1.5, %v1195_v48 }
 0x659   : > { %v1197_v50 = vmul.f32 %v2026_v45, %v1196_v49 }
 0x65b   : > { %v1201_v18 = vsel %vm1200_vm14, %v2026_v45, %v1197_v50 }
 0x65c   : > { %v1202_v53 = vmul.f32 %v1201_v18, %v1185_v34 }
 0x65e   : > { %v1206_v54 = vmul.f32 %v1996_v51, %v1202_v53 }
 0x660   : > { %v2319_v55 = vadd.f32 %v1997_v52, %v1206_v54 }
 0x662   : > { %v1226_v56 = vpack.c.bf16 %v2319_v55, %v2319_v55 }
 0x664   : > { %1901 = vmatmul.msk.bf16.vlgmr.msra.gmra.mxu2 %vm784_vm0, %v1226_v56 }
 0x6e7   : > { %v1254_v2 = vpop.f32.mrf.mxu2 }
 0x6e8   : > { %v1255_v3 = vadd.f32 %v1999_v1, %v1254_v2 }
 0x6ea   : > { %v1258_v5 = vpack.c.bf16 %v1255_v3, %v1255_v3 }
 0x6ec   : > { %v1364_v6 = vunpack.c.l.b16 %v1258_v5  ;;  %1911 = vmatmul.msk.bf16.vlgmr.msrb.gmra.mxu0 %vm831_vm1, %v1258_v5 }
 0x6ee   : > { %v1365_v7 = vpack.c.b16 %v1364_v6, %v1364_v6 }
 0x6ef   : > { %v1256_v8 = vpop.f32.mrf.mxu2 }
 0x6f0   : > { %1442 = vrot.lane.b32.xlu0 %v1365_v7, %s2519_s4  ;;  %1366 = vrot.lane.b32.xlu2 %v1365_v7, %s2518_s25  ;;  %s2526_s25 = smov 24  }
 0x6f8   : > { %1520 = vrot.lane.b32.xlu2 %v2328_v63, %s2520_s1 }
 0x700   : > { %1518 = vrot.lane.b32.xlu2 %v1365_v7, %s2520_s1  ;;  %s749_s1 = scalar_lea.vmem %s2483_s24, %s2211_s8 }
 0x708   : > { %1444 = vrot.lane.b32.xlu2 %v2328_v63, %s2519_s4 }
 0x74a   : > { %v1367_v11 = vpop.permute.xlu2 %1366 }
 0x74b   : > { %1913 = vmatmul.msk.bf16.vlgmr.msrb.gmra.mxu2 %vm831_vm1, %v1367_v11 }
 0x752   : > { %v1521_v12 = vpop.permute.xlu2 %1520 }
 0x753   : > { %v1526_v13 = vsel %vm831_vm1, %v1521_v12, 0 }
 0x754   : > { %1535 = vmatpush.bf16.xpose.msra.mxu2 %v1526_v13 }
 0x75a   : > { %v1519_v14 = vpop.permute.xlu2 %1518 }
 0x75b   : > { %1917 = vmatmul.msk.bf16.vlgmr.msra.gmra.mxu2 %vm831_vm1, %v1519_v14 }
 0x762   : > { %v1445_v15 = vpop.permute.xlu2 %1444  ;;  %v1443_v19 = vpop.permute.xlu0 %1442 }
 0x763   : > { %v1450_v16 = vsel %vm831_vm1, %v1445_v15, 0 }
 0x764   : > { %1459 = vmatpush.bf16.xpose.msra.mxu0 %v1450_v16 }
 0x769   : > { %v1307_v17 = vpop.f32.mrf.mxu0 }
 0x76a   : > { %v1311_v20 = vmul.f32 0.35355338, %v1307_v17 }
 0x76b   : > { %1915 = vmatmul.msk.bf16.vlgmr.msra.gmra.mxu0 %vm831_vm1, %v1443_v19 }
 0x76c   : > { %v1312_v21 = vsel %vm831_vm1, %v1311_v20, -inf }
 0x76d   : > { %1313 = vmax.xlane.f32.xlu2 %v1312_v21 }
 0x771   : > { %v1309_v22 = vpop.f32.mrf.mxu0 }
 0x7ce   : > { %v1385_v23 = vpop.f32.mrf.mxu2 }
 0x7cf   : > { %v1389_v34 = vmul.f32 0.35355338, %v1385_v23 }
 0x7d1   : > { %v1390_v35 = vsel %vm831_vm1, %v1389_v34, -inf }
 0x7d6   : > { %v1387_v24 = vpop.f32.mrf.mxu2 }
 0x7de   : > { %v1537_v25 = vpop.f32.mrf.mxu2 }
 0x7df   : > { %v1541_v38 = vmul.f32 0.35355338, %v1537_v25 }
 0x7e0   : > { %v1314_v27 = vpop.xlane.xlu2 %1313 }
 0x7e1   : > { %v1315_v30 = vsub.f32 %v1311_v20, %v1314_v27  ;;  %v1542_v39 = vsel %vm831_vm1, %v1541_v38, -inf }
 0x7e3   : > { %v1316_v33 = vmul.f32 1.442695, %v1315_v30 }
 0x7e5   : > { %2027 = vpow2.f32 %v1316_v33 }
 0x7e6   : > { %v1539_v26 = vpop.f32.mrf.mxu2 }
 0x7e8   : > { %v1461_v28 = vpop.f32.mrf.mxu0 }
 0x7e9   : > { %v1465_v29 = vmul.f32 0.35355338, %v1461_v28 }
 0x7eb   : > { %v1466_v32 = vsel %vm831_vm1, %v1465_v29, -inf  ;;  %v2028_v36 = vpop.eup %2027 }
 0x7ec   : > { %1467 = vmax.xlane.f32.xlu1 %v1466_v32  ;;  %v1318_v37 = vsel %vm831_vm1, %v2028_v36, 0.0 }
 0x7f0   : > { %v1463_v4 = vpop.f32.mrf.mxu0 }
 0x7f4   : > { %1391 = vmax.xlane.f32.xlu1 %v1390_v35 }
 0x7fc   : > { %1319 = vadd.xlane.f32.xlu1 %v1318_v37 }
 0x804   : > { %1543 = vmax.xlane.f32.xlu1 %v1542_v39 }
 0x81d   : > { %1415 = vrot.lane.b32.xlu1 %v2328_v63, %s2521_s27 }
 0x85f   : > { %v1468_v40 = vpop.xlane.xlu1 %1467 }
 0x860   : > { %v1469_v41 = vsub.f32 %v1465_v29, %v1468_v40 }
 0x862   : > { %v1470_v42 = vmul.f32 1.442695, %v1469_v41 }
 0x864   : > { %2029 = vpow2.f32 %v1470_v42 }
 0x867   : > { %v1392_v43 = vpop.xlane.xlu1 %1391 }
 0x868   : > { %v1393_v44 = vsub.f32 %v1389_v34, %v1392_v43 }
 0x86a   : > { %v2356_v45 = vpop.eup %2029  ;;  %v1394_v46 = vmul.f32 1.442695, %v1393_v44 }
 0x86b   : > { %v1472_v47 = vsel %vm831_vm1, %v2356_v45, 0.0 }
 0x86c   : > { %2031 = vpow2.f32 %v1394_v46  ;;  %1473 = vadd.xlane.f32.xlu2 %v1472_v47 }
 0x86f   : > { %v1320_v48 = vpop.xlane.xlu1 %1319 }
 0x870   : > { %v1332_v0 = vand.u32 2147483648, %v1320_v48  ;;  %vm1326_vm3 = vweird.f32 %v1320_v48  ;;  %v1330_v1 = vand.u32 2147483647, %v1320_v48 }
 0x872   : > { %v2032_v49 = vpop.eup %2031  ;;  %v1333_v5 = vor.u32 1.1754944e-38, %v1332_v0  ;;  %vm1331_vm5 = vcmp.eq.f32.partialorder %v1330_v1, 8.507059e+37 }
 0x873   : > { %v1396_v50 = vsel %vm831_vm1, %v2032_v49, 0.0 }
 0x874   : > { %1397 = vadd.xlane.f32.xlu0 %v1396_v50 }
 0x877   : > { %v1544_v51 = vpop.xlane.xlu1 %1543 }
 0x878   : > { %v1545_v18 = vsub.f32 %v1541_v38, %v1544_v51 }
 0x87a   : > { %v1546_v52 = vmul.f32 1.442695, %v1545_v18 }
 0x87c   : > { %2033 = vpow2.f32 %v1546_v52 }
 0x87d   : > { %2035 = vrcp.f32 %v1320_v48 }
 0x882   : > { %v2361_v53 = vpop.eup %2033 }
 0x883   : > { %v1548_v54 = vsel %vm831_vm1, %v2361_v53, 0.0  ;;  %v2036_v58 = vpop.eup %2035 }
 0x884   : > { %1340 = vrot.lane.b32.xlu2 %v2328_v63, %s2522_s28  ;;  %1549 = vadd.xlane.f32.xlu1 %v1548_v54  ;;  %v1322_v59 = vmul.f32 %v2036_v58, %v1320_v48  ;;  %vm1327_vm15 = vweird.f32 %v2036_v58 }
 0x885   : > { %vm1328_vm4 = vmor %vm1326_vm3, %vm1327_vm15 }
 0x886   : > { %v1323_v60 = vsub.f32 1.0, %v1322_v59 }
 0x888   : > { %1567 = vrot.lane.b32.xlu0 %v2328_v63, %s2523_s7  ;;  %v1324_v61 = vmul.f32 %v2036_v58, %v1323_v60 }
 0x88a   : > { %v1325_v62 = vadd.f32 %v2036_v58, %v1324_v61 }
 0x88c   : > { %v1329_v3 = vsel %vm1328_vm4, %v2036_v58, %v1325_v62 }
 0x88d   : > { %v1334_v6 = vsel %vm1331_vm5, %v1333_v5, %v1329_v3  ;;  %v1966_v3 = vld [vmem:[%s2473_s14] sm:$0xff] }
 0x88e   : > { %v1335_v7 = vmul.f32 %v2028_v36, %v1334_v6 }
 0x88f   : > { %v1416_v56 = vpop.permute.xlu1 %1415 }
 0x890   : > { %v1421_v57 = vsel %vm885_vm2, %v1416_v56, 0  ;;  %v1336_v10 = vpack.c.bf16 %v1335_v7, %v1335_v7 }
 0x891   : > { %1430 = vmatpush.bf16.msra.mxu3 %v1421_v57 }
 0x89d   : > { %1491 = vrot.lane.b32.xlu1 %v2328_v63, %s2524_s30 }
 0x8df   : > { %v2372_v2 = vpop.xlane.xlu2 %1473 }
 0x8e0   : > { %v1486_v38 = vand.u32 2147483648, %v2372_v2  ;;  %vm1480_vm4 = vweird.f32 %v2372_v2  ;;  %v1484_v40 = vand.u32 2147483647, %v2372_v2 }
 0x8e2   : > { %v1487_v46 = vor.u32 1.1754944e-38, %v1486_v38 }
 0x8e7   : > { %v1341_v8 = vpop.permute.xlu2 %1340  ;;  %v1398_v63 = vpop.xlane.xlu0 %1397 }
 0x8e8   : > { %v1346_v9 = vsel %vm885_vm2, %v1341_v8, 0  ;;  %2037 = vrcp.f32 %v1398_v63  ;;  %v1410_v14 = vand.u32 2147483648, %v1398_v63  ;;  %v1408_v16 = vand.u32 2147483647, %v1398_v63 }
 0x8e9   : > { %1355 = vmatpush.bf16.msrb.mxu1 %v1346_v9  ;;  %2039 = vrcp.f32 %v2372_v2  ;;  %vm1404_vm11 = vweird.f32 %v1398_v63 }
 0x8ea   : > { %v1411_v20 = vor.u32 1.1754944e-38, %v1410_v14  ;;  %vm1409_vm13 = vcmp.eq.f32.partialorder %v1408_v16, 8.507059e+37 }
 0x8ec   : > { %1912 = vmatmul.msk.bf16.vlgmr.msrb.gmra.mxu1 %vm831_vm1, %v1336_v10 }
 0x8ee   : > { %v2038_v11 = vpop.eup %2037 }
 0x8ef   : > { %v1400_v12 = vmul.f32 %v2038_v11, %v1398_v63  ;;  %vm1405_vm6 = vweird.f32 %v2038_v11  ;;  %v2040_v17 = vpop.eup %2039  ;;  %v2000_v63 = vld [vmem:[%s2474_s15] ss:$0 sm:$0xff] }
 0x8f0   : > { %vm1406_vm12 = vmor %vm1404_vm11, %vm1405_vm6  ;;  %v1476_v23 = vmul.f32 %v2040_v17, %v2372_v2  ;;  %vm1481_vm15 = vweird.f32 %v2040_v17  ;;  %v1967_v2 = vld [vmem:[%s2473_s14 + $0x8] sm:$0xff] }
 0x8f1   : > { %v1401_v13 = vsub.f32 1.0, %v1400_v12  ;;  %vm1482_vm6 = vmor %vm1480_vm4, %vm1481_vm15  ;;  %1619 = vmatpush.bf16.msrb.mxu0 %v1967_v2 }
 0x8f2   : > { %v1477_v29 = vsub.f32 1.0, %v1476_v23 }
 0x8f3   : > { %v1402_v15 = vmul.f32 %v2038_v11, %v1401_v13 }
 0x8f4   : > { %v1478_v33 = vmul.f32 %v2040_v17, %v1477_v29 }
 0x8f5   : > { %v1403_v19 = vadd.f32 %v2038_v11, %v1402_v15  ;;  %1620 = vmatpush.bf16.msrb.mxu0 %v1966_v3 }
 0x8f6   : > { %v1479_v37 = vadd.f32 %v2040_v17, %v1478_v33  ;;  %v2001_v33 = vld [vmem:[%s2475_s16] ss:$0 sm:$0xff] }
 0x8f7   : > { %v1407_v21 = vsel %vm1406_vm12, %v2038_v11, %v1403_v19  ;;  %v1550_v22 = vpop.xlane.xlu1 %1549  ;;  %vm1485_vm12 = vcmp.eq.f32.partialorder %v1484_v40, 8.507059e+37  ;;  %v1970_v40 = vld [vmem:[%s2479_s20] sm:$0xff] }
 0x8f8   : > { %v1412_v24 = vsel %vm1409_vm13, %v1411_v20, %v1407_v21  ;;  %2041 = vrcp.f32 %v1550_v22  ;;  %v1562_v4 = vand.u32 2147483648, %v1550_v22  ;;  %v1560_v36 = vand.u32 2147483647, %v1550_v22  ;;  %v1969_v20 = vld [vmem:[%s2477_s18 + $0x8] sm:$0xff]  ;;  %v1973_v21 = vld [vmem:[%s2479_s20 + $0x18] sm:$0xff] }
 0x8f9   : > { %v1413_v25 = vmul.f32 %v2032_v49, %v1412_v24  ;;  %vm1556_vm3 = vweird.f32 %v1550_v22  ;;  %v1483_v43 = vsel %vm1482_vm6, %v2040_v17, %v1479_v37  ;;  %1742 = vmatpush.bf16.msrb.mxu2 %v1973_v21  ;;  %v1972_v24 = vld [vmem:[%s2479_s20 + $0x10] sm:$0xff] }
 0x8fa   : > { %v1568_v26 = vpop.permute.xlu0 %1567  ;;  %v1563_v41 = vor.u32 1.1754944e-38, %v1562_v4  ;;  %vm1561_vm11 = vcmp.eq.f32.partialorder %v1560_v36, 8.507059e+37  ;;  %v1488_v48 = vsel %vm1485_vm12, %v1487_v46, %v1483_v43  ;;  %v2002_v4 = vld [vmem:[%s2476_s17] ss:$0 sm:$0xff] }
 0x8fb   : > { %v1573_v27 = vsel %vm885_vm2, %v1568_v26, 0  ;;  %v1414_v28 = vpack.c.bf16 %v1413_v25, %v1413_v25  ;;  %v1489_v50 = vmul.f32 %v2356_v45, %v1488_v48  ;;  %v2004_v48 = vld [vmem:[%s2480_s21] ss:$0 sm:$0xff] }
 0x8fc   : > { %1582 = vmatpush.bf16.msrb.mxu3 %v1573_v27 }
 0x8fd   : > { %1914 = vmatmul.msk.bf16.vlgmr.msra.gmra.mxu3 %vm831_vm1, %v1414_v28  ;;  %v1490_v52 = vpack.c.bf16 %v1489_v50, %v1489_v50  ;;  %1743 = vmatpush.bf16.msrb.mxu2 %v1972_v24 }
 0x8fe   : > { %v2042_v30 = vpop.eup %2041 }
 0x8ff   : > { %v1552_v32 = vmul.f32 %v2042_v30, %v1550_v22  ;;  %vm1557_vm14 = vweird.f32 %v2042_v30 }
 0x900   : > { %vm1558_vm5 = vmor %vm1556_vm3, %vm1557_vm14 }
 0x901   : > { %v1553_v34 = vsub.f32 1.0, %v1552_v32 }
 0x903   : > { %v1554_v35 = vmul.f32 %v2042_v30, %v1553_v34 }
 0x905   : > { %v1555_v39 = vadd.f32 %v2042_v30, %v1554_v35 }
 0x907   : > { %v1559_v42 = vsel %vm1558_vm5, %v2042_v30, %v1555_v39  ;;  %v1971_v39 = vld [vmem:[%s2479_s20 + $0x8] sm:$0xff] }
 0x908   : > { %v1564_v44 = vsel %vm1561_vm11, %v1563_v41, %v1559_v42  ;;  %1744 = vmatpush.bf16.msrb.mxu2 %v1971_v39  ;;  %v2003_v41 = vld [vmem:[%s2478_s19] ss:$0 sm:$0xff] }
 0x909   : > { %v1565_v47 = vmul.f32 %v2361_v53, %v1564_v44 }
 0x90b   : > { %v1566_v49 = vpack.c.bf16 %v1565_v47, %v1565_v47 }
 0x90c   : > { %1745 = vmatpush.bf16.msrb.mxu2 %v1970_v40 }
 0x90d   : > { %1918 = vmatmul.msk.bf16.vlgmr.msrb.gmra.mxu3 %vm831_vm1, %v1566_v49 }
 0x90f   : > { %v1492_v51 = vpop.permute.xlu1 %1491 }
 0x910   : > { %v1497_v18 = vsel %vm885_vm2, %v1492_v51, 0 }
 0x911   : > { %1506 = vmatpush.bf16.msra.mxu1 %v1497_v18 }
 0x914   : > { %1916 = vmatmul.msk.bf16.vlgmr.msra.gmra.mxu1 %vm831_vm1, %v1490_v52 }
 0x915   : > { %1689 = vmatpush.bf16.msrb.mxu1 %v1969_v20 }
 0x969   : > { %v1357_v54 = vpop.f32.mrf.mxu1 }
 0x96a   : > { %v1361_v56 = vpack.c.bf16 %v1357_v54, %v1357_v54 }
 0x96c   : > { %1362 = vst.msk [vmem:[#allocation2] sm:$0xf] %vm903_vm7, %v1361_v56 }
 0x971   : > { %v1359_v57 = vpop.f32.mrf.mxu1 }
 0x980   : > { %v1432_v53 = vpop.f32.mrf.mxu3 }
 0x981   : > { %v1436_v58 = vpack.c.bf16 %v1432_v53, %v1432_v53 }
 0x983   : > { %1438 = vrot.lane.b32.xlu1 %v1436_v58, %s2525_s3 }
 0x988   : > { %v1434_v59 = vpop.f32.mrf.mxu3 }
 0x990   : > { %v1584_v60 = vpop.f32.mrf.mxu3 }
 0x991   : > { %v1588_v61 = vpack.c.bf16 %v1584_v60, %v1584_v60  ;;  %v1508_v45 = vpop.f32.mrf.mxu1 }
 0x992   : > { %v1512_v62 = vpack.c.bf16 %v1508_v45, %v1508_v45 }
 0x993   : > { %1590 = vrot.lane.b32.xlu0 %v1588_v61, %s2526_s25 }
 0x994   : > { %1514 = vrot.lane.b32.xlu2 %v1512_v62, %s2527_s29 }
 0x998   : > { %v1586_v0 = vpop.f32.mrf.mxu3 }
 0x999   : > { %v1510_v1 = vpop.f32.mrf.mxu1 }
 0x9ee   : > { %v1515_v6 = vpop.permute.xlu2 %1514 }
 0x9f5   : > { %v1439_v5 = vpop.permute.xlu1 %1438 }
 0x9f6   : > { %1441 = vst.msk [vmem:[#allocation2] sm:$0xf] %vm983_vm8, %v1439_v5  ;;  %vm1734_vm8 = vcmask 523264   ;;  %v2005_v5 = vld [vmem:[%s2481_s22] ss:$0 sm:$0xff] }
 0x9f7   : > { %1517 = vst.msk [vmem:[#allocation2] sm:$0xf] %vm1060_vm9, %v1515_v6 }
 0xa05   : > { %v1591_v7 = vpop.permute.xlu0 %1590 }
 0xa06   : > { %1593 = vst.msk [vmem:[#allocation2] sm:$0xf] %vm1137_vm10, %v1591_v7 }
 0xa0d   : > { %v1594_v8 = vld [vmem:[#allocation2] sm:$0xf] }
 0xa0e   : > { %1927 = vmatmul.msk.bf16.vlgmr.msrb.gmra.mxu0 %vm784_vm0, %v1594_v8 }
 0xa8b   : > { %v1622_v9 = vpop.f32.mrf.mxu0 }
 0xa8c   : > { %v1623_v10 = vadd.f32 %v2000_v63, %v1622_v9 }
 0xa8e   : > { %v1626_v11 = vadd.f32 %v1623_v10, %v2319_v55  ;;  %v1968_v55 = vld [vmem:[%s2477_s18] sm:$0xff] }
 0xa8f   : > { %1690 = vmatpush.bf16.msrb.mxu1 %v1968_v55 }
 0xa90   : > { %v1629_v12 = vsel %vm784_vm0, %v1626_v11, 0.0 }
 0xa91   : > { %1630 = vadd.xlane.f32.xlu1 %v1629_v12 }
 0xa93   : > { %v1624_v13 = vpop.f32.mrf.mxu0 }
 0xb04   : > { %v1631_v14 = vpop.xlane.xlu1 %1630 }
 0xb05   : > { %v1632_v15 = vmul.f32 %v1631_v14, %v2291_v31 }
 0xb07   : > { %v1633_v16 = vsub.f32 %v1626_v11, %v1632_v15 }
 0xb09   : > { %v1634_v17 = vmul.f32 %v1633_v16, %v1633_v16 }
 0xb0b   : > { %v1635_v19 = vsel %vm784_vm0, %v1634_v17, 0.0 }
 0xb0c   : > { %1636 = vadd.xlane.f32.xlu2 %v1635_v19 }
 0xb7f   : > { %v1637_v22 = vpop.xlane.xlu2 %1636 }
 0xb80   : > { %v1638_v23 = vmul.f32 %v1637_v22, %v2291_v31 }
 0xb82   : > { %v1639_v25 = vadd.f32 1e-05, %v1638_v23 }
 0xb84   : > { %2043 = vrsqrt.f32 %v1639_v25  ;;  %vm1646_vm2 = vweird.f32 %v1639_v25 }
 0xb8a   : > { %v2044_v26 = vpop.eup %2043 }
 0xb8b   : > { %v1641_v27 = vmul.f32 %v2044_v26, %v1639_v25  ;;  %vm1647_vm1 = vweird.f32 %v2044_v26 }
 0xb8c   : > { %vm1648_vm7 = vmor %vm1646_vm2, %vm1647_vm1 }
 0xb8d   : > { %v1642_v28 = vmul.f32 %v2044_v26, %v1641_v27 }
 0xb8f   : > { %v1643_v29 = vmul.f32 0.5, %v1642_v28 }
 0xb91   : > { %v1644_v30 = vsub.f32 1.5, %v1643_v29 }
 0xb93   : > { %v1645_v32 = vmul.f32 %v2044_v26, %v1644_v30 }
 0xb95   : > { %v1649_v34 = vsel %vm1648_vm7, %v2044_v26, %v1645_v32 }
 0xb96   : > { %v1650_v35 = vmul.f32 %v1649_v34, %v1633_v16 }
 0xb98   : > { %v1654_v36 = vmul.f32 %v2001_v33, %v1650_v35 }
 0xb9a   : > { %v1658_v37 = vadd.f32 %v2002_v4, %v1654_v36 }
 0xb9c   : > { %v1659_v38 = vpack.c.bf16 %v1658_v37, %v1658_v37 }
 0xb9e   : > { %1936 = vmatmul.msk.bf16.vlgmr.msrb.gmra.mxu1 %vm784_vm0, %v1659_v38 }
 0xc1b   : > { %v1692_v42 = vpop.f32.mrf.mxu1 }
 0xc1c   : > { %v1693_v43 = vadd.f32 %v2003_v41, %v1692_v42 }
 0xc1e   : > { %v1696_v44 = vmax.f32 %v1693_v43, 0.0 }
 0xc20   : > { %v1697_v46 = vpack.c.bf16 %v1696_v44, %v1696_v44 }
 0xc22   : > { %1953 = vmatmul.msk.bf16.vlgmr.msrb.gmra.mxu2 %vm1734_vm8, %v1697_v46 }
 0xc23   : > { %v1694_v47 = vpop.f32.mrf.mxu1 }
 0xca5   : > { %v1747_v49 = vpop.f32.mrf.mxu2 }
 0xca6   : > { %v1748_v50 = vadd.f32 %v2004_v48, %v1747_v49 }
 0xca8   : > { %v1751_v51 = vadd.f32 %v1748_v50, %v1658_v37 }
 0xcaa   : > { %v1754_v18 = vsel %vm784_vm0, %v1751_v51, 0.0 }
 0xcab   : > { %1755 = vadd.xlane.f32.xlu0 %v1754_v18 }
 0xcad   : > { %v1749_v52 = vpop.f32.mrf.mxu2 }
 0xd1e   : > { %v1756_v54 = vpop.xlane.xlu0 %1755 }
 0xd1f   : > { %v1757_v56 = vmul.f32 %v1756_v54, %v2291_v31 }
 0xd21   : > { %v1758_v57 = vsub.f32 %v1751_v51, %v1757_v56 }
 0xd23   : > { %v1759_v53 = vmul.f32 %v1758_v57, %v1758_v57 }
 0xd25   : > { %v1760_v58 = vsel %vm784_vm0, %v1759_v53, 0.0 }
 0xd26   : > { %1761 = vadd.xlane.f32.xlu1 %v1760_v58 }
 0xd99   : > { %v1762_v59 = vpop.xlane.xlu1 %1761 }
 0xd9a   : > { %v1763_v60 = vmul.f32 %v1762_v59, %v2291_v31  ;;  %v2006_v31 = vld [vmem:[%s2482_s23] ss:$0 sm:$0xff] }
 0xd9c   : > { %v1764_v61 = vadd.f32 1e-05, %v1763_v60 }
 0xd9e   : > { %2045 = vrsqrt.f32 %v1764_v61  ;;  %vm1771_vm10 = vweird.f32 %v1764_v61 }
 0xda4   : > { %v2046_v45 = vpop.eup %2045 }
 0xda5   : > { %v1766_v62 = vmul.f32 %v2046_v45, %v1764_v61  ;;  %vm1772_vm9 = vweird.f32 %v2046_v45 }
 0xda6   : > { %vm1773_vm13 = vmor %vm1771_vm10, %vm1772_vm9 }
 0xda7   : > { %v1767_v0 = vmul.f32 %v2046_v45, %v1766_v62 }
 0xda9   : > { %v1768_v1 = vmul.f32 0.5, %v1767_v0 }
 0xdab   : > { %v1769_v2 = vsub.f32 1.5, %v1768_v1 }
 0xdad   : > { %v1770_v3 = vmul.f32 %v2046_v45, %v1769_v2 }
 0xdaf   : > { %v1774_v6 = vsel %vm1773_vm13, %v2046_v45, %v1770_v3 }
 0xdb0   : > { %v1775_v7 = vmul.f32 %v1774_v6, %v1758_v57 }
 0xdb2   : > { %v1779_v8 = vmul.f32 %v2005_v5, %v1775_v7 }
 0xdb4   : > { %v1783_v63 = vadd.f32 %v2006_v31, %v1779_v8 }
 0xdb6   : > { %1784 = vst.msk [vmem:[%s749_s1] sm:$0xff] %vm784_vm0, %v1783_v63 }
 0xdb7 PF: > { %s34_s5 = sadd.s32 1, %s2053_s5  }
 0xdb8   : > { %p31_p4 = scmp.ge.s32.totalorder %s34_s5, 4  }
 0xdba   :  { %33 = sbr.rel (!%p31_p4) target bundleno = 10 (0xa), region = 149 }

</bundles_post_ra>
